<compile_context>
chip_gen: v6e
topology: v6e:2x2x1
jax: 0.10.0
libtpu: 0.0.40
codegen_flags: <defaults>
</compile_context>

<pallas_src>
import functools

import jax
import jax.numpy as jnp
from jax.experimental import pallas as pl
from jax.experimental.pallas import tpu as pltpu


def conv_block_kernel(xp_ref, w1_ref, s1_ref, b1_ref, w2_ref, s2_ref, b2_ref,
                      out_ref, y1p_ref, patch_ref, *, pool_type):
    """
    xp_ref   : (1, H+2, W+2, Cin_p)   zero-padded NHWC input tile (compute dtype)
    w1_ref   : (9*Cin_p, Cout_p)      conv1 weights, tap-major rows (kh*3+kw)
    s1/b1    : (1, Cout_p)            folded BN1 scale / shift (f32)
    w2_ref   : (9*Cout_p, Cout_p)     conv2 weights
    s2/b2    : (1, Cout_p)            folded BN2 scale / shift (f32)
    out_ref  : (1, H//2, W//2, Cout_p)
    y1p_ref  : (1, H+2, W+2, Cout_p)  VMEM scratch: padded conv1 activations
    patch_ref: (H*W, 9*max(Cin_p, Cout_p)) VMEM scratch: im2col patch
    """
    _, hp, wp, cin = xp_ref.shape
    h, w = hp - 2, wp - 2
    cout = w2_ref.shape[-1]
    cdt = patch_ref.dtype

    def conv3x3(src_ref, w_ref, c):
        # im2col into VMEM scratch: 9 lane-aligned column-block writes, then a
        # single MXU matmul with K = 9*c (fills the systolic array, no
        # accumulator chain of full-size VPU adds).
        for kh in range(3):
            for kw in range(3):
                t = kh * 3 + kw
                tap = src_ref[:, kh:kh + h, kw:kw + w, :].reshape(h * w, c)
                patch_ref[:, t * c:(t + 1) * c] = tap.astype(cdt)
        return jnp.dot(patch_ref[:, :9 * c], w_ref[...],
                       preferred_element_type=jnp.float32)

    # ---- conv1 -> folded BN1 -> ReLU (f32) ----
    y1 = jnp.maximum(conv3x3(xp_ref, w1_ref, cin) * s1_ref[...] + b1_ref[...],
                     0.0)

    # Stage conv1 activations into the zero-padded scratch for conv2.
    # Only the 1-wide halo is zeroed; the interior is fully overwritten every
    # step.  (Halo is re-zeroed each step: the scratch persists per core and
    # the "parallel" batch axis may be split across cores, so a
    # program_id == 0 guard would be unsafe.)
    y1p_ref[:, 1:1 + h, 1:1 + w, :] = y1.reshape(1, h, w, cout).astype(cdt)
    zrow = jnp.zeros((1, 1, wp, cout), cdt)
    y1p_ref[:, 0:1, :, :] = zrow
    y1p_ref[:, hp - 1:hp, :, :] = zrow
    zcol = jnp.zeros((1, hp, 1, cout), cdt)
    y1p_ref[:, :, 0:1, :] = zcol
    y1p_ref[:, :, wp - 1:wp, :] = zcol

    # ---- conv2 -> folded BN2 -> ReLU (f32) ----
    y2 = jnp.maximum(conv3x3(y1p_ref, w2_ref, cout) * s2_ref[...] + b2_ref[...],
                     0.0)                                     # (h*w, cout)

    # ---- 2x2 / stride-2 pooling ----
    # Pair H rows first: splitting the flattened-row (major) dim is
    # relayout-free, so the sublane-splitting W pairing runs on half the data.
    y2 = y2.reshape(h // 2, 2, w, cout)
    r0 = y2[:, 0, :, :]
    r1 = y2[:, 1, :, :]

    def wpool(t, op):                       # pair adjacent W columns
        t = t.reshape(h // 2, w // 2, 2, cout)
        return op(t[:, :, 0, :], t[:, :, 1, :])

    if pool_type == "avg":
        out = wpool(r0 + r1, jnp.add) * 0.25
    elif pool_type == "max":
        out = wpool(jnp.maximum(r0, r1), jnp.maximum)
    elif pool_type == "avg+max":
        out = (wpool(r0 + r1, jnp.add) * 0.25
               + wpool(jnp.maximum(r0, r1), jnp.maximum))
    else:
        raise ValueError(f"unsupported pool_type {pool_type}")

    out_ref[...] = out.reshape(1, h // 2, w // 2, cout).astype(out_ref.dtype)


def conv_block_forward(x_nchw, w1_oihw, w2_oihw, bn1, bn2,
                       pool_size=(2, 2), pool_type="avg", eps=1e-5,
                       compute_dtype=jnp.bfloat16):
    """Pallas implementation of ConvBlock.forward (NCHW in, NCHW out)."""
    assert pool_size == (2, 2), "kernel is specialized for 2x2 pooling"
    n, cin, h, w = x_nchw.shape
    cout = w1_oihw.shape[0]
    assert h % 2 == 0 and w % 2 == 0

    lane = 128
    cin_p = ((cin + lane - 1) // lane) * lane
    cout_p = ((cout + lane - 1) // lane) * lane

    # ---- glue (plain JAX): layout, spatial + channel padding, BN folding ----
    x_nhwc = jnp.transpose(x_nchw, (0, 2, 3, 1))
    xp = jnp.pad(x_nhwc, ((0, 0), (1, 1), (1, 1), (0, cin_p - cin)))
    xp = xp.astype(compute_dtype)

    def prep_w(w_oihw, ci, ci_p):
        wt = jnp.transpose(w_oihw, (2, 3, 1, 0))                  # (3,3,ci,co)
        wt = jnp.pad(wt, ((0, 0), (0, 0), (0, ci_p - ci), (0, cout_p - cout)))
        return wt.reshape(9 * ci_p, cout_p).astype(compute_dtype)

    w1 = prep_w(w1_oihw, cin, cin_p)
    w2 = prep_w(w2_oihw, cout, cout_p)

    def fold_bn(params):
        gamma, beta, mean, var = params
        scale = gamma / jnp.sqrt(var + eps)
        shift = beta - mean * scale
        scale = jnp.pad(scale, (0, cout_p - cout)).reshape(1, cout_p)
        shift = jnp.pad(shift, (0, cout_p - cout)).reshape(1, cout_p)
        return scale.astype(jnp.float32), shift.astype(jnp.float32)

    s1, b1 = fold_bn(bn1)
    s2, b2 = fold_bn(bn2)

    cmax = max(cin_p, cout_p)
    isz = jnp.dtype(compute_dtype).itemsize
    # rough per-core VMEM budget: double-buffered tiles + weights + scratches
    est = (2 * (h + 2) * (w + 2) * cin_p * isz
           + 2 * (h // 2) * (w // 2) * cout_p * 4
           + (9 * cin_p + 9 * cout_p + 4) * cout_p * isz
           + (h + 2) * (w + 2) * cout_p * isz
           + h * w * 9 * cmax * isz
           + 4 * h * w * cout_p * 4)
    vmem_limit = int(min(64 * 2**20, max(32 * 2**20, 2 * est)))

    out_nhwc = pl.pallas_call(
        functools.partial(conv_block_kernel, pool_type=pool_type),
        out_shape=jax.ShapeDtypeStruct((n, h // 2, w // 2, cout_p),
                                       jnp.float32),
        grid_spec=pltpu.PrefetchScalarGridSpec(
            num_scalar_prefetch=0,
            grid=(n,),
            in_specs=[
                pl.BlockSpec((1, h + 2, w + 2, cin_p),
                             lambda b: (b, 0, 0, 0)),
                pl.BlockSpec((9 * cin_p, cout_p), lambda b: (0, 0)),
                pl.BlockSpec((1, cout_p), lambda b: (0, 0)),
                pl.BlockSpec((1, cout_p), lambda b: (0, 0)),
                pl.BlockSpec((9 * cout_p, cout_p), lambda b: (0, 0)),
                pl.BlockSpec((1, cout_p), lambda b: (0, 0)),
                pl.BlockSpec((1, cout_p), lambda b: (0, 0)),
            ],
            out_specs=pl.BlockSpec((1, h // 2, w // 2, cout_p),
                                   lambda b: (b, 0, 0, 0)),
            scratch_shapes=[
                pltpu.VMEM((1, h + 2, w + 2, cout_p), compute_dtype),
                pltpu.VMEM((h * w, 9 * cmax), compute_dtype),
            ],
        ),
        compiler_params=pltpu.CompilerParams(
            dimension_semantics=("parallel",),
            vmem_limit_bytes=vmem_limit,
        ),
    )(xp, w1, s1, b1, w2, s2, b2)

    out_nhwc = out_nhwc[:, :, :, :cout]            # drop channel padding
    return jnp.transpose(out_nhwc, (0, 3, 1, 2))   # back to NCHW


def conv_block_reference(x, w1, w2, bn1, bn2, pool_type="avg", eps=1e-5,
                         compute_dtype=jnp.float32):
    """Pure-JAX reference mirroring the PyTorch module (eval-mode BN)."""
    def conv(a, w):
        return jax.lax.conv_general_dilated(
            a.astype(compute_dtype), w.astype(compute_dtype),
            window_strides=(1, 1), padding=((1, 1), (1, 1)),
            dimension_numbers=("NCHW", "OIHW", "NCHW"),
            preferred_element_type=jnp.float32)

    def bn(a, params):
        g, b, m, v = (p[None, :, None, None] for p in params)
        return (a - m) / jnp.sqrt(v + eps) * g + b

    y = jax.nn.relu(bn(conv(x, w1), bn1))
    y = jax.nn.relu(bn(conv(y, w2), bn2))
    n, c, hh, ww = y.shape
    yr = y.reshape(n, c, hh // 2, 2, ww // 2, 2)
    avg = yr.mean(axis=(3, 5))
    mx = yr.max(axis=(3, 5))
    if pool_type == "avg":
        return avg
    if pool_type == "max":
        return mx
    if pool_type == "avg+max":
        return avg + mx
    raise ValueError(pool_type)


if __name__ == "__main__":
    N, Cin, Cout, H, W = 2, 4, 8, 16, 16

    keys = jax.random.split(jax.random.PRNGKey(0), 11)
    x = jax.random.normal(keys[0], (N, Cin, H, W), jnp.float32)
    w1 = jax.random.normal(keys[1], (Cout, Cin, 3, 3), jnp.float32) * 0.2
    w2 = jax.random.normal(keys[2], (Cout, Cout, 3, 3), jnp.float32) * 0.2
    bn1 = (1.0 + 0.1 * jax.random.normal(keys[3], (Cout,), jnp.float32),   # gamma
           0.1 * jax.random.normal(keys[4], (Cout,), jnp.float32),         # beta
           0.1 * jax.random.normal(keys[5], (Cout,), jnp.float32),         # running_mean
           1.0 + 0.1 * jnp.abs(jax.random.normal(keys[6], (Cout,), jnp.float32)))
    bn2 = (1.0 + 0.1 * jax.random.normal(keys[7], (Cout,), jnp.float32),
           0.1 * jax.random.normal(keys[8], (Cout,), jnp.float32),
           0.1 * jax.random.normal(keys[9], (Cout,), jnp.float32),
           1.0 + 0.1 * jnp.abs(jax.random.normal(keys[10], (Cout,), jnp.float32)))

    # Exact-semantics check: f32 compute path vs f32 reference.
    out = jax.block_until_ready(
        conv_block_forward(x, w1, w2, bn1, bn2, pool_type="avg",
                           compute_dtype=jnp.float32))
    ref = conv_block_reference(x, w1, w2, bn1, bn2, pool_type="avg")
    assert out.shape == (N, Cout, H // 2, W // 2), out.shape
    assert jnp.allclose(out, ref, rtol=1e-4, atol=2e-4), \
        float(jnp.max(jnp.abs(out - ref)))

    # Fast path: bf16 MXU operands with f32 accumulation, all pool types,
    # checked against a reference that rounds conv operands to bf16 the same way.
    for pt in ("avg", "max", "avg+max"):
        out_bf = jax.block_until_ready(
            conv_block_forward(x, w1, w2, bn1, bn2, pool_type=pt,
                               compute_dtype=jnp.bfloat16))
        ref_bf = conv_block_reference(x, w1, w2, bn1, bn2, pool_type=pt,
                                      compute_dtype=jnp.bfloat16)
        assert out_bf.shape == (N, Cout, H // 2, W // 2)
        assert jnp.allclose(out_bf, ref_bf, rtol=1e-3, atol=1e-3), \
            (pt, float(jnp.max(jnp.abs(out_bf - ref_bf))))

    print("KERNEL_OK")
</pallas_src>

<mosaic_0001>
module attributes {stable_mosaic.version = 11 : i64} {
  func.func @conv_block_kernel(%arg0: i32, %arg1: memref<1x18x18x128xf32, #tpu.memory_space<vmem>>, %arg2: memref<1152x128xf32, #tpu.memory_space<vmem>>, %arg3: memref<1x128xf32, #tpu.memory_space<vmem>>, %arg4: memref<1x128xf32, #tpu.memory_space<vmem>>, %arg5: memref<1152x128xf32, #tpu.memory_space<vmem>>, %arg6: memref<1x128xf32, #tpu.memory_space<vmem>>, %arg7: memref<1x128xf32, #tpu.memory_space<vmem>>, %arg8: memref<1x8x8x128xf32, #tpu.memory_space<vmem>>, %arg9: memref<1x18x18x128xf32, #tpu.memory_space<vmem>>, %arg10: memref<256x1152xf32, #tpu.memory_space<vmem>>) attributes {dimension_semantics = [#tpu.dimension_semantics<parallel>], iteration_bounds = array<i64: 2>, scalar_prefetch = 0 : i64, scratch_operands = 2 : i64, tpu.core_type = #tpu.core_type<tc>, window_params = [{transform_indices = @transform_0, window_bounds = array<i64: 1, 18, 18, 128>}, {pipeline_mode = #tpu.pipeline_mode<synchronous>, transform_indices = @transform_1, window_bounds = array<i64: 1152, 128>}, {pipeline_mode = #tpu.pipeline_mode<synchronous>, transform_indices = @transform_2, window_bounds = array<i64: 1, 128>}, {pipeline_mode = #tpu.pipeline_mode<synchronous>, transform_indices = @transform_3, window_bounds = array<i64: 1, 128>}, {pipeline_mode = #tpu.pipeline_mode<synchronous>, transform_indices = @transform_4, window_bounds = array<i64: 1152, 128>}, {pipeline_mode = #tpu.pipeline_mode<synchronous>, transform_indices = @transform_5, window_bounds = array<i64: 1, 128>}, {pipeline_mode = #tpu.pipeline_mode<synchronous>, transform_indices = @transform_6, window_bounds = array<i64: 1, 128>}, {transform_indices = @transform_7, window_bounds = array<i64: 1, 8, 8, 128>}]} {
    %c0 = arith.constant 0 : index
    %c0_0 = arith.constant 0 : index
    %c0_1 = arith.constant 0 : index
    %c0_2 = arith.constant 0 : index
    %0 = vector.load %arg1[%c0, %c0_0, %c0_1, %c0_2] : memref<1x18x18x128xf32, #tpu.memory_space<vmem>>, vector<1x16x16x128xf32>
    %1 = vector.shape_cast %0 : vector<1x16x16x128xf32> to vector<256x128xf32>
    %c0_3 = arith.constant 0 : index
    %c0_4 = arith.constant 0 : index
    %2 = vector.load %arg10[%c0_3, %c0_4] : memref<256x1152xf32, #tpu.memory_space<vmem>>, vector<256x128xf32>
    tpu.vector_store %arg10[%c0_3, %c0_4], %1 {strides = array<i32>} : memref<256x1152xf32, #tpu.memory_space<vmem>>, vector<256x128xf32>,
    %c0_5 = arith.constant 0 : index
    %c0_6 = arith.constant 0 : index
    %c1 = arith.constant 1 : index
    %c0_7 = arith.constant 0 : index
    %3 = vector.load %arg1[%c0_5, %c0_6, %c1, %c0_7] : memref<1x18x18x128xf32, #tpu.memory_space<vmem>>, vector<1x16x16x128xf32>
    %4 = vector.shape_cast %3 : vector<1x16x16x128xf32> to vector<256x128xf32>
    %c0_8 = arith.constant 0 : index
    %c128 = arith.constant 128 : index
    %5 = vector.load %arg10[%c0_8, %c128] : memref<256x1152xf32, #tpu.memory_space<vmem>>, vector<256x128xf32>
    tpu.vector_store %arg10[%c0_8, %c128], %4 {strides = array<i32>} : memref<256x1152xf32, #tpu.memory_space<vmem>>, vector<256x128xf32>,
    %c0_9 = arith.constant 0 : index
    %c0_10 = arith.constant 0 : index
    %c2 = arith.constant 2 : index
    %c0_11 = arith.constant 0 : index
    %6 = vector.load %arg1[%c0_9, %c0_10, %c2, %c0_11] : memref<1x18x18x128xf32, #tpu.memory_space<vmem>>, vector<1x16x16x128xf32>
    %7 = vector.shape_cast %6 : vector<1x16x16x128xf32> to vector<256x128xf32>
    %c0_12 = arith.constant 0 : index
    %c256 = arith.constant 256 : index
    %8 = vector.load %arg10[%c0_12, %c256] : memref<256x1152xf32, #tpu.memory_space<vmem>>, vector<256x128xf32>
    tpu.vector_store %arg10[%c0_12, %c256], %7 {strides = array<i32>} : memref<256x1152xf32, #tpu.memory_space<vmem>>, vector<256x128xf32>,
    %c0_13 = arith.constant 0 : index
    %c1_14 = arith.constant 1 : index
    %c0_15 = arith.constant 0 : index
    %c0_16 = arith.constant 0 : index
    %9 = vector.load %arg1[%c0_13, %c1_14, %c0_15, %c0_16] : memref<1x18x18x128xf32, #tpu.memory_space<vmem>>, vector<1x16x16x128xf32>
    %10 = vector.shape_cast %9 : vector<1x16x16x128xf32> to vector<256x128xf32>
    %c0_17 = arith.constant 0 : index
    %c384 = arith.constant 384 : index
    %11 = vector.load %arg10[%c0_17, %c384] : memref<256x1152xf32, #tpu.memory_space<vmem>>, vector<256x128xf32>
    tpu.vector_store %arg10[%c0_17, %c384], %10 {strides = array<i32>} : memref<256x1152xf32, #tpu.memory_space<vmem>>, vector<256x128xf32>,
    %c0_18 = arith.constant 0 : index
    %c1_19 = arith.constant 1 : index
    %c1_20 = arith.constant 1 : index
    %c0_21 = arith.constant 0 : index
    %12 = vector.load %arg1[%c0_18, %c1_19, %c1_20, %c0_21] : memref<1x18x18x128xf32, #tpu.memory_space<vmem>>, vector<1x16x16x128xf32>
    %13 = vector.shape_cast %12 : vector<1x16x16x128xf32> to vector<256x128xf32>
    %c0_22 = arith.constant 0 : index
    %c512 = arith.constant 512 : index
    %14 = vector.load %arg10[%c0_22, %c512] : memref<256x1152xf32, #tpu.memory_space<vmem>>, vector<256x128xf32>
    tpu.vector_store %arg10[%c0_22, %c512], %13 {strides = array<i32>} : memref<256x1152xf32, #tpu.memory_space<vmem>>, vector<256x128xf32>,
    %c0_23 = arith.constant 0 : index
    %c1_24 = arith.constant 1 : index
    %c2_25 = arith.constant 2 : index
    %c0_26 = arith.constant 0 : index
    %15 = vector.load %arg1[%c0_23, %c1_24, %c2_25, %c0_26] : memref<1x18x18x128xf32, #tpu.memory_space<vmem>>, vector<1x16x16x128xf32>
    %16 = vector.shape_cast %15 : vector<1x16x16x128xf32> to vector<256x128xf32>
    %c0_27 = arith.constant 0 : index
    %c640 = arith.constant 640 : index
    %17 = vector.load %arg10[%c0_27, %c640] : memref<256x1152xf32, #tpu.memory_space<vmem>>, vector<256x128xf32>
    tpu.vector_store %arg10[%c0_27, %c640], %16 {strides = array<i32>} : memref<256x1152xf32, #tpu.memory_space<vmem>>, vector<256x128xf32>,
    %c0_28 = arith.constant 0 : index
    %c2_29 = arith.constant 2 : index
    %c0_30 = arith.constant 0 : index
    %c0_31 = arith.constant 0 : index
    %18 = vector.load %arg1[%c0_28, %c2_29, %c0_30, %c0_31] : memref<1x18x18x128xf32, #tpu.memory_space<vmem>>, vector<1x16x16x128xf32>
    %19 = vector.shape_cast %18 : vector<1x16x16x128xf32> to vector<256x128xf32>
    %c0_32 = arith.constant 0 : index
    %c768 = arith.constant 768 : index
    %20 = vector.load %arg10[%c0_32, %c768] : memref<256x1152xf32, #tpu.memory_space<vmem>>, vector<256x128xf32>
    tpu.vector_store %arg10[%c0_32, %c768], %19 {strides = array<i32>} : memref<256x1152xf32, #tpu.memory_space<vmem>>, vector<256x128xf32>,
    %c0_33 = arith.constant 0 : index
    %c2_34 = arith.constant 2 : index
    %c1_35 = arith.constant 1 : index
    %c0_36 = arith.constant 0 : index
    %21 = vector.load %arg1[%c0_33, %c2_34, %c1_35, %c0_36] : memref<1x18x18x128xf32, #tpu.memory_space<vmem>>, vector<1x16x16x128xf32>
    %22 = vector.shape_cast %21 : vector<1x16x16x128xf32> to vector<256x128xf32>
    %c0_37 = arith.constant 0 : index
    %c896 = arith.constant 896 : index
    %23 = vector.load %arg10[%c0_37, %c896] : memref<256x1152xf32, #tpu.memory_space<vmem>>, vector<256x128xf32>
    tpu.vector_store %arg10[%c0_37, %c896], %22 {strides = array<i32>} : memref<256x1152xf32, #tpu.memory_space<vmem>>, vector<256x128xf32>,
    %c0_38 = arith.constant 0 : index
    %c2_39 = arith.constant 2 : index
    %c2_40 = arith.constant 2 : index
    %c0_41 = arith.constant 0 : index
    %24 = vector.load %arg1[%c0_38, %c2_39, %c2_40, %c0_41] : memref<1x18x18x128xf32, #tpu.memory_space<vmem>>, vector<1x16x16x128xf32>
    %25 = vector.shape_cast %24 : vector<1x16x16x128xf32> to vector<256x128xf32>
    %c0_42 = arith.constant 0 : index
    %c1024 = arith.constant 1024 : index
    %26 = vector.load %arg10[%c0_42, %c1024] : memref<256x1152xf32, #tpu.memory_space<vmem>>, vector<256x128xf32>
    tpu.vector_store %arg10[%c0_42, %c1024], %25 {strides = array<i32>} : memref<256x1152xf32, #tpu.memory_space<vmem>>, vector<256x128xf32>,
    %c0_43 = arith.constant 0 : index
    %c0_44 = arith.constant 0 : index
    %27 = vector.load %arg10[%c0_43, %c0_44] : memref<256x1152xf32, #tpu.memory_space<vmem>>, vector<256x1152xf32>
    %c0_45 = arith.constant 0 : index
    %c0_46 = arith.constant 0 : index
    %28 = vector.load %arg2[%c0_45, %c0_46] : memref<1152x128xf32, #tpu.memory_space<vmem>>, vector<1152x128xf32>
    %cst = arith.constant dense<0.000000e+00> : vector<256x128xf32>
    %29 = tpu.matmul %27, %28, %cst {dimension_numbers = #tpu.dot_dimension_numbers<[1], [0], [0], [1], [0, 0, 1, 1], [], []>} : vector<256x1152xf32>, vector<1152x128xf32>, vector<256x128xf32> -> vector<256x128xf32>
    %c0_47 = arith.constant 0 : index
    %c0_48 = arith.constant 0 : index
    %30 = vector.load %arg3[%c0_47, %c0_48] : memref<1x128xf32, #tpu.memory_space<vmem>>, vector<1x128xf32>
    %31 = vector.broadcast %30 : vector<1x128xf32> to vector<256x128xf32>
    %32 = arith.mulf %29, %31 : vector<256x128xf32>
    %c0_49 = arith.constant 0 : index
    %c0_50 = arith.constant 0 : index
    %33 = vector.load %arg4[%c0_49, %c0_50] : memref<1x128xf32, #tpu.memory_space<vmem>>, vector<1x128xf32>
    %34 = vector.broadcast %33 : vector<1x128xf32> to vector<256x128xf32>
    %35 = arith.addf %32, %34 : vector<256x128xf32>
    %cst_51 = arith.constant 0.000000e+00 : f32
    %36 = vector.broadcast %cst_51 : f32 to vector<256x128xf32>
    %37 = arith.maximumf %35, %36 : vector<256x128xf32>
    %38 = vector.shape_cast %37 : vector<256x128xf32> to vector<1x16x16x128xf32>
    %c0_52 = arith.constant 0 : index
    %c1_53 = arith.constant 1 : index
    %c1_54 = arith.constant 1 : index
    %c0_55 = arith.constant 0 : index
    %39 = vector.load %arg9[%c0_52, %c1_53, %c1_54, %c0_55] : memref<1x18x18x128xf32, #tpu.memory_space<vmem>>, vector<1x16x16x128xf32>
    tpu.vector_store %arg9[%c0_52, %c1_53, %c1_54, %c0_55], %38 {strides = array<i32>} : memref<1x18x18x128xf32, #tpu.memory_space<vmem>>, vector<1x16x16x128xf32>,
    %cst_56 = arith.constant 0.000000e+00 : f32
    %40 = vector.broadcast %cst_56 : f32 to vector<1x1x18x128xf32>
    %c0_57 = arith.constant 0 : index
    %c0_58 = arith.constant 0 : index
    %c0_59 = arith.constant 0 : index
    %c0_60 = arith.constant 0 : index
    %41 = vector.load %arg9[%c0_57, %c0_58, %c0_59, %c0_60] : memref<1x18x18x128xf32, #tpu.memory_space<vmem>>, vector<1x1x18x128xf32>
    tpu.vector_store %arg9[%c0_57, %c0_58, %c0_59, %c0_60], %40 {strides = array<i32>} : memref<1x18x18x128xf32, #tpu.memory_space<vmem>>, vector<1x1x18x128xf32>,
    %c0_61 = arith.constant 0 : index
    %c17 = arith.constant 17 : index
    %c0_62 = arith.constant 0 : index
    %c0_63 = arith.constant 0 : index
    %42 = vector.load %arg9[%c0_61, %c17, %c0_62, %c0_63] : memref<1x18x18x128xf32, #tpu.memory_space<vmem>>, vector<1x1x18x128xf32>
    tpu.vector_store %arg9[%c0_61, %c17, %c0_62, %c0_63], %40 {strides = array<i32>} : memref<1x18x18x128xf32, #tpu.memory_space<vmem>>, vector<1x1x18x128xf32>,
    %cst_64 = arith.constant 0.000000e+00 : f32
    %43 = vector.broadcast %cst_64 : f32 to vector<1x18x1x128xf32>
    %c0_65 = arith.constant 0 : index
    %c0_66 = arith.constant 0 : index
    %c0_67 = arith.constant 0 : index
    %c0_68 = arith.constant 0 : index
    %44 = vector.load %arg9[%c0_65, %c0_66, %c0_67, %c0_68] : memref<1x18x18x128xf32, #tpu.memory_space<vmem>>, vector<1x18x1x128xf32>
    tpu.vector_store %arg9[%c0_65, %c0_66, %c0_67, %c0_68], %43 {strides = array<i32>} : memref<1x18x18x128xf32, #tpu.memory_space<vmem>>, vector<1x18x1x128xf32>,
    %c0_69 = arith.constant 0 : index
    %c0_70 = arith.constant 0 : index
    %c17_71 = arith.constant 17 : index
    %c0_72 = arith.constant 0 : index
    %45 = vector.load %arg9[%c0_69, %c0_70, %c17_71, %c0_72] : memref<1x18x18x128xf32, #tpu.memory_space<vmem>>, vector<1x18x1x128xf32>
    tpu.vector_store %arg9[%c0_69, %c0_70, %c17_71, %c0_72], %43 {strides = array<i32>} : memref<1x18x18x128xf32, #tpu.memory_space<vmem>>, vector<1x18x1x128xf32>,
    %c0_73 = arith.constant 0 : index
    %c0_74 = arith.constant 0 : index
    %c0_75 = arith.constant 0 : index
    %c0_76 = arith.constant 0 : index
    %46 = vector.load %arg9[%c0_73, %c0_74, %c0_75, %c0_76] : memref<1x18x18x128xf32, #tpu.memory_space<vmem>>, vector<1x16x16x128xf32>
    %47 = vector.shape_cast %46 : vector<1x16x16x128xf32> to vector<256x128xf32>
    %c0_77 = arith.constant 0 : index
    %c0_78 = arith.constant 0 : index
    %48 = vector.load %arg10[%c0_77, %c0_78] : memref<256x1152xf32, #tpu.memory_space<vmem>>, vector<256x128xf32>
    tpu.vector_store %arg10[%c0_77, %c0_78], %47 {strides = array<i32>} : memref<256x1152xf32, #tpu.memory_space<vmem>>, vector<256x128xf32>,
    %c0_79 = arith.constant 0 : index
    %c0_80 = arith.constant 0 : index
    %c1_81 = arith.constant 1 : index
    %c0_82 = arith.constant 0 : index
    %49 = vector.load %arg9[%c0_79, %c0_80, %c1_81, %c0_82] : memref<1x18x18x128xf32, #tpu.memory_space<vmem>>, vector<1x16x16x128xf32>
    %50 = vector.shape_cast %49 : vector<1x16x16x128xf32> to vector<256x128xf32>
    %c0_83 = arith.constant 0 : index
    %c128_84 = arith.constant 128 : index
    %51 = vector.load %arg10[%c0_83, %c128_84] : memref<256x1152xf32, #tpu.memory_space<vmem>>, vector<256x128xf32>
    tpu.vector_store %arg10[%c0_83, %c128_84], %50 {strides = array<i32>} : memref<256x1152xf32, #tpu.memory_space<vmem>>, vector<256x128xf32>,
    %c0_85 = arith.constant 0 : index
    %c0_86 = arith.constant 0 : index
    %c2_87 = arith.constant 2 : index
    %c0_88 = arith.constant 0 : index
    %52 = vector.load %arg9[%c0_85, %c0_86, %c2_87, %c0_88] : memref<1x18x18x128xf32, #tpu.memory_space<vmem>>, vector<1x16x16x128xf32>
    %53 = vector.shape_cast %52 : vector<1x16x16x128xf32> to vector<256x128xf32>
    %c0_89 = arith.constant 0 : index
    %c256_90 = arith.constant 256 : index
    %54 = vector.load %arg10[%c0_89, %c256_90] : memref<256x1152xf32, #tpu.memory_space<vmem>>, vector<256x128xf32>
    tpu.vector_store %arg10[%c0_89, %c256_90], %53 {strides = array<i32>} : memref<256x1152xf32, #tpu.memory_space<vmem>>, vector<256x128xf32>,
    %c0_91 = arith.constant 0 : index
    %c1_92 = arith.constant 1 : index
    %c0_93 = arith.constant 0 : index
    %c0_94 = arith.constant 0 : index
    %55 = vector.load %arg9[%c0_91, %c1_92, %c0_93, %c0_94] : memref<1x18x18x128xf32, #tpu.memory_space<vmem>>, vector<1x16x16x128xf32>
    %56 = vector.shape_cast %55 : vector<1x16x16x128xf32> to vector<256x128xf32>
    %c0_95 = arith.constant 0 : index
    %c384_96 = arith.constant 384 : index
    %57 = vector.load %arg10[%c0_95, %c384_96] : memref<256x1152xf32, #tpu.memory_space<vmem>>, vector<256x128xf32>
    tpu.vector_store %arg10[%c0_95, %c384_96], %56 {strides = array<i32>} : memref<256x1152xf32, #tpu.memory_space<vmem>>, vector<256x128xf32>,
    %c0_97 = arith.constant 0 : index
    %c1_98 = arith.constant 1 : index
    %c1_99 = arith.constant 1 : index
    %c0_100 = arith.constant 0 : index
    %58 = vector.load %arg9[%c0_97, %c1_98, %c1_99, %c0_100] : memref<1x18x18x128xf32, #tpu.memory_space<vmem>>, vector<1x16x16x128xf32>
    %59 = vector.shape_cast %58 : vector<1x16x16x128xf32> to vector<256x128xf32>
    %c0_101 = arith.constant 0 : index
    %c512_102 = arith.constant 512 : index
    %60 = vector.load %arg10[%c0_101, %c512_102] : memref<256x1152xf32, #tpu.memory_space<vmem>>, vector<256x128xf32>
    tpu.vector_store %arg10[%c0_101, %c512_102], %59 {strides = array<i32>} : memref<256x1152xf32, #tpu.memory_space<vmem>>, vector<256x128xf32>,
    %c0_103 = arith.constant 0 : index
    %c1_104 = arith.constant 1 : index
    %c2_105 = arith.constant 2 : index
    %c0_106 = arith.constant 0 : index
    %61 = vector.load %arg9[%c0_103, %c1_104, %c2_105, %c0_106] : memref<1x18x18x128xf32, #tpu.memory_space<vmem>>, vector<1x16x16x128xf32>
    %62 = vector.shape_cast %61 : vector<1x16x16x128xf32> to vector<256x128xf32>
    %c0_107 = arith.constant 0 : index
    %c640_108 = arith.constant 640 : index
    %63 = vector.load %arg10[%c0_107, %c640_108] : memref<256x1152xf32, #tpu.memory_space<vmem>>, vector<256x128xf32>
    tpu.vector_store %arg10[%c0_107, %c640_108], %62 {strides = array<i32>} : memref<256x1152xf32, #tpu.memory_space<vmem>>, vector<256x128xf32>,
    %c0_109 = arith.constant 0 : index
    %c2_110 = arith.constant 2 : index
    %c0_111 = arith.constant 0 : index
    %c0_112 = arith.constant 0 : index
    %64 = vector.load %arg9[%c0_109, %c2_110, %c0_111, %c0_112] : memref<1x18x18x128xf32, #tpu.memory_space<vmem>>, vector<1x16x16x128xf32>
    %65 = vector.shape_cast %64 : vector<1x16x16x128xf32> to vector<256x128xf32>
    %c0_113 = arith.constant 0 : index
    %c768_114 = arith.constant 768 : index
    %66 = vector.load %arg10[%c0_113, %c768_114] : memref<256x1152xf32, #tpu.memory_space<vmem>>, vector<256x128xf32>
    tpu.vector_store %arg10[%c0_113, %c768_114], %65 {strides = array<i32>} : memref<256x1152xf32, #tpu.memory_space<vmem>>, vector<256x128xf32>,
    %c0_115 = arith.constant 0 : index
    %c2_116 = arith.constant 2 : index
    %c1_117 = arith.constant 1 : index
    %c0_118 = arith.constant 0 : index
    %67 = vector.load %arg9[%c0_115, %c2_116, %c1_117, %c0_118] : memref<1x18x18x128xf32, #tpu.memory_space<vmem>>, vector<1x16x16x128xf32>
    %68 = vector.shape_cast %67 : vector<1x16x16x128xf32> to vector<256x128xf32>
    %c0_119 = arith.constant 0 : index
    %c896_120 = arith.constant 896 : index
    %69 = vector.load %arg10[%c0_119, %c896_120] : memref<256x1152xf32, #tpu.memory_space<vmem>>, vector<256x128xf32>
    tpu.vector_store %arg10[%c0_119, %c896_120], %68 {strides = array<i32>} : memref<256x1152xf32, #tpu.memory_space<vmem>>, vector<256x128xf32>,
    %c0_121 = arith.constant 0 : index
    %c2_122 = arith.constant 2 : index
    %c2_123 = arith.constant 2 : index
    %c0_124 = arith.constant 0 : index
    %70 = vector.load %arg9[%c0_121, %c2_122, %c2_123, %c0_124] : memref<1x18x18x128xf32, #tpu.memory_space<vmem>>, vector<1x16x16x128xf32>
    %71 = vector.shape_cast %70 : vector<1x16x16x128xf32> to vector<256x128xf32>
    %c0_125 = arith.constant 0 : index
    %c1024_126 = arith.constant 1024 : index
    %72 = vector.load %arg10[%c0_125, %c1024_126] : memref<256x1152xf32, #tpu.memory_space<vmem>>, vector<256x128xf32>
    tpu.vector_store %arg10[%c0_125, %c1024_126], %71 {strides = array<i32>} : memref<256x1152xf32, #tpu.memory_space<vmem>>, vector<256x128xf32>,
    %c0_127 = arith.constant 0 : index
    %c0_128 = arith.constant 0 : index
    %73 = vector.load %arg10[%c0_127, %c0_128] : memref<256x1152xf32, #tpu.memory_space<vmem>>, vector<256x1152xf32>
    %c0_129 = arith.constant 0 : index
    %c0_130 = arith.constant 0 : index
    %74 = vector.load %arg5[%c0_129, %c0_130] : memref<1152x128xf32, #tpu.memory_space<vmem>>, vector<1152x128xf32>
    %cst_131 = arith.constant dense<0.000000e+00> : vector<256x128xf32>
    %75 = tpu.matmul %73, %74, %cst_131 {dimension_numbers = #tpu.dot_dimension_numbers<[1], [0], [0], [1], [0, 0, 1, 1], [], []>} : vector<256x1152xf32>, vector<1152x128xf32>, vector<256x128xf32> -> vector<256x128xf32>
    %c0_132 = arith.constant 0 : index
    %c0_133 = arith.constant 0 : index
    %76 = vector.load %arg6[%c0_132, %c0_133] : memref<1x128xf32, #tpu.memory_space<vmem>>, vector<1x128xf32>
    %77 = vector.broadcast %76 : vector<1x128xf32> to vector<256x128xf32>
    %78 = arith.mulf %75, %77 : vector<256x128xf32>
    %c0_134 = arith.constant 0 : index
    %c0_135 = arith.constant 0 : index
    %79 = vector.load %arg7[%c0_134, %c0_135] : memref<1x128xf32, #tpu.memory_space<vmem>>, vector<1x128xf32>
    %80 = vector.broadcast %79 : vector<1x128xf32> to vector<256x128xf32>
    %81 = arith.addf %78, %80 : vector<256x128xf32>
    %cst_136 = arith.constant 0.000000e+00 : f32
    %82 = vector.broadcast %cst_136 : f32 to vector<256x128xf32>
    %83 = arith.maximumf %81, %82 : vector<256x128xf32>
    %84 = vector.shape_cast %83 : vector<256x128xf32> to vector<8x2x16x128xf32>
    %85 = vector.extract_strided_slice %84 {offsets = [0, 0, 0, 0], sizes = [8, 1, 16, 128], strides = [1, 1, 1, 1]} : vector<8x2x16x128xf32> to vector<8x1x16x128xf32>
    %86 = vector.shape_cast %85 : vector<8x1x16x128xf32> to vector<8x16x128xf32>
    %87 = vector.extract_strided_slice %84 {offsets = [0, 1, 0, 0], sizes = [8, 1, 16, 128], strides = [1, 1, 1, 1]} : vector<8x2x16x128xf32> to vector<8x1x16x128xf32>
    %88 = vector.shape_cast %87 : vector<8x1x16x128xf32> to vector<8x16x128xf32>
    %89 = arith.addf %86, %88 : vector<8x16x128xf32>
    %90 = vector.shape_cast %89 : vector<8x16x128xf32> to vector<8x8x2x128xf32>
    %91 = vector.extract_strided_slice %90 {offsets = [0, 0, 0, 0], sizes = [8, 8, 1, 128], strides = [1, 1, 1, 1]} : vector<8x8x2x128xf32> to vector<8x8x1x128xf32>
    %92 = vector.shape_cast %91 : vector<8x8x1x128xf32> to vector<8x8x128xf32>
    %93 = vector.extract_strided_slice %90 {offsets = [0, 0, 1, 0], sizes = [8, 8, 1, 128], strides = [1, 1, 1, 1]} : vector<8x8x2x128xf32> to vector<8x8x1x128xf32>
    %94 = vector.shape_cast %93 : vector<8x8x1x128xf32> to vector<8x8x128xf32>
    %95 = arith.addf %92, %94 : vector<8x8x128xf32>
    %cst_137 = arith.constant 2.500000e-01 : f32
    %96 = vector.broadcast %cst_137 : f32 to vector<8x8x128xf32>
    %97 = arith.mulf %95, %96 : vector<8x8x128xf32>
    %98 = vector.shape_cast %97 : vector<8x8x128xf32> to vector<1x8x8x128xf32>
    %c0_138 = arith.constant 0 : index
    %c0_139 = arith.constant 0 : index
    %c0_140 = arith.constant 0 : index
    %c0_141 = arith.constant 0 : index
    %99 = vector.load %arg8[%c0_138, %c0_139, %c0_140, %c0_141] : memref<1x8x8x128xf32, #tpu.memory_space<vmem>>, vector<1x8x8x128xf32>
    tpu.vector_store %arg8[%c0_138, %c0_139, %c0_140, %c0_141], %98 {strides = array<i32>} : memref<1x8x8x128xf32, #tpu.memory_space<vmem>>, vector<1x8x8x128xf32>,
    return
  }
  func.func @transform_0(%arg0: i32) -> (i32, i32, i32, i32) {
    %c0_i32 = arith.constant 0 : i32
    %c0_i32_0 = arith.constant 0 : i32
    %c0_i32_1 = arith.constant 0 : i32
    %c0_i32_2 = arith.constant 0 : i32
    return %arg0, %c0_i32, %c0_i32_0, %c0_i32_1 : i32, i32, i32, i32
  }
  func.func @transform_1(%arg0: i32) -> (i32, i32) {
    %c0_i32 = arith.constant 0 : i32
    %c0_i32_0 = arith.constant 0 : i32
    %c0_i32_1 = arith.constant 0 : i32
    return %c0_i32, %c0_i32_0 : i32, i32
  }
  func.func @transform_2(%arg0: i32) -> (i32, i32) {
    %c0_i32 = arith.constant 0 : i32
    %c0_i32_0 = arith.constant 0 : i32
    %c0_i32_1 = arith.constant 0 : i32
    return %c0_i32, %c0_i32_0 : i32, i32
  }
  func.func @transform_3(%arg0: i32) -> (i32, i32) {
    %c0_i32 = arith.constant 0 : i32
    %c0_i32_0 = arith.constant 0 : i32
    %c0_i32_1 = arith.constant 0 : i32
    return %c0_i32, %c0_i32_0 : i32, i32
  }
  func.func @transform_4(%arg0: i32) -> (i32, i32) {
    %c0_i32 = arith.constant 0 : i32
    %c0_i32_0 = arith.constant 0 : i32
    %c0_i32_1 = arith.constant 0 : i32
    return %c0_i32, %c0_i32_0 : i32, i32
  }
  func.func @transform_5(%arg0: i32) -> (i32, i32) {
    %c0_i32 = arith.constant 0 : i32
    %c0_i32_0 = arith.constant 0 : i32
    %c0_i32_1 = arith.constant 0 : i32
    return %c0_i32, %c0_i32_0 : i32, i32
  }
  func.func @transform_6(%arg0: i32) -> (i32, i32) {
    %c0_i32 = arith.constant 0 : i32
    %c0_i32_0 = arith.constant 0 : i32
    %c0_i32_1 = arith.constant 0 : i32
    return %c0_i32, %c0_i32_0 : i32, i32
  }
  func.func @transform_7(%arg0: i32) -> (i32, i32, i32, i32) {
    %c0_i32 = arith.constant 0 : i32
    %c0_i32_0 = arith.constant 0 : i32
    %c0_i32_1 = arith.constant 0 : i32
    %c0_i32_2 = arith.constant 0 : i32
    return %arg0, %c0_i32, %c0_i32_0, %c0_i32_1 : i32, i32, i32, i32
  }
}

</mosaic_0001>

<bundles_post_ra>
// kernel: tpu_custom_call.1
= control target key start
LH: loop header
LB: loop body
LE: loop exit
PB: predicated region body
PF: predicated region fallthrough
CT: control target
= control target key end

     0   :  { %12 = vsyncpa [#allocation5], 0  ;;  %s9385_s0 = inlined_call_operand.vmem [shape: f32[2,18,18,128], index: 0, kind: input, shape index: {}]   ;;  %s9386_s1 = inlined_call_operand.vmem [shape: f32[1152,128], index: 1, kind: input, shape index: {}]   ;;  %s9387_s2 = inlined_call_operand.vmem [shape: f32[1,128], index: 2, kind: input, shape index: {}]   ;;  %s9388_s3 = inlined_call_operand.vmem [shape: f32[1,128], index: 3, kind: input, shape index: {}]   ;;  %s9389_s4 = inlined_call_operand.hbm [shape: f32[1152,128], index: 4, kind: input, shape index: {}]   ;;  %s9390_s5 = inlined_call_operand.vmem [shape: f32[1,128], index: 5, kind: input, shape index: {}]   ;;  %s9391_s6 = inlined_call_operand.vmem [shape: f32[1,128], index: 6, kind: input, shape index: {}]   ;;  %s9392_s7 = inlined_call_operand.hbm [shape: f32[2,8,8,128], index: 7, kind: output, shape index: {}]  }
   0x1   :  { %13 = vsyncpa [#allocation6], 0 }
   0x2   :  { %15 = vsyncpa [#allocation6 + $0x1], 0  ;;  %s6765_s24 = smov 0   ;;  %s6767_s25 = smov 0  }
   0x3   :  { %s6769_s26 = smov 0   ;;  %s6771_s27 = smov 0  }
   0x4 LB: > { %s6786_s28 = sadd.s32 4294967295, %s6715_s27   ;;  %s6032_s29 = sadd.s32 4294967294, %s6715_s27   ;;  %s6715_s27 = sphi %s6771_s27, %s9512_s27   ;;  %s6711_s26 = sphi %s6769_s26, %s9511_s26   ;;  %s6707_s25 = sphi %s6767_s25, %s9510_s25   ;;  %s6703_s24 = sphi %s6765_s24, %s9509_s24  }
   0x5   : > { %s6790_s30 = sadd.s32 1, %s6715_s27   ;;  %s180_s8 = sadd.s32 1, %s6711_s26 }
   0x6   : > { %s177_s9 = ssub.s32 %s6715_s27, %s6790_s30  ;;  %p190_p0 = scmp.ne.s32.totalorder %s6711_s26, %s6707_s25 }
   0x7   : > { %p178_p1 = scmp.eq.s32.totalorder %s177_s9, 0  ;;  %p191_p2 = scmp.eq.s32.totalorder %s6786_s28, 1 }
   0x8   : > { %p196_p3 = scmp.ne.s32.totalorder %s6707_s25, %s6703_s24  ;;  %p197_p4 = scmp.eq.s32.totalorder %s6032_s29, 1 }
   0x9   : > { %s6801_s10 = scalar_select %p178_p1, %s6711_s26, %s180_s8  }
   0xa   : > { %p6803_p5 = por %p191_p2, %p190_p0  ;;  %p6807_p6 = por %p197_p4, %p196_p3 }
   0xb   : > { %p6033_p7 = scmp.ge.s32.totalorder %s6715_s27, 1  ;;  %p204_p8 = scmp.lt.s32.totalorder %s6715_s27, 3 }
   0xc   : > { %s9438_s12 = scalar_select %p6807_p6, 1, 0 }
   0xd   : > { %p6577_p9 = scmp.eq.s32.totalorder %s6786_s28, 0  ;;  %p6814_p10 = pnand %p6033_p7, %p204_p8 }
   0xe   : > { %s6717_s14 = smov [#allocation4]  }
   0xf   : > { %s225_s15 = sshll.u32 %s6717_s14, 4  ;;  %p6569_p11 = pneg %p6814_p10  ;;  %s226_s15 = int_to_ptr.vmem [resolvable:$true] %s225_s15 }
  0x10   : > { %s6636_s16 = scalar_lea.vmem %s226_s15, 18432  ;;  %p6644_p3 = scmp.lt.s32.totalorder %s226_s15, %s226_s15 }
  0x11   : > { %p6570_p12 = pnand %p6577_p9, %p6569_p11  ;;  %p6637_p0 = scmp.ne.s32.totalorder %s226_s15, %s6636_s16 }
  0x12   : > { %p6645_p4 = scmp.lt.s32.totalorder %s6636_s16, %s6636_s16 }
  0x13   : > { %p6627_p13 = pneg %p6570_p12 }
  0x14   : > { %p6646_p6 = por %p6645_p4, %p6644_p3 }
  0x15   : > { %p6639_p1 = pnand %p6637_p0, %p6627_p13 }
  0x17   : > { %p6640_p2 = pneg %p6639_p1 }
  0x19   : > { %p6647_p7 = pnand %p6646_p6, %p6640_p2 }
  0x1b   : > { %6650 = shalt.err (!%p6647_p7)
}
  0x1c   : > { %s6718_s17 = smov 128   ;;  %s6719_s18 = smov 8  }
  0x1d   : > { %6572 = dma.hbm_to_vmem [thread:$0]  (!%p6570_p12), %s9389_s4, 18432, %s226_s15, [#allocation5], %s6718_s17, %s6718_s17, %s6719_s18  }
  0x1e   : > { %255 = sbr.rel (%p6814_p10) target bundleno = 1175 (0x497), region = 48 }
  0x23   : > { %6694 = dma.done.wait (%p6577_p9), [#allocation5], 18432  }
  0x24   : > { %6696 = vsyncadd (%p6577_p9), [#allocation5], 4294948864  ;;  %v6720_v0 = vmov 0.0   ;;  %v1173_v1 = vld [vmem:[%s9386_s1 + $0x78] sm:$0xff]  ;;  %v1172_v3 = vld [vmem:[%s9386_s1 + $0x70] sm:$0xff]  ;;  %p287_p6 = scmp.lt.s32.totalorder %s6786_s28, 1 }
  0x25   : > { %1302 = vmatprep.subr.mxu0 %v6720_v0  ;;  %2570 = vst [vmem:[#allocation2] sm:$0xff] %v6720_v0  ;;  %2571 = vst [vmem:[#allocation2 + $0x8] sm:$0xff] %v6720_v0  ;;  %1527 = vmatprep.subr.mxu1 %v6720_v0  ;;  %v1205_v2 = vld [vmem:[%s9386_s1 + $0x178] sm:$0xff]  ;;  %v1204_v4 = vld [vmem:[%s9386_s1 + $0x170] sm:$0xff]  ;;  %vm5865_vm0 = vcmask 1041409   ;;  %vm5867_vm1 = vcmask 1042434  }
  0x26   : > { %2572 = vst [vmem:[#allocation2 + $0x10] sm:$0x3] %v6720_v0  ;;  %2574 = vst [vmem:[#allocation2 + $0x198] sm:$0xff] %v6720_v0  ;;  %1303 = vmatpush1.msra.mxu0 %v1173_v1  ;;  %1528 = vmatpush1.msra.mxu1 %v1205_v2  ;;  %v1171_v5 = vld [vmem:[%s9386_s1 + $0x68] sm:$0xff]  ;;  %v1170_v7 = vld [vmem:[%s9386_s1 + $0x60] sm:$0xff]  ;;  %s288_s13 = scalar_select %p287_p6, %s6786_s28, 1 }
  0x27   : > { %2575 = vst [vmem:[#allocation2 + $0x1a0] sm:$0xff] %v6720_v0  ;;  %2576 = vst [vmem:[#allocation2 + $0x1a8] sm:$0x3] %v6720_v0  ;;  %1304 = vmatprep.subr.mxu0 %v6720_v0  ;;  %1529 = vmatprep.subr.mxu1 %v6720_v0  ;;  %v1203_v6 = vld [vmem:[%s9386_s1 + $0x168] sm:$0xff]  ;;  %v1202_v8 = vld [vmem:[%s9386_s1 + $0x160] sm:$0xff]  ;;  %vm5869_vm2 = vcmask 1043459  }
  0x28   : > { %2578 = vst [vmem:[#allocation2 + $0x18] sm:$0x1] %v6720_v0  ;;  %2579 = vst [vmem:[#allocation2 + $0x30] sm:$0x1] %v6720_v0  ;;  %1305 = vmatpush1.msra.mxu0 %v1172_v3  ;;  %1530 = vmatpush1.msra.mxu1 %v1204_v4  ;;  %v1169_v9 = vld [vmem:[%s9386_s1 + $0x58] sm:$0xff]  ;;  %v1168_v11 = vld [vmem:[%s9386_s1 + $0x50] sm:$0xff] }
  0x29   : > { %2580 = vst [vmem:[#allocation2 + $0x48] sm:$0x1] %v6720_v0  ;;  %2581 = vst [vmem:[#allocation2 + $0x60] sm:$0x1] %v6720_v0  ;;  %1306 = vmatprep.subr.mxu0 %v6720_v0  ;;  %1531 = vmatprep.subr.mxu1 %v6720_v0  ;;  %v1201_v10 = vld [vmem:[%s9386_s1 + $0x158] sm:$0xff]  ;;  %v1200_v12 = vld [vmem:[%s9386_s1 + $0x150] sm:$0xff] }
  0x2a   : > { %2582 = vst [vmem:[#allocation2 + $0x78] sm:$0x1] %v6720_v0  ;;  %2583 = vst [vmem:[#allocation2 + $0x90] sm:$0x1] %v6720_v0  ;;  %1307 = vmatpush1.msra.mxu0 %v1171_v5  ;;  %1532 = vmatpush1.msra.mxu1 %v1203_v6  ;;  %v1167_v13 = vld [vmem:[%s9386_s1 + $0x48] sm:$0xff]  ;;  %v1166_v15 = vld [vmem:[%s9386_s1 + $0x40] sm:$0xff] }
  0x2b   : > { %2584 = vst [vmem:[#allocation2 + $0xa8] sm:$0x1] %v6720_v0  ;;  %2585 = vst [vmem:[#allocation2 + $0xc0] sm:$0x1] %v6720_v0  ;;  %1308 = vmatprep.subr.mxu0 %v6720_v0  ;;  %1533 = vmatprep.subr.mxu1 %v6720_v0  ;;  %v1199_v14 = vld [vmem:[%s9386_s1 + $0x148] sm:$0xff]  ;;  %v1198_v16 = vld [vmem:[%s9386_s1 + $0x140] sm:$0xff] }
  0x2c   : > { %2586 = vst [vmem:[#allocation2 + $0xd8] sm:$0x1] %v6720_v0  ;;  %2587 = vst [vmem:[#allocation2 + $0xf0] sm:$0x1] %v6720_v0  ;;  %1309 = vmatpush1.msra.mxu0 %v1170_v7  ;;  %1534 = vmatpush1.msra.mxu1 %v1202_v8  ;;  %v1165_v17 = vld [vmem:[%s9386_s1 + $0x38] sm:$0xff]  ;;  %v1164_v19 = vld [vmem:[%s9386_s1 + $0x30] sm:$0xff] }
  0x2d   : > { %2588 = vst [vmem:[#allocation2 + $0x108] sm:$0x1] %v6720_v0  ;;  %2589 = vst [vmem:[#allocation2 + $0x120] sm:$0x1] %v6720_v0  ;;  %1310 = vmatprep.subr.mxu0 %v6720_v0  ;;  %1535 = vmatprep.subr.mxu1 %v6720_v0  ;;  %v1197_v18 = vld [vmem:[%s9386_s1 + $0x138] sm:$0xff]  ;;  %v1196_v20 = vld [vmem:[%s9386_s1 + $0x130] sm:$0xff] }
  0x2e   : > { %2590 = vst [vmem:[#allocation2 + $0x138] sm:$0x1] %v6720_v0  ;;  %2591 = vst [vmem:[#allocation2 + $0x150] sm:$0x1] %v6720_v0  ;;  %1311 = vmatpush1.msra.mxu0 %v1169_v9  ;;  %1536 = vmatpush1.msra.mxu1 %v1201_v10  ;;  %v1163_v21 = vld [vmem:[%s9386_s1 + $0x28] sm:$0xff]  ;;  %v1162_v23 = vld [vmem:[%s9386_s1 + $0x20] sm:$0xff] }
  0x2f   : > { %2592 = vst [vmem:[#allocation2 + $0x168] sm:$0x1] %v6720_v0  ;;  %2593 = vst [vmem:[#allocation2 + $0x180] sm:$0x1] %v6720_v0  ;;  %1312 = vmatprep.subr.mxu0 %v6720_v0  ;;  %1537 = vmatprep.subr.mxu1 %v6720_v0  ;;  %v1195_v22 = vld [vmem:[%s9386_s1 + $0x128] sm:$0xff]  ;;  %v1194_v24 = vld [vmem:[%s9386_s1 + $0x120] sm:$0xff] }
  0x30   : > { %2596 = vst [vmem:[#allocation2 + $0x29] sm:$0x1] %v6720_v0  ;;  %2597 = vst [vmem:[#allocation2 + $0x41] sm:$0x1] %v6720_v0  ;;  %1313 = vmatpush1.msra.mxu0 %v1168_v11  ;;  %1538 = vmatpush1.msra.mxu1 %v1200_v12  ;;  %v1161_v25 = vld [vmem:[%s9386_s1 + $0x18] sm:$0xff]  ;;  %v1160_v27 = vld [vmem:[%s9386_s1 + $0x10] sm:$0xff] }
  0x31   : > { %2598 = vst [vmem:[#allocation2 + $0x59] sm:$0x1] %v6720_v0  ;;  %2599 = vst [vmem:[#allocation2 + $0x71] sm:$0x1] %v6720_v0  ;;  %1314 = vmatprep.subr.mxu0 %v6720_v0  ;;  %1539 = vmatprep.subr.mxu1 %v6720_v0  ;;  %v1193_v26 = vld [vmem:[%s9386_s1 + $0x118] sm:$0xff]  ;;  %v1192_v28 = vld [vmem:[%s9386_s1 + $0x110] sm:$0xff] }
  0x32   : > { %2600 = vst [vmem:[#allocation2 + $0x89] sm:$0x1] %v6720_v0  ;;  %2601 = vst [vmem:[#allocation2 + $0xa1] sm:$0x1] %v6720_v0  ;;  %1315 = vmatpush1.msra.mxu0 %v1167_v13  ;;  %1540 = vmatpush1.msra.mxu1 %v1199_v14  ;;  %v1159_v29 = vld [vmem:[%s9386_s1 + $0x8] sm:$0xff]  ;;  %v1158_v31 = vld [vmem:[%s9386_s1] sm:$0xff] }
  0x33   : > { %2602 = vst [vmem:[#allocation2 + $0xb9] sm:$0x1] %v6720_v0  ;;  %2603 = vst [vmem:[#allocation2 + $0xd1] sm:$0x1] %v6720_v0  ;;  %1316 = vmatprep.subr.mxu0 %v6720_v0  ;;  %1541 = vmatprep.subr.mxu1 %v6720_v0  ;;  %v1191_v30 = vld [vmem:[%s9386_s1 + $0x108] sm:$0xff]  ;;  %v1190_v32 = vld [vmem:[%s9386_s1 + $0x100] sm:$0xff] }
  0x34   : > { %2604 = vst [vmem:[#allocation2 + $0xe9] sm:$0x1] %v6720_v0  ;;  %2605 = vst [vmem:[#allocation2 + $0x101] sm:$0x1] %v6720_v0  ;;  %1317 = vmatpush1.msra.mxu0 %v1166_v15  ;;  %1542 = vmatpush1.msra.mxu1 %v1198_v16  ;;  %v1189_v33 = vld [vmem:[%s9386_s1 + $0xf8] sm:$0xff]  ;;  %v1188_v35 = vld [vmem:[%s9386_s1 + $0xf0] sm:$0xff] }
  0x35   : > { %2606 = vst [vmem:[#allocation2 + $0x119] sm:$0x1] %v6720_v0  ;;  %2607 = vst [vmem:[#allocation2 + $0x131] sm:$0x1] %v6720_v0  ;;  %1318 = vmatprep.subr.mxu0 %v6720_v0  ;;  %1543 = vmatprep.subr.mxu1 %v6720_v0  ;;  %v1221_v34 = vld [vmem:[%s9386_s1 + $0x1f8] sm:$0xff]  ;;  %v1220_v36 = vld [vmem:[%s9386_s1 + $0x1f0] sm:$0xff] }
  0x36   : > { %2608 = vst [vmem:[#allocation2 + $0x149] sm:$0x1] %v6720_v0  ;;  %2609 = vst [vmem:[#allocation2 + $0x161] sm:$0x1] %v6720_v0  ;;  %1319 = vmatpush1.msra.mxu0 %v1165_v17  ;;  %1544 = vmatpush1.msra.mxu1 %v1197_v18  ;;  %v1187_v37 = vld [vmem:[%s9386_s1 + $0xe8] sm:$0xff]  ;;  %v1186_v39 = vld [vmem:[%s9386_s1 + $0xe0] sm:$0xff] }
  0x37   : > { %2610 = vst [vmem:[#allocation2 + $0x179] sm:$0x1] %v6720_v0  ;;  %2611 = vst [vmem:[#allocation2 + $0x191] sm:$0x1] %v6720_v0  ;;  %1320 = vmatprep.subr.mxu0 %v6720_v0  ;;  %1545 = vmatprep.subr.mxu1 %v6720_v0  ;;  %v1219_v38 = vld [vmem:[%s9386_s1 + $0x1e8] sm:$0xff]  ;;  %v1218_v40 = vld [vmem:[%s9386_s1 + $0x1e0] sm:$0xff] }
  0x38   : > { %2577 = vst [vmem:[#allocation2] sm:$0x1] %v6720_v0  ;;  %2594 = vst [vmem:[#allocation2 + $0x198] sm:$0x1] %v6720_v0  ;;  %1321 = vmatpush1.msra.mxu0 %v1164_v19  ;;  %1546 = vmatpush1.msra.mxu1 %v1196_v20  ;;  %v1185_v41 = vld [vmem:[%s9386_s1 + $0xd8] sm:$0xff]  ;;  %v1184_v43 = vld [vmem:[%s9386_s1 + $0xd0] sm:$0xff] }
  0x39   : > { %2595 = vst [vmem:[#allocation2 + $0x11] sm:$0x1] %v6720_v0  ;;  %2612 = vst [vmem:[#allocation2 + $0x1a9] sm:$0x1] %v6720_v0  ;;  %1322 = vmatprep.subr.mxu0 %v6720_v0  ;;  %1547 = vmatprep.subr.mxu1 %v6720_v0  ;;  %v1217_v42 = vld [vmem:[%s9386_s1 + $0x1d8] sm:$0xff]  ;;  %v1216_v44 = vld [vmem:[%s9386_s1 + $0x1d0] sm:$0xff] }
  0x3a   : > { %1323 = vmatpush1.msra.mxu0 %v1163_v21  ;;  %1548 = vmatpush1.msra.mxu1 %v1195_v22  ;;  %v1183_v45 = vld [vmem:[%s9386_s1 + $0xc8] sm:$0xff]  ;;  %v1182_v47 = vld [vmem:[%s9386_s1 + $0xc0] sm:$0xff]  ;;  %v1181_v49 = vld [vmem:[%s9386_s1 + $0xb8] sm:$0xff]  ;;  %s6562_s22 = smul.u32 432, %s288_s13  ;;  %vm5871_vm3 = vcmask 1044484   ;;  %vm5873_vm4 = vcmask 1045509  }
  0x3b   : > { %1324 = vmatprep.subr.mxu0 %v6720_v0  ;;  %1549 = vmatprep.subr.mxu1 %v6720_v0  ;;  %v1215_v46 = vld [vmem:[%s9386_s1 + $0x1c8] sm:$0xff]  ;;  %v1214_v48 = vld [vmem:[%s9386_s1 + $0x1c0] sm:$0xff]  ;;  %v1213_v50 = vld [vmem:[%s9386_s1 + $0x1b8] sm:$0xff]  ;;  %vm5875_vm5 = vcmask 1046534   ;;  %vm5877_vm6 = vcmask 1047559   ;;  %s284_s9 = sand.u32 1, %s6707_s25  }
  0x3c   : > { %1325 = vmatpush1.msra.mxu0 %v1162_v23  ;;  %1550 = vmatpush1.msra.mxu1 %v1194_v24  ;;  %v1180_v51 = vld [vmem:[%s9386_s1 + $0xb0] sm:$0xff]  ;;  %v1179_v53 = vld [vmem:[%s9386_s1 + $0xa8] sm:$0xff]  ;;  %v1178_v55 = vld [vmem:[%s9386_s1 + $0xa0] sm:$0xff]  ;;  %s7116_s19 = scalar_lea.vmem %s9385_s0, %s6562_s22  ;;  %s6038_s13 = sshll.u32 %s284_s9, 6 }
  0x3d   : > { %1326 = vmatprep.subr.mxu0 %v6720_v0  ;;  %1551 = vmatprep.subr.mxu1 %v6720_v0  ;;  %v1212_v52 = vld [vmem:[%s9386_s1 + $0x1b0] sm:$0xff]  ;;  %v1211_v54 = vld [vmem:[%s9386_s1 + $0x1a8] sm:$0xff]  ;;  %v1210_v56 = vld [vmem:[%s9386_s1 + $0x1a0] sm:$0xff]  ;;  %s9106_s14 = scalar_lea.vmem [#allocation7], %s6038_s13  ;;  %s6305_s18 = sshll.u32 %s6786_s28, 10 }
  0x3e   : > { %1327 = vmatpush1.msra.mxu0 %v1161_v25  ;;  %1552 = vmatpush1.msra.mxu1 %v1193_v26  ;;  %v1177_v57 = vld [vmem:[%s9386_s1 + $0x98] sm:$0xff]  ;;  %v1176_v59 = vld [vmem:[%s9386_s1 + $0x90] sm:$0xff]  ;;  %v1175_v61 = vld [vmem:[%s9386_s1 + $0x88] sm:$0xff]  ;;  %s5958_s20 = sshll.u32 %s9106_s14, 4  ;;  %s9336_s29 = scalar_lea.hbm %s9392_s7, %s6305_s18  ;;  %s9338_s20 = int_to_ptr.vmem [resolvable:$true] %s5958_s20 }
  0x3f   : > { %1328 = vmatprep.subr.mxu0 %v6720_v0  ;;  %1553 = vmatprep.subr.mxu1 %v6720_v0  ;;  %v1209_v58 = vld [vmem:[%s9386_s1 + $0x198] sm:$0xff]  ;;  %v1208_v60 = vld [vmem:[%s9386_s1 + $0x190] sm:$0xff]  ;;  %v1207_v62 = vld [vmem:[%s9386_s1 + $0x188] sm:$0xff]  ;;  %s9345_s28 = scalar_lea.sflag [#allocation6], %s284_s9  ;;  %s6651_s22 = scalar_lea.vmem %s9338_s20, 1024 }
  0x40   : > { %1329 = vmatpush1.msra.mxu0 %v1160_v27  ;;  %1554 = vmatpush1.msra.mxu1 %v1192_v28  ;;  %v356_v63 = vld [vmem:[%s7116_s19 + $0x1] sm:$0xff]  ;;  %v6040_v4 = vld [vmem:[%s7116_s19 + $0x18] sm:$0xff]  ;;  %v357_v7 = vld [vmem:[%s7116_s19 + $0x9] sm:$0xff]  ;;  %p6652_p8 = scmp.ne.s32.totalorder %s9338_s20, %s6651_s22  ;;  %s6722_s8 = smov [#allocation7]  }
  0x41   : > { %1330 = vmatprep.subr.mxu0 %v6720_v0  ;;  %1555 = vmatprep.subr.mxu1 %v6720_v0  ;;  %v1174_v1 = vld [vmem:[%s9386_s1 + $0x80] sm:$0xff]  ;;  %v1237_v6 = vld [vmem:[%s9386_s1 + $0x278] sm:$0xff]  ;;  %v293_v9 = vld [vmem:[%s7116_s19 + $0x8] sm:$0xff]  ;;  %s6655_s13 = sshll.u32 %s6722_s8, 4  ;;  %s6656_s13 = int_to_ptr.vmem [resolvable:$false] %s6655_s13 }
  0x42   : > { %1331 = vmatpush1.msra.mxu0 %v1159_v29  ;;  %1556 = vmatpush1.msra.mxu1 %v1191_v30  ;;  %v292_v2 = vld [vmem:[%s7116_s19] sm:$0xff]  ;;  %v1236_v10 = vld [vmem:[%s9386_s1 + $0x270] sm:$0xff]  ;;  %v1235_v14 = vld [vmem:[%s9386_s1 + $0x268] sm:$0xff]  ;;  %p6653_p9 = pnand %p6652_p8, %p6803_p5  ;;  %s6657_s15 = scalar_lea.vmem %s6656_s13, 2048 }
  0x43   : > { %1332 = vmatprep.subr.mxu0 %v6720_v0  ;;  %1557 = vmatprep.subr.mxu1 %v6720_v0  ;;  %v1206_v3 = vld [vmem:[%s9386_s1 + $0x180] sm:$0xff]  ;;  %v421_v12 = vld [vmem:[%s7116_s19 + $0xa] sm:$0xff]  ;;  %v7174_v18 = vld [vmem:[%s7116_s19 + $0x38] sm:$0xff]  ;;  %p6658_p11 = scmp.lt.s32.totalorder %s9338_s20, %s6656_s13  ;;  %p6659_p12 = scmp.lt.s32.totalorder %s6657_s15, %s6651_s22 }
  0x44   : > { %1333 = vmatpush1.msra.mxu0 %v1158_v31  ;;  %1558 = vmatpush1.msra.mxu1 %v1190_v32  ;;  %v420_v5 = vld [vmem:[%s7116_s19 + $0x2] sm:$0xff]  ;;  %v7151_v11 = vld [vmem:[%s7116_s19 + $0x19] sm:$0xff]  ;;  %v7156_v13 = vld [vmem:[%s7116_s19 + $0x30] sm:$0xff]  ;;  %p6654_p10 = pneg %p6653_p9 }
  0x45   : > { %1334 = vmatprep.subr.mxu0 %v6720_v0  ;;  %1559 = vmatprep.subr.mxu1 %v6720_v0  ;;  %v6041_v8 = vld [vmem:[%s7116_s19 + $0x20] sm:$0xff]  ;;  %v1233_v19 = vld [vmem:[%s9386_s1 + $0x258] sm:$0xff]  ;;  %v1232_v21 = vld [vmem:[%s9386_s1 + $0x250] sm:$0xff]  ;;  %p6660_p13 = por %p6659_p12, %p6658_p11 }
  0x46   : > { %1335 = vmatpush2.msra.mxu0 %v1189_v33  ;;  %1560 = vmatpush2.msra.mxu1 %v1221_v34  ;;  %v7164_v15 = vld [vmem:[%s7116_s19 + $0x21] sm:$0xff]  ;;  %v7183_v20 = vld [vmem:[%s7116_s19 + $0x31] sm:$0xff]  ;;  %v7203_v25 = vld [vmem:[%s7116_s19 + $0x39] sm:$0xff] }
  0x47   : > { %1336 = vmatprep.subr.mxu0 %v6720_v0  ;;  %1561 = vmatprep.subr.mxu1 %v6720_v0  ;;  %v1234_v16 = vld [vmem:[%s9386_s1 + $0x260] sm:$0xff]  ;;  %v7194_v23 = vld [vmem:[%s7116_s19 + $0x48] sm:$0xff]  ;;  %v7211_v27 = vld [vmem:[%s7116_s19 + $0x32] sm:$0xff]  ;;  %p6661_p0 = pnand %p6660_p13, %p6654_p10 }
  0x48   : > { %1337 = vmatpush2.msra.mxu0 %v1188_v35  ;;  %1562 = vmatpush2.msra.mxu1 %v1220_v36  ;;  %v7171_v17 = vld [vmem:[%s7116_s19 + $0x1a] sm:$0xff]  ;;  %v7191_v22 = vld [vmem:[%s7116_s19 + $0x22] sm:$0xff]  ;;  %v7215_v28 = vld [vmem:[%s7116_s19 + $0x50] sm:$0xff] }
  0x49   : > { %1338 = vmatprep.subr.mxu0 %v6720_v0  ;;  %1563 = vmatprep.subr.mxu1 %v6720_v0  ;;  %v1231_v24 = vld [vmem:[%s9386_s1 + $0x248] sm:$0xff]  ;;  %v1230_v26 = vld [vmem:[%s9386_s1 + $0x240] sm:$0xff]  ;;  %v1229_v29 = vld [vmem:[%s9386_s1 + $0x238] sm:$0xff] }
  0x4a   : > { %1339 = vmatpush2.msra.mxu0 %v1187_v37  ;;  %1564 = vmatpush2.msra.mxu1 %v1219_v38  ;;  %v7224_v30 = vld [vmem:[%s7116_s19 + $0x49] sm:$0xff]  ;;  %v7232_v32 = vld [vmem:[%s7116_s19 + $0x3a] sm:$0xff]  ;;  %v7245_v35 = vld [vmem:[%s7116_s19 + $0x51] sm:$0xff] }
  0x4b   : > { %1340 = vmatprep.subr.mxu0 %v6720_v0  ;;  %1565 = vmatprep.subr.mxu1 %v6720_v0  ;;  %v1228_v31 = vld [vmem:[%s9386_s1 + $0x230] sm:$0xff]  ;;  %v7236_v33 = vld [vmem:[%s7116_s19 + $0x60] sm:$0xff]  ;;  %v1227_v34 = vld [vmem:[%s9386_s1 + $0x228] sm:$0xff] }
  0x4c   : > { %1341 = vmatpush2.msra.mxu0 %v1186_v39  ;;  %1566 = vmatpush2.msra.mxu1 %v1218_v40  ;;  %v1226_v36 = vld [vmem:[%s9386_s1 + $0x220] sm:$0xff]  ;;  %v7253_v37 = vld [vmem:[%s7116_s19 + $0x4a] sm:$0xff]  ;;  %v1225_v39 = vld [vmem:[%s9386_s1 + $0x218] sm:$0xff] }
  0x4d   : > { %1342 = vmatprep.subr.mxu0 %v6720_v0  ;;  %1567 = vmatprep.subr.mxu1 %v6720_v0  ;;  %v7257_v38 = vld [vmem:[%s7116_s19 + $0x68] sm:$0xff] }
  0x4e   : > { %1343 = vmatpush2.msra.mxu0 %v1185_v41  ;;  %1568 = vmatpush2.msra.mxu1 %v1217_v42  ;;  %v7266_v40 = vld [vmem:[%s7116_s19 + $0x61] sm:$0xff]  ;;  %v1224_v41 = vld [vmem:[%s9386_s1 + $0x210] sm:$0xff] }
  0x4f   : > { %1344 = vmatprep.subr.mxu0 %v6720_v0  ;;  %1569 = vmatprep.subr.mxu1 %v6720_v0  ;;  %v7274_v42 = vld [vmem:[%s7116_s19 + $0x52] sm:$0xff] }
  0x50   : > { %1345 = vmatpush2.msra.mxu0 %v1184_v43  ;;  %1570 = vmatpush2.msra.mxu1 %v1216_v44  ;;  %v7278_v43 = vld [vmem:[%s7116_s19 + $0x78] sm:$0xff]  ;;  %v1223_v44 = vld [vmem:[%s9386_s1 + $0x208] sm:$0xff] }
  0x51   : > { %1346 = vmatprep.subr.mxu0 %v6720_v0  ;;  %1571 = vmatprep.subr.mxu1 %v6720_v0 }
  0x52   : > { %1347 = vmatpush2.msra.mxu0 %v1183_v45  ;;  %1572 = vmatpush2.msra.mxu1 %v1215_v46  ;;  %v7287_v45 = vld [vmem:[%s7116_s19 + $0x69] sm:$0xff]  ;;  %v1222_v46 = vld [vmem:[%s9386_s1 + $0x200] sm:$0xff] }
  0x53   : > { %1348 = vmatprep.subr.mxu0 %v6720_v0  ;;  %1573 = vmatprep.subr.mxu1 %v6720_v0 }
  0x54   : > { %1349 = vmatpush2.msra.mxu0 %v1182_v47  ;;  %1574 = vmatpush2.msra.mxu1 %v1214_v48  ;;  %v7295_v47 = vld [vmem:[%s7116_s19 + $0x62] sm:$0xff] }
  0x55   : > { %1350 = vmatprep.subr.mxu0 %v6720_v0  ;;  %1575 = vmatprep.subr.mxu1 %v6720_v0  ;;  %v7299_v48 = vld [vmem:[%s7116_s19 + $0x80] sm:$0xff] }
  0x56   : > { %1351 = vmatpush2.msra.mxu0 %v1181_v49  ;;  %1576 = vmatpush2.msra.mxu1 %v1213_v50  ;;  %v1253_v49 = vld [vmem:[%s9386_s1 + $0x2f8] sm:$0xff] }
  0x57   : > { %1352 = vmatprep.subr.mxu0 %v6720_v0  ;;  %1577 = vmatprep.subr.mxu1 %v6720_v0  ;;  %v7308_v50 = vld [vmem:[%s7116_s19 + $0x79] sm:$0xff] }
  0x58   : > { %1353 = vmatpush2.msra.mxu0 %v1180_v51  ;;  %1578 = vmatpush2.msra.mxu1 %v1212_v52  ;;  %v1269_v51 = vld [vmem:[%s9386_s1 + $0x378] sm:$0xff]  ;;  %v7316_v52 = vld [vmem:[%s7116_s19 + $0x6a] sm:$0xff] }
  0x59   : > { %1354 = vmatprep.subr.mxu0 %v6720_v0  ;;  %1579 = vmatprep.subr.mxu1 %v6720_v0 }
  0x5a   : > { %1355 = vmatpush2.msra.mxu0 %v1179_v53  ;;  %1580 = vmatpush2.msra.mxu1 %v1211_v54  ;;  %v7320_v53 = vld [vmem:[%s7116_s19 + $0x90] sm:$0xff] }
  0x5b   : > { %1356 = vmatprep.subr.mxu0 %v6720_v0  ;;  %1581 = vmatprep.subr.mxu1 %v6720_v0  ;;  %v1268_v54 = vld [vmem:[%s9386_s1 + $0x370] sm:$0xff] }
  0x5c   : > { %1357 = vmatpush2.msra.mxu0 %v1178_v55  ;;  %1582 = vmatpush2.msra.mxu1 %v1210_v56  ;;  %v7329_v55 = vld [vmem:[%s7116_s19 + $0x81] sm:$0xff]  ;;  %v1252_v56 = vld [vmem:[%s9386_s1 + $0x2f0] sm:$0xff] }
  0x5d   : > { %1358 = vmatprep.subr.mxu0 %v6720_v0  ;;  %1583 = vmatprep.subr.mxu1 %v6720_v0 }
  0x5e   : > { %1359 = vmatpush2.msra.mxu0 %v1177_v57  ;;  %1584 = vmatpush2.msra.mxu1 %v1209_v58  ;;  %v7337_v57 = vld [vmem:[%s7116_s19 + $0x7a] sm:$0xff] }
  0x5f   : > { %1360 = vmatprep.subr.mxu0 %v6720_v0  ;;  %1585 = vmatprep.subr.mxu1 %v6720_v0  ;;  %v7342_v58 = vld [vmem:[%s7116_s19 + $0x98] sm:$0xff] }
  0x60   : > { %1361 = vmatpush2.msra.mxu0 %v1176_v59  ;;  %1586 = vmatpush2.msra.mxu1 %v1208_v60  ;;  %v1267_v59 = vld [vmem:[%s9386_s1 + $0x368] sm:$0xff]  ;;  %v7350_v60 = vld [vmem:[%s7116_s19 + $0x91] sm:$0xff] }
  0x61   : > { %1362 = vmatprep.subr.mxu0 %v6720_v0  ;;  %1587 = vmatprep.subr.mxu1 %v6720_v0 }
  0x62   : > { %1363 = vmatpush2.msra.mxu0 %v1175_v61  ;;  %1588 = vmatpush2.msra.mxu1 %v1207_v62  ;;  %v7355_v61 = vld [vmem:[%s7116_s19 + $0x82] sm:$0xff] }
  0x63   : > { %1364 = vmatprep.subr.mxu0 %v6720_v0  ;;  %1366 = vmatprep.mubr.f32.mxu0 %v356_v63  ;;  %v1251_v62 = vld [vmem:[%s9386_s1 + $0x2e8] sm:$0xff] }
  0x64   : > { %1365 = vmatpush2.msra.mxu0 %v1174_v1  ;;  %1589 = vmatprep.subr.mxu1 %v6720_v0  ;;  %v7362_v63 = vld [vmem:[%s7116_s19 + $0xa8] sm:$0xff]  ;;  %v1266_v1 = vld [vmem:[%s9386_s1 + $0x360] sm:$0xff] }
  0x65   : > { %1367 = vmatmul.mubr.f32.vlgmr.msra.gmra.mxu0 %v292_v2  ;;  %1590 = vmatpush2.msra.mxu1 %v1206_v3  ;;  %v7372_v2 = vld [vmem:[%s7116_s19 + $0x99] sm:$0xff] }
  0x66   : > { %1591 = vmatprep.mubr.f32.mxu1 %v6040_v4  ;;  %1752 = vmatprep.subr.mxu0 %v6720_v0  ;;  %v1265_v3 = vld [vmem:[%s9386_s1 + $0x358] sm:$0xff] }
  0x67   : > { %1592 = vmatmul.mubr.f32.vlgmr.msra.gmra.mxu1 %v420_v5  ;;  %1753 = vmatpush1.msra.mxu0 %v1237_v6  ;;  %v7383_v5 = vld [vmem:[%s7116_s19 + $0xb0] sm:$0xff] }
  0x68   : > { %1371 = vmatprep.mubr.f32.mxu0 %v357_v7  ;;  %1596 = vmatprep.mubr.f32.mxu1 %v6041_v8  ;;  %v1264_v6 = vld [vmem:[%s9386_s1 + $0x350] sm:$0xff] }
  0x69   : > { %1372 = vmatmul.mubr.f32.gmra.mxu0 %v293_v9  ;;  %1754 = vmatprep.subr.mxu0 %v6720_v0  ;;  %v7392_v7 = vld [vmem:[%s7116_s19 + $0xa9] sm:$0xff]  ;;  %v7400_v9 = vld [vmem:[%s7116_s19 + $0x9a] sm:$0xff] }
  0x6a   : > { %1755 = vmatpush1.msra.mxu0 %v1236_v10  ;;  %1376 = vmatprep.mubr.f32.mxu0 %v7151_v11  ;;  %v7405_v10 = vld [vmem:[%s7116_s19 + $0xc0] sm:$0xff] }
  0x6b   : > { %1597 = vmatmul.mubr.f32.gmra.mxu1 %v421_v12  ;;  %1756 = vmatprep.subr.mxu0 %v6720_v0  ;;  %v1263_v12 = vld [vmem:[%s9386_s1 + $0x348] sm:$0xff] }
  0x6c   : > { %1601 = vmatprep.mubr.f32.mxu1 %v7156_v13  ;;  %1757 = vmatpush1.msra.mxu0 %v1235_v14  ;;  %v7413_v14 = vld [vmem:[%s7116_s19 + $0xb1] sm:$0xff] }
  0x6d   : > { %1377 = vmatmul.mubr.f32.gmra.mxu0 %v6040_v4  ;;  %1758 = vmatprep.subr.mxu0 %v6720_v0  ;;  %v7379_v4 = vld [vmem:[%s7116_s19 + $0x92] sm:$0xff] }
  0x6e   : > { %1381 = vmatprep.mubr.f32.mxu0 %v7164_v15  ;;  %1759 = vmatpush1.msra.mxu0 %v1234_v16  ;;  %v7418_v16 = vld [vmem:[%s7116_s19 + $0xaa] sm:$0xff] }
  0x6f   : > { %1602 = vmatmul.mubr.f32.gmra.mxu1 %v7171_v17  ;;  %1760 = vmatprep.subr.mxu0 %v6720_v0 }
  0x70   : > { %1606 = vmatprep.mubr.f32.mxu1 %v7174_v18  ;;  %1761 = vmatpush1.msra.mxu0 %v1233_v19  ;;  %v1249_v19 = vld [vmem:[%s9386_s1 + $0x2d8] sm:$0xff] }
  0x71   : > { %1382 = vmatmul.mubr.f32.gmra.mxu0 %v6041_v8  ;;  %1762 = vmatprep.subr.mxu0 %v6720_v0  ;;  %v1250_v8 = vld [vmem:[%s9386_s1 + $0x2e0] sm:$0xff] }
  0x72   : > { %1386 = vmatprep.mubr.f32.mxu0 %v7183_v20  ;;  %1763 = vmatpush1.msra.mxu0 %v1232_v21  ;;  %v7425_v21 = vld [vmem:[%s7116_s19 + $0xc8] sm:$0xff] }
  0x73   : > { %1607 = vmatmul.mubr.f32.gmra.mxu1 %v7191_v22  ;;  %1764 = vmatprep.subr.mxu0 %v6720_v0 }
  0x74   : > { %1611 = vmatprep.mubr.f32.mxu1 %v7194_v23  ;;  %1765 = vmatpush1.msra.mxu0 %v1231_v24  ;;  %v1262_v24 = vld [vmem:[%s9386_s1 + $0x340] sm:$0xff] }
  0x75   : > { %1387 = vmatmul.mubr.f32.gmra.mxu0 %v7156_v13  ;;  %1766 = vmatprep.subr.mxu0 %v6720_v0 }
  0x76   : > { %1391 = vmatprep.mubr.f32.mxu0 %v7203_v25  ;;  %1767 = vmatpush1.msra.mxu0 %v1230_v26  ;;  %v7435_v26 = vld [vmem:[%s7116_s19 + $0xc1] sm:$0xff] }
  0x77   : > { %1612 = vmatmul.mubr.f32.gmra.mxu1 %v7211_v27  ;;  %1768 = vmatprep.subr.mxu0 %v6720_v0 }
  0x78   : > { %1616 = vmatprep.mubr.f32.mxu1 %v7215_v28  ;;  %1769 = vmatpush1.msra.mxu0 %v1229_v29  ;;  %v1261_v29 = vld [vmem:[%s9386_s1 + $0x338] sm:$0xff] }
  0x79   : > { %1392 = vmatmul.mubr.f32.gmra.mxu0 %v7174_v18  ;;  %1770 = vmatprep.subr.mxu0 %v6720_v0 }
  0x7a   : > { %1396 = vmatprep.mubr.f32.mxu0 %v7224_v30  ;;  %1771 = vmatpush1.msra.mxu0 %v1228_v31  ;;  %v7442_v31 = vld [vmem:[%s7116_s19 + $0xb2] sm:$0xff] }
  0x7b   : > { %1617 = vmatmul.mubr.f32.gmra.mxu1 %v7232_v32  ;;  %1772 = vmatprep.subr.mxu0 %v6720_v0 }
  0x7c   : > { %1621 = vmatprep.mubr.f32.mxu1 %v7236_v33  ;;  %1773 = vmatpush1.msra.mxu0 %v1227_v34  ;;  %v7446_v34 = vld [vmem:[%s7116_s19 + $0xd8] sm:$0xff] }
  0x7d   : > { %1397 = vmatmul.mubr.f32.gmra.mxu0 %v7194_v23  ;;  %1774 = vmatprep.subr.mxu0 %v6720_v0 }
  0x7e   : > { %1401 = vmatprep.mubr.f32.mxu0 %v7245_v35  ;;  %1775 = vmatpush1.msra.mxu0 %v1226_v36  ;;  %v1260_v36 = vld [vmem:[%s9386_s1 + $0x330] sm:$0xff] }
  0x7f   : > { %1622 = vmatmul.mubr.f32.gmra.mxu1 %v7253_v37  ;;  %1776 = vmatprep.subr.mxu0 %v6720_v0 }
  0x80   : > { %1626 = vmatprep.mubr.f32.mxu1 %v7257_v38  ;;  %1777 = vmatpush1.msra.mxu0 %v1225_v39  ;;  %v7455_v39 = vld [vmem:[%s7116_s19 + $0xc9] sm:$0xff] }
  0x81   : > { %1402 = vmatmul.mubr.f32.gmra.mxu0 %v7215_v28  ;;  %1778 = vmatprep.subr.mxu0 %v6720_v0 }
  0x82   : > { %1406 = vmatprep.mubr.f32.mxu0 %v7266_v40  ;;  %1779 = vmatpush1.msra.mxu0 %v1224_v41  ;;  %v1248_v41 = vld [vmem:[%s9386_s1 + $0x2d0] sm:$0xff] }
  0x83   : > { %1627 = vmatmul.mubr.f32.gmra.mxu1 %v7274_v42  ;;  %1780 = vmatprep.subr.mxu0 %v6720_v0 }
  0x84   : > { %1631 = vmatprep.mubr.f32.mxu1 %v7278_v43  ;;  %1781 = vmatpush1.msra.mxu0 %v1223_v44  ;;  %v7463_v44 = vld [vmem:[%s7116_s19 + $0xc2] sm:$0xff] }
  0x85   : > { %1407 = vmatmul.mubr.f32.gmra.mxu0 %v7236_v33  ;;  %1782 = vmatprep.subr.mxu0 %v6720_v0 }
  0x86   : > { %1411 = vmatprep.mubr.f32.mxu0 %v7287_v45  ;;  %1783 = vmatpush1.msra.mxu0 %v1222_v46  ;;  %v7468_v46 = vld [vmem:[%s7116_s19 + $0xe0] sm:$0xff] }
  0x87   : > { %1632 = vmatmul.mubr.f32.gmra.mxu1 %v7295_v47  ;;  %1784 = vmatprep.subr.mxu0 %v6720_v0 }
  0x88   : > { %1636 = vmatprep.mubr.f32.mxu1 %v7299_v48  ;;  %1785 = vmatpush2.msra.mxu0 %v1253_v49  ;;  %v1259_v49 = vld [vmem:[%s9386_s1 + $0x328] sm:$0xff] }
  0x89   : > { %1412 = vmatmul.mubr.f32.gmra.mxu0 %v7257_v38  ;;  %1977 = vmatprep.subr.mxu1 %v6720_v0 }
  0x8a   : > { %1416 = vmatprep.mubr.f32.mxu0 %v7308_v50  ;;  %1978 = vmatpush1.msra.mxu1 %v1269_v51  ;;  %v7476_v51 = vld [vmem:[%s7116_s19 + $0xd9] sm:$0xff] }
  0x8b   : > { %1637 = vmatmul.mubr.f32.gmra.mxu1 %v7316_v52  ;;  %1786 = vmatprep.subr.mxu0 %v6720_v0 }
  0x8c   : > { %1641 = vmatprep.mubr.f32.mxu1 %v7320_v53  ;;  %1979 = vmatprep.subr.mxu1 %v6720_v0 }
  0x8d   : > { %1417 = vmatmul.mubr.f32.gmra.mxu0 %v7278_v43  ;;  %1980 = vmatpush1.msra.mxu1 %v1268_v54  ;;  %v7481_v54 = vld [vmem:[%s7116_s19 + $0xca] sm:$0xff] }
  0x8e   : > { %1421 = vmatprep.mubr.f32.mxu0 %v7329_v55  ;;  %1787 = vmatpush2.msra.mxu0 %v1252_v56  ;;  %v1247_v56 = vld [vmem:[%s9386_s1 + $0x2c8] sm:$0xff] }
  0x8f   : > { %1642 = vmatmul.mubr.f32.gmra.mxu1 %v7337_v57  ;;  %1981 = vmatprep.subr.mxu1 %v6720_v0 }
  0x90   : > { %1646 = vmatprep.mubr.f32.mxu1 %v7342_v58  ;;  %1982 = vmatpush1.msra.mxu1 %v1267_v59  ;;  %v7488_v59 = vld [vmem:[%s7116_s19 + $0xf0] sm:$0xff] }
  0x91   : > { %1422 = vmatmul.mubr.f32.gmra.mxu0 %v7299_v48  ;;  %1788 = vmatprep.subr.mxu0 %v6720_v0  ;;  %9440 = vst [vmem:[#allocation10_spill] sm:$0xff] %v7488_v59 }
  0x92   : > { %1426 = vmatprep.mubr.f32.mxu0 %v7350_v60  ;;  %1983 = vmatprep.subr.mxu1 %v6720_v0 }
  0x93   : > { %1647 = vmatmul.mubr.f32.gmra.mxu1 %v7355_v61  ;;  %1789 = vmatpush2.msra.mxu0 %v1251_v62  ;;  %v1258_v62 = vld [vmem:[%s9386_s1 + $0x320] sm:$0xff] }
  0x94   : > { %1651 = vmatprep.mubr.f32.mxu1 %v7362_v63  ;;  %1984 = vmatpush1.msra.mxu1 %v1266_v1  ;;  %v7498_v1 = vld [vmem:[%s7116_s19 + $0xe1] sm:$0xff] }
  0x95   : > { %1427 = vmatmul.mubr.f32.gmra.mxu0 %v7320_v53  ;;  %1985 = vmatprep.subr.mxu1 %v6720_v0 }
  0x96   : > { %1431 = vmatprep.mubr.f32.mxu0 %v7372_v2  ;;  %1986 = vmatpush1.msra.mxu1 %v1265_v3  ;;  %v1257_v3 = vld [vmem:[%s9386_s1 + $0x318] sm:$0xff] }
  0x97   : > { %1652 = vmatmul.mubr.f32.gmra.mxu1 %v7379_v4  ;;  %1790 = vmatprep.subr.mxu0 %v6720_v0 }
  0x98   : > { %1656 = vmatprep.mubr.f32.mxu1 %v7383_v5  ;;  %1987 = vmatprep.subr.mxu1 %v6720_v0 }
  0x99   : > { %1432 = vmatmul.mubr.f32.gmra.mxu0 %v7342_v58  ;;  %1988 = vmatpush1.msra.mxu1 %v1264_v6  ;;  %v7505_v6 = vld [vmem:[%s7116_s19 + $0xda] sm:$0xff] }
  0x9a   : > { %1436 = vmatprep.mubr.f32.mxu0 %v7392_v7  ;;  %1791 = vmatpush2.msra.mxu0 %v1250_v8  ;;  %v7509_v8 = vld [vmem:[%s7116_s19 + $0xf8] sm:$0xff] }
  0x9b   : > { %1657 = vmatmul.mubr.f32.gmra.mxu1 %v7400_v9  ;;  %1989 = vmatprep.subr.mxu1 %v6720_v0  ;;  %9441 = vst [vmem:[#allocation11_spill] sm:$0xff] %v7509_v8 }
  0x9c   : > { %1661 = vmatprep.mubr.f32.mxu1 %v7405_v10  ;;  %1990 = vmatpush1.msra.mxu1 %v1263_v12  ;;  %v1256_v12 = vld [vmem:[%s9386_s1 + $0x310] sm:$0xff] }
  0x9d   : > { %1437 = vmatmul.mubr.f32.gmra.mxu0 %v7362_v63  ;;  %1792 = vmatprep.subr.mxu0 %v6720_v0 }
  0x9e   : > { %1441 = vmatprep.mubr.f32.mxu0 %v7413_v14  ;;  %1991 = vmatprep.subr.mxu1 %v6720_v0 }
  0x9f   : > { %1662 = vmatmul.mubr.f32.gmra.mxu1 %v7418_v16  ;;  %1793 = vmatpush2.msra.mxu0 %v1249_v19  ;;  %v7518_v19 = vld [vmem:[%s7116_s19 + $0xf1] sm:$0xff] }
  0xa0   : > { %1666 = vmatprep.mubr.f32.mxu1 %v7425_v21  ;;  %1992 = vmatpush1.msra.mxu1 %v1262_v24  ;;  %v1246_v24 = vld [vmem:[%s9386_s1 + $0x2c0] sm:$0xff] }
  0xa1   : > { %1442 = vmatmul.mubr.f32.gmra.mxu0 %v7383_v5  ;;  %1993 = vmatprep.subr.mxu1 %v6720_v0 }
  0xa2   : > { %1446 = vmatprep.mubr.f32.mxu0 %v7435_v26  ;;  %1994 = vmatpush1.msra.mxu1 %v1261_v29  ;;  %v7526_v29 = vld [vmem:[%s7116_s19 + $0xe2] sm:$0xff] }
  0xa3   : > { %1667 = vmatmul.mubr.f32.gmra.mxu1 %v7442_v31  ;;  %1794 = vmatprep.subr.mxu0 %v6720_v0 }
  0xa4   : > { %1671 = vmatprep.mubr.f32.mxu1 %v7446_v34  ;;  %1995 = vmatprep.subr.mxu1 %v6720_v0 }
  0xa5   : > { %1447 = vmatmul.mubr.f32.gmra.mxu0 %v7405_v10  ;;  %1996 = vmatpush1.msra.mxu1 %v1260_v36  ;;  %v7531_v36 = vld [vmem:[%s7116_s19 + $0x108] sm:$0xff] }
  0xa6   : > { %1451 = vmatprep.mubr.f32.mxu0 %v7455_v39  ;;  %1795 = vmatpush2.msra.mxu0 %v1248_v41  ;;  %9442 = vst [vmem:[#allocation12_spill] sm:$0xff] %v7531_v36  ;;  %v1255_v41 = vld [vmem:[%s9386_s1 + $0x308] sm:$0xff] }
  0xa7   : > { %1672 = vmatmul.mubr.f32.gmra.mxu1 %v7463_v44  ;;  %1997 = vmatprep.subr.mxu1 %v6720_v0 }
  0xa8   : > { %1676 = vmatprep.mubr.f32.mxu1 %v7468_v46  ;;  %1998 = vmatpush1.msra.mxu1 %v1259_v49  ;;  %v7539_v49 = vld [vmem:[%s7116_s19 + $0xf9] sm:$0xff] }
  0xa9   : > { %1452 = vmatmul.mubr.f32.gmra.mxu0 %v7425_v21  ;;  %1796 = vmatprep.subr.mxu0 %v6720_v0  ;;  %9443 = vst [vmem:[#allocation13_spill] sm:$0xff] %v7539_v49 }
  0xaa   : > { %1456 = vmatprep.mubr.f32.mxu0 %v7476_v51  ;;  %1999 = vmatprep.subr.mxu1 %v6720_v0 }
  0xab   : > { %1677 = vmatmul.mubr.f32.gmra.mxu1 %v7481_v54  ;;  %1797 = vmatpush2.msra.mxu0 %v1247_v56  ;;  %v7544_v56 = vld [vmem:[%s7116_s19 + $0xf2] sm:$0xff] }
  0xac   : > { %1681 = vmatprep.mubr.f32.mxu1 %v7488_v59  ;;  %2000 = vmatpush1.msra.mxu1 %v1258_v62  ;;  %9444 = vst [vmem:[#allocation14_spill] sm:$0xff] %v7544_v56  ;;  %v1245_v62 = vld [vmem:[%s9386_s1 + $0x2b8] sm:$0xff] }
  0xad   : > { %1457 = vmatmul.mubr.f32.gmra.mxu0 %v7446_v34  ;;  %2001 = vmatprep.subr.mxu1 %v6720_v0 }
  0xae   : > { %1461 = vmatprep.mubr.f32.mxu0 %v7498_v1  ;;  %2002 = vmatpush1.msra.mxu1 %v1257_v3  ;;  %v7551_v3 = vld [vmem:[%s7116_s19 + $0x110] sm:$0xff] }
  0xaf   : > { %1682 = vmatmul.mubr.f32.gmra.mxu1 %v7505_v6  ;;  %1798 = vmatprep.subr.mxu0 %v6720_v0  ;;  %9445 = vst [vmem:[#allocation15_spill] sm:$0xff] %v7551_v3 }
  0xb0   : > { %1686 = vmatprep.mubr.f32.mxu1 %v7509_v8  ;;  %2003 = vmatprep.subr.mxu1 %v6720_v0 }
  0xb1   : > { %1462 = vmatmul.mubr.f32.gmra.mxu0 %v7468_v46  ;;  %2004 = vmatpush1.msra.mxu1 %v1256_v12  ;;  %v1254_v12 = vld [vmem:[%s9386_s1 + $0x300] sm:$0xff] }
  0xb2   : > { %1466 = vmatprep.mubr.f32.mxu0 %v7518_v19  ;;  %1799 = vmatpush2.msra.mxu0 %v1246_v24  ;;  %v7561_v24 = vld [vmem:[%s7116_s19 + $0x109] sm:$0xff] }
  0xb3   : > { %1687 = vmatmul.mubr.f32.gmra.mxu1 %v7526_v29  ;;  %2005 = vmatprep.subr.mxu1 %v6720_v0  ;;  %9446 = vst [vmem:[#allocation16_spill] sm:$0xff] %v7561_v24 }
  0xb4   : > { %1691 = vmatprep.mubr.f32.mxu1 %v7531_v36  ;;  %2006 = vmatpush1.msra.mxu1 %v1255_v41  ;;  %v1285_v41 = vld [vmem:[%s9386_s1 + $0x3f8] sm:$0xff] }
  0xb5   : > { %1467 = vmatmul.mubr.f32.gmra.mxu0 %v7488_v59  ;;  %1800 = vmatprep.subr.mxu0 %v6720_v0  ;;  %v7568_v59 = vld [vmem:[%s7116_s19 + $0xfa] sm:$0xff] }
  0xb6   : > { %1471 = vmatprep.mubr.f32.mxu0 %v7539_v49  ;;  %2007 = vmatprep.subr.mxu1 %v6720_v0  ;;  %9447 = vst [vmem:[#allocation17_spill] sm:$0xff] %v7568_v59  ;;  %v7572_v0 = vld [vmem:[%s7116_s19 + $0x120] sm:$0xff]  ;;  %v7574_v49 = vld [vmem:[#allocation2 + $0x8] sm:$0xff] }
  0xb7   : > { %1692 = vmatmul.mubr.f32.gmra.mxu1 %v7544_v56  ;;  %1801 = vmatpush2.msra.mxu0 %v1245_v62  ;;  %9448 = vst [vmem:[#allocation18_spill] sm:$0xff] %v7572_v0  ;;  %v1284_v62 = vld [vmem:[%s9386_s1 + $0x3f0] sm:$0xff]  ;;  %v7604_v56 = vld [vmem:[%s7116_s19 + $0x121] sm:$0xff] }
  0xb8   : > { %1696 = vmatprep.mubr.f32.mxu1 %v7551_v3  ;;  %2008 = vmatpush1.msra.mxu1 %v1254_v12  ;;  %v7583_v12 = vld [vmem:[%s7116_s19 + $0x111] sm:$0xff]  ;;  %9452 = vst [vmem:[#allocation22_spill] sm:$0xff] %v7604_v56 }
  0xb9   : > { %1472 = vmatmul.mubr.f32.gmra.mxu0 %v7509_v8  ;;  %2009 = vmatprep.subr.mxu1 %v7574_v49  ;;  %9449 = vst [vmem:[#allocation19_spill] sm:$0xff] %v7583_v12  ;;  %v1244_v8 = vld [vmem:[%s9386_s1 + $0x2b0] sm:$0xff] }
  0xba   : > { %1476 = vmatprep.mubr.f32.mxu0 %v7561_v24  ;;  %2010 = vmatpush2.msra.mxu1 %v1285_v41  ;;  %v7591_v24 = vld [vmem:[%s7116_s19 + $0x10a] sm:$0xff] }
  0xbb   : > { %1697 = vmatmul.mubr.f32.gmra.mxu1 %v7568_v59  ;;  %1802 = vmatprep.subr.mxu0 %v7574_v49  ;;  %9450 = vst [vmem:[#allocation20_spill] sm:$0xff] %v7591_v24  ;;  %v7596_v41 = vld [vmem:[%s7116_s19 + $0x128] sm:$0xff] }
  0xbc   : > { %1701 = vmatprep.mubr.f32.mxu1 %v7572_v0  ;;  %2011 = vmatprep.subr.mxu1 %v7574_v49  ;;  %9451 = vst [vmem:[#allocation21_spill] sm:$0xff] %v7596_v41  ;;  %v1283_v59 = vld [vmem:[%s9386_s1 + $0x3e8] sm:$0xff] }
  0xbd   : > { %1477 = vmatmul.mubr.f32.gmra.mxu0 %v7531_v36  ;;  %2012 = vmatpush2.msra.mxu1 %v1284_v62  ;;  %v7609_v36 = vld [vmem:[%s7116_s19 + $0x112] sm:$0xff]  ;;  %v1243_v62 = vld [vmem:[%s9386_s1 + $0x2a8] sm:$0xff] }
  0xbe   : > { %1481 = vmatprep.mubr.f32.mxu0 %v7583_v12  ;;  %1803 = vmatpush2.msra.mxu0 %v1244_v8  ;;  %9453 = vst [vmem:[#allocation23_spill] sm:$0xff] %v7609_v36  ;;  %v7616_v8 = vld [vmem:[%s7116_s19 + $0x138] sm:$0xff]  ;;  %v7633_v12 = vld [vmem:[%s7116_s19 + $0x122] sm:$0xff] }
  0xbf   : > { %1702 = vmatmul.mubr.f32.gmra.mxu1 %v7591_v24  ;;  %2013 = vmatprep.subr.mxu1 %v7574_v49  ;;  %9454 = vst [vmem:[#allocation24_spill] sm:$0xff] %v7616_v8  ;;  %v1282_v24 = vld [vmem:[%s9386_s1 + $0x3e0] sm:$0xff]  ;;  %9456 = vst [vmem:[#allocation26_spill] sm:$0xff] %v7633_v12 }
  0xc0   : > { %1706 = vmatprep.mubr.f32.mxu1 %v7596_v41  ;;  %2014 = vmatpush2.msra.mxu1 %v1283_v59  ;;  %v7626_v59 = vld [vmem:[%s7116_s19 + $0x129] sm:$0xff] }
  0xc1   : > { %1482 = vmatmul.mubr.f32.gmra.mxu0 %v7551_v3  ;;  %1804 = vmatprep.subr.mxu0 %v7574_v49  ;;  %9455 = vst [vmem:[#allocation25_spill] sm:$0xff] %v7626_v59  ;;  %v1281_v3 = vld [vmem:[%s9386_s1 + $0x3d8] sm:$0xff] }
  0xc2   : > { %1486 = vmatprep.mubr.f32.mxu0 %v7604_v56  ;;  %2015 = vmatprep.subr.mxu1 %v7574_v49  ;;  %v7637_v56 = vld [vmem:[%s7116_s19 + $0x140] sm:$0xff] }
  0xc3   : > { %1707 = vmatmul.mubr.f32.gmra.mxu1 %v7609_v36  ;;  %1805 = vmatpush2.msra.mxu0 %v1243_v62  ;;  %9457 = vst [vmem:[#allocation27_spill] sm:$0xff] %v7637_v56  ;;  %v1280_v62 = vld [vmem:[%s9386_s1 + $0x3d0] sm:$0xff]  ;;  %v7646_v36 = vld [vmem:[%s7116_s19 + $0x139] sm:$0xff] }
  0xc4   : > { %1711 = vmatprep.mubr.f32.mxu1 %v7616_v8  ;;  %2016 = vmatpush2.msra.mxu1 %v1282_v24  ;;  %9458 = vst [vmem:[#allocation28_spill] sm:$0xff] %v7646_v36  ;;  %v1242_v24 = vld [vmem:[%s9386_s1 + $0x2a0] sm:$0xff] }
  0xc5   : > { %1487 = vmatmul.mubr.f32.gmra.mxu0 %v7572_v0  ;;  %2017 = vmatprep.subr.mxu1 %v7574_v49  ;;  %v7667_v0 = vld [vmem:[%s7116_s19 + $0x141] sm:$0xff] }
  0xc6   : > { %1491 = vmatprep.mubr.f32.mxu0 %v7626_v59  ;;  %2018 = vmatpush2.msra.mxu1 %v1281_v3  ;;  %v7654_v59 = vld [vmem:[%s7116_s19 + $0x12a] sm:$0xff]  ;;  %9461 = vst [vmem:[#allocation31_spill] sm:$0xff] %v7667_v0 }
  0xc7   : > { %1712 = vmatmul.mubr.f32.gmra.mxu1 %v7633_v12  ;;  %1806 = vmatprep.subr.mxu0 %v7574_v49  ;;  %9459 = vst [vmem:[#allocation29_spill] sm:$0xff] %v7654_v59  ;;  %v7659_v3 = vld [vmem:[%s7116_s19 + $0x150] sm:$0xff]  ;;  %v1279_v12 = vld [vmem:[%s9386_s1 + $0x3c8] sm:$0xff] }
  0xc8   : > { %1716 = vmatprep.mubr.f32.mxu1 %v7637_v56  ;;  %2019 = vmatprep.subr.mxu1 %v7574_v49  ;;  %9460 = vst [vmem:[#allocation30_spill] sm:$0xff] %v7659_v3 }
  0xc9   : > { %1492 = vmatmul.mubr.f32.gmra.mxu0 %v7596_v41  ;;  %2020 = vmatpush2.msra.mxu1 %v1280_v62  ;;  %v7672_v41 = vld [vmem:[%s7116_s19 + $0x13a] sm:$0xff] }
  0xca   : > { %1496 = vmatprep.mubr.f32.mxu0 %v7646_v36  ;;  %1807 = vmatpush2.msra.mxu0 %v1242_v24  ;;  %9462 = vst [vmem:[#allocation32_spill] sm:$0xff] %v7672_v41  ;;  %v1241_v62 = vld [vmem:[%s9386_s1 + $0x298] sm:$0xff]  ;;  %v7696_v36 = vld [vmem:[%s7116_s19 + $0x142] sm:$0xff] }
  0xcb   : > { %1717 = vmatmul.mubr.f32.gmra.mxu1 %v7654_v59  ;;  %2021 = vmatprep.subr.mxu1 %v7574_v49  ;;  %v7679_v24 = vld [vmem:[%s7116_s19 + $0x158] sm:$0xff]  ;;  %v1278_v59 = vld [vmem:[%s9386_s1 + $0x3c0] sm:$0xff]  ;;  %9465 = vst [vmem:[#allocation35_spill] sm:$0xff] %v7696_v36 }
  0xcc   : > { %1721 = vmatprep.mubr.f32.mxu1 %v7659_v3  ;;  %2022 = vmatpush2.msra.mxu1 %v1279_v12  ;;  %9463 = vst [vmem:[#allocation33_spill] sm:$0xff] %v7679_v24  ;;  %v7689_v12 = vld [vmem:[%s7116_s19 + $0x151] sm:$0xff] }
  0xcd   : > { %1497 = vmatmul.mubr.f32.gmra.mxu0 %v7616_v8  ;;  %1808 = vmatprep.subr.mxu0 %v7574_v49  ;;  %9464 = vst [vmem:[#allocation34_spill] sm:$0xff] %v7689_v12  ;;  %v1277_v8 = vld [vmem:[%s9386_s1 + $0x3b8] sm:$0xff] }
  0xce   : > { %1501 = vmatprep.mubr.f32.mxu0 %v7667_v0  ;;  %2023 = vmatprep.subr.mxu1 %v7574_v49  ;;  %v7700_v0 = vld [vmem:[%s7116_s19 + $0x168] sm:$0xff] }
  0xcf   : > { %1722 = vmatmul.mubr.f32.gmra.mxu1 %v7672_v41  ;;  %1809 = vmatpush2.msra.mxu0 %v1241_v62  ;;  %v1276_v62 = vld [vmem:[%s9386_s1 + $0x3b0] sm:$0xff]  ;;  %v7709_v41 = vld [vmem:[%s7116_s19 + $0x159] sm:$0xff] }
  0xd0   : > { %1726 = vmatprep.mubr.f32.mxu1 %v7679_v24  ;;  %2024 = vmatpush2.msra.mxu1 %v1278_v59  ;;  %9466 = vst [vmem:[#allocation36_spill] sm:$0xff] %v7709_v41  ;;  %v1240_v59 = vld [vmem:[%s9386_s1 + $0x290] sm:$0xff] }
  0xd1   : > { %1502 = vmatmul.mubr.f32.gmra.mxu0 %v7637_v56  ;;  %2025 = vmatprep.subr.mxu1 %v7574_v49  ;;  %v7731_v56 = vld [vmem:[%s7116_s19 + $0x169] sm:$0xff] }
  0xd2   : > { %1506 = vmatprep.mubr.f32.mxu0 %v7689_v12  ;;  %2026 = vmatpush2.msra.mxu1 %v1277_v8  ;;  %v7717_v12 = vld [vmem:[%s7116_s19 + $0x152] sm:$0xff]  ;;  %9468 = vst [vmem:[#allocation38_spill] sm:$0xff] %v7731_v56 }
  0xd3   : > { %1727 = vmatmul.mubr.f32.gmra.mxu1 %v7696_v36  ;;  %1810 = vmatprep.subr.mxu0 %v7574_v49  ;;  %9467 = vst [vmem:[#allocation37_spill] sm:$0xff] %v7717_v12  ;;  %v7722_v8 = vld [vmem:[%s7116_s19 + $0x170] sm:$0xff]  ;;  %v1275_v36 = vld [vmem:[%s9386_s1 + $0x3a8] sm:$0xff] }
  0xd4   : > { %1731 = vmatprep.mubr.f32.mxu1 %v7700_v0  ;;  %2027 = vmatprep.subr.mxu1 %v7574_v49 }
  0xd5   : > { %1507 = vmatmul.mubr.f32.gmra.mxu0 %v7659_v3  ;;  %2028 = vmatpush2.msra.mxu1 %v1276_v62  ;;  %v7735_v3 = vld [vmem:[%s7116_s19 + $0x15a] sm:$0xff]  ;;  %v1239_v62 = vld [vmem:[%s9386_s1 + $0x288] sm:$0xff] }
  0xd6   : > { %1511 = vmatprep.mubr.f32.mxu0 %v7709_v41  ;;  %1811 = vmatpush2.msra.mxu0 %v1240_v59  ;;  %v7742_v59 = vld [vmem:[%s7116_s19 + $0x180] sm:$0xff]  ;;  %v7759_v41 = vld [vmem:[%s7116_s19 + $0x16a] sm:$0xff] }
  0xd7   : > { %1732 = vmatmul.mubr.f32.gmra.mxu1 %v7717_v12  ;;  %2029 = vmatprep.subr.mxu1 %v7574_v49  ;;  %9469 = vst [vmem:[#allocation39_spill] sm:$0xff] %v7742_v59  ;;  %v1274_v12 = vld [vmem:[%s9386_s1 + $0x3a0] sm:$0xff]  ;;  %9470 = vst [vmem:[#allocation40_spill] sm:$0xff] %v7759_v41 }
  0xd8   : > { %1736 = vmatprep.mubr.f32.mxu1 %v7722_v8  ;;  %2030 = vmatpush2.msra.mxu1 %v1275_v36  ;;  %v7752_v36 = vld [vmem:[%s7116_s19 + $0x171] sm:$0xff] }
  0xd9   : > { %1512 = vmatmul.mubr.f32.gmra.mxu0 %v7679_v24  ;;  %1812 = vmatprep.subr.mxu0 %v7574_v49  ;;  %v1273_v24 = vld [vmem:[%s9386_s1 + $0x398] sm:$0xff] }
  0xda   : > { %1516 = vmatprep.mubr.f32.mxu0 %v7731_v56  ;;  %2031 = vmatprep.subr.mxu1 %v7574_v49  ;;  %v7764_v56 = vld [vmem:[%s7116_s19 + $0x188] sm:$0xff] }
  0xdb   : > { %1737 = vmatmul.mubr.f32.gmra.mxu1 %v7735_v3  ;;  %1813 = vmatpush2.msra.mxu0 %v1239_v62  ;;  %9471 = vst [vmem:[#allocation41_spill] sm:$0xff] %v7764_v56  ;;  %v1272_v62 = vld [vmem:[%s9386_s1 + $0x390] sm:$0xff] }
  0xdc   : > { %1741 = vmatprep.mubr.f32.mxu1 %v7742_v59  ;;  %2032 = vmatpush2.msra.mxu1 %v1274_v12  ;;  %v1238_v12 = vld [vmem:[%s9386_s1 + $0x280] sm:$0xff]  ;;  %v7778_v59 = vld [vmem:[%s7116_s19 + $0x172] sm:$0xff] }
  0xdd   : > { %1517 = vmatmul.mubr.f32.gmra.mxu0 %v7700_v0  ;;  %2033 = vmatprep.subr.mxu1 %v7574_v49 }
  0xde   : > { %1521 = vmatprep.mubr.f32.mxu0 %v7752_v36  ;;  %2034 = vmatpush2.msra.mxu1 %v1273_v24  ;;  %v1271_v24 = vld [vmem:[%s9386_s1 + $0x388] sm:$0xff] }
  0xdf   : > { %1742 = vmatmul.mubr.f32.gmra.mxu1 %v7759_v41  ;;  %1814 = vmatprep.subr.mxu0 %v7574_v49  ;;  %v1301_v41 = vld [vmem:[%s9386_s1 + $0x478] sm:$0xff] }
  0xe0   : > { %1746 = vmatprep.mubr.f32.mxu1 %v7764_v56  ;;  %2035 = vmatprep.subr.mxu1 %v7574_v49  ;;  %v1270_v56 = vld [vmem:[%s9386_s1 + $0x380] sm:$0xff] }
  0xe1   : > { %1522 = vmatmul.mubr.f32.gmra.mxu0 %v7722_v8  ;;  %2036 = vmatpush2.msra.mxu1 %v1272_v62  ;;  %v1300_v62 = vld [vmem:[%s9386_s1 + $0x470] sm:$0xff] }
  0xe2   : > { %1815 = vmatpush2.msra.mxu0 %v1238_v12  ;;  %2037 = vmatprep.subr.mxu1 %v7574_v49 }
  0xe3   : > { %1747 = vmatmul.mubr.f32.gmra.mxu1 %v7778_v59  ;;  %1816 = vmatprep.mubr.f32.mxu0 %v7171_v17  ;;  %v1298_v17 = vld [vmem:[%s9386_s1 + $0x460] sm:$0xff] }
  0xe4   : > { %2038 = vmatpush2.msra.mxu1 %v1271_v24  ;;  %6402 = vmatprep.subr.mxu0 %v1301_v41  ;;  %v9486_v24 = vld [vmem:[#allocation26_spill] sm:$0xff] }
  0xe5   : > { %1817 = vmatmul.mubr.f32.vlgmr.msra.gmra.mxu0 %v7151_v11  ;;  %2039 = vmatprep.subr.mxu1 %v7574_v49  ;;  %v1299_v11 = vld [vmem:[%s9386_s1 + $0x468] sm:$0xff] }
  0xe6   : > { %2040 = vmatpush2.msra.mxu1 %v1270_v56  ;;  %2041 = vmatprep.mubr.f32.mxu1 %v7183_v20  ;;  %v9485_v56 = vld [vmem:[#allocation25_spill] sm:$0xff] }
  0xe7   : > { %6403 = vmatpush3.msra.mxu0 %v1301_v41  ;;  %2042 = vmatmul.mubr.f32.vlgmr.msra.gmra.mxu1 %v7156_v13  ;;  %v1297_v13 = vld [vmem:[%s9386_s1 + $0x458] sm:$0xff] }
  0xe8   : > { %1821 = vmatprep.mubr.f32.mxu0 %v7191_v22  ;;  %2046 = vmatprep.mubr.f32.mxu1 %v7203_v25  ;;  %v1293_v22 = vld [vmem:[%s9386_s1 + $0x438] sm:$0xff] }
  0xe9   : > { %1822 = vmatmul.mubr.f32.gmra.mxu0 %v7164_v15  ;;  %6404 = vmatprep.subr.mxu0 %v1300_v62  ;;  %v1296_v15 = vld [vmem:[%s9386_s1 + $0x450] sm:$0xff] }
  0xea   : > { %1826 = vmatprep.mubr.f32.mxu0 %v7211_v27  ;;  %6405 = vmatpush3.msra.mxu0 %v1300_v62  ;;  %v1290_v27 = vld [vmem:[%s9386_s1 + $0x420] sm:$0xff]  ;;  %v3491_v62 = vld [vmem:[#allocation4 + $0x68] sm:$0xff] }
  0xeb   : > { %2047 = vmatmul.mubr.f32.gmra.mxu1 %v7174_v18  ;;  %6406 = vmatprep.subr.mxu0 %v1299_v11  ;;  %v1295_v18 = vld [vmem:[%s9386_s1 + $0x448] sm:$0xff] }
  0xec   : > { %2051 = vmatprep.mubr.f32.mxu1 %v7224_v30  ;;  %6407 = vmatpush3.msra.mxu0 %v1299_v11 }
  0xed   : > { %1827 = vmatmul.mubr.f32.gmra.mxu0 %v7183_v20  ;;  %6408 = vmatprep.subr.mxu0 %v1298_v17  ;;  %v1294_v20 = vld [vmem:[%s9386_s1 + $0x440] sm:$0xff] }
  0xee   : > { %1831 = vmatprep.mubr.f32.mxu0 %v7232_v32  ;;  %6409 = vmatpush3.msra.mxu0 %v1298_v17  ;;  %v1287_v32 = vld [vmem:[%s9386_s1 + $0x408] sm:$0xff] }
  0xef   : > { %2052 = vmatmul.mubr.f32.gmra.mxu1 %v7194_v23  ;;  %6410 = vmatprep.subr.mxu0 %v1297_v13  ;;  %v1292_v23 = vld [vmem:[%s9386_s1 + $0x430] sm:$0xff] }
  0xf0   : > { %2056 = vmatprep.mubr.f32.mxu1 %v7245_v35  ;;  %6411 = vmatpush3.msra.mxu0 %v1297_v13  ;;  %v9487_v13 = vld [vmem:[#allocation21_spill] sm:$0xff] }
  0xf1   : > { %1832 = vmatmul.mubr.f32.gmra.mxu0 %v7203_v25  ;;  %6412 = vmatprep.subr.mxu0 %v1296_v15  ;;  %v1291_v25 = vld [vmem:[%s9386_s1 + $0x428] sm:$0xff] }
  0xf2   : > { %1836 = vmatprep.mubr.f32.mxu0 %v7253_v37  ;;  %6413 = vmatpush3.msra.mxu0 %v1296_v15 }
  0xf3   : > { %2057 = vmatmul.mubr.f32.gmra.mxu1 %v7215_v28  ;;  %6414 = vmatprep.subr.mxu0 %v1295_v18  ;;  %v1289_v28 = vld [vmem:[%s9386_s1 + $0x418] sm:$0xff] }
  0xf4   : > { %2061 = vmatprep.mubr.f32.mxu1 %v7266_v40  ;;  %6415 = vmatpush3.msra.mxu0 %v1295_v18  ;;  %v9488_v18 = vld [vmem:[#allocation28_spill] sm:$0xff] }
  0xf5   : > { %1837 = vmatmul.mubr.f32.gmra.mxu0 %v7224_v30  ;;  %6416 = vmatprep.subr.mxu0 %v1294_v20  ;;  %v1288_v30 = vld [vmem:[%s9386_s1 + $0x410] sm:$0xff] }
  0xf6   : > { %1841 = vmatprep.mubr.f32.mxu0 %v7274_v42  ;;  %6417 = vmatpush3.msra.mxu0 %v1294_v20 }
  0xf7   : > { %2062 = vmatmul.mubr.f32.gmra.mxu1 %v7236_v33  ;;  %6418 = vmatprep.subr.mxu0 %v1293_v22  ;;  %v1286_v33 = vld [vmem:[%s9386_s1 + $0x400] sm:$0xff] }
  0xf8   : > { %2066 = vmatprep.mubr.f32.mxu1 %v7287_v45  ;;  %6419 = vmatpush3.msra.mxu0 %v1293_v22 }
  0xf9   : > { %1842 = vmatmul.mubr.f32.gmra.mxu0 %v7245_v35  ;;  %6420 = vmatprep.subr.mxu0 %v1292_v23 }
  0xfa   : > { %1846 = vmatprep.mubr.f32.mxu0 %v7295_v47  ;;  %6421 = vmatpush3.msra.mxu0 %v1292_v23  ;;  %v9489_v23 = vld [vmem:[#allocation29_spill] sm:$0xff] }
  0xfb   : > { %2067 = vmatmul.mubr.f32.gmra.mxu1 %v7257_v38  ;;  %6422 = vmatprep.subr.mxu0 %v1291_v25 }
  0xfc   : > { %2071 = vmatprep.mubr.f32.mxu1 %v7308_v50  ;;  %6423 = vmatpush3.msra.mxu0 %v1291_v25  ;;  %v3490_v25 = vld [vmem:[#allocation4 + $0x60] sm:$0xff] }
  0xfd   : > { %1847 = vmatmul.mubr.f32.gmra.mxu0 %v7266_v40  ;;  %6424 = vmatprep.subr.mxu0 %v1290_v27  ;;  %v9472_v40 = vld [vmem:[#allocation10_spill] sm:$0xff] }
  0xfe   : > { %1851 = vmatprep.mubr.f32.mxu0 %v7316_v52  ;;  %6425 = vmatpush3.msra.mxu0 %v1290_v27 }
  0xff   : > { %2072 = vmatmul.mubr.f32.gmra.mxu1 %v7278_v43  ;;  %6426 = vmatprep.subr.mxu0 %v1289_v28  ;;  %v9473_v43 = vld [vmem:[#allocation13_spill] sm:$0xff] }
 0x100   : > { %2076 = vmatprep.mubr.f32.mxu1 %v7329_v55  ;;  %6427 = vmatpush3.msra.mxu0 %v1289_v28 }
 0x101   : > { %1852 = vmatmul.mubr.f32.gmra.mxu0 %v7287_v45  ;;  %6428 = vmatprep.subr.mxu0 %v1288_v30 }
 0x102   : > { %1856 = vmatprep.mubr.f32.mxu0 %v7337_v57  ;;  %6429 = vmatpush3.msra.mxu0 %v1288_v30  ;;  %v9476_v57 = vld [vmem:[#allocation16_spill] sm:$0xff] }
 0x103   : > { %2077 = vmatmul.mubr.f32.gmra.mxu1 %v7299_v48  ;;  %6430 = vmatprep.subr.mxu0 %v1287_v32  ;;  %v9474_v48 = vld [vmem:[#allocation14_spill] sm:$0xff]  ;;  %v9490_v30 = vld [vmem:[#allocation24_spill] sm:$0xff] }
 0x104   : > { %2081 = vmatprep.mubr.f32.mxu1 %v7350_v60  ;;  %6431 = vmatpush3.msra.mxu0 %v1287_v32 }
 0x105   : > { %1857 = vmatmul.mubr.f32.gmra.mxu0 %v7308_v50  ;;  %6432 = vmatprep.subr.mxu0 %v1286_v33 }
 0x106   : > { %1861 = vmatprep.mubr.f32.mxu0 %v7355_v61  ;;  %6433 = vmatpush3.msra.mxu0 %v1286_v33  ;;  %v9477_v61 = vld [vmem:[#allocation17_spill] sm:$0xff]  ;;  %v9491_v33 = vld [vmem:[#allocation31_spill] sm:$0xff] }
 0x107   : > { %2082 = vmatmul.mubr.f32.gmra.mxu1 %v7320_v53  ;;  %3622 = vmatprep.subr.mxu1 %v7574_v49  ;;  %v9475_v53 = vld [vmem:[#allocation11_spill] sm:$0xff] }
 0x108   : > { %2086 = vmatprep.mubr.f32.mxu1 %v7372_v2  ;;  %3847 = vmatprep.subr.mxu0 %v7574_v49 }
 0x109   : > { %1862 = vmatmul.mubr.f32.gmra.mxu0 %v7329_v55 }
 0x10a   : > { %1866 = vmatprep.mubr.f32.mxu0 %v7379_v4  ;;  %v9478_v4 = vld [vmem:[#allocation12_spill] sm:$0xff] }
 0x10b   : > { %2087 = vmatmul.mubr.f32.gmra.mxu1 %v7342_v58 }
 0x10c   : > { %2091 = vmatprep.mubr.f32.mxu1 %v7392_v7 }
 0x10d   : > { %1867 = vmatmul.mubr.f32.gmra.mxu0 %v7350_v60 }
 0x10e   : > { %1871 = vmatprep.mubr.f32.mxu0 %v7400_v9 }
 0x10f   : > { %2092 = vmatmul.mubr.f32.gmra.mxu1 %v7362_v63 }
 0x110   : > { %2096 = vmatprep.mubr.f32.mxu1 %v7413_v14 }
 0x111   : > { %1872 = vmatmul.mubr.f32.gmra.mxu0 %v7372_v2 }
 0x112   : > { %1876 = vmatprep.mubr.f32.mxu0 %v7418_v16  ;;  %v3493_v16 = vld [vmem:[#allocation4 + $0x78] sm:$0xff] }
 0x113   : > { %2097 = vmatmul.mubr.f32.gmra.mxu1 %v7383_v5 }
 0x114   : > { %2101 = vmatprep.mubr.f32.mxu1 %v7435_v26  ;;  %3623 = vmatpush1.msra.mxu1 %v3493_v16 }
 0x115   : > { %1877 = vmatmul.mubr.f32.gmra.mxu0 %v7392_v7  ;;  %v9479_v7 = vld [vmem:[#allocation19_spill] sm:$0xff]  ;;  %3624 = vmatprep.subr.mxu1 %v7574_v49 }
 0x116   : > { %1881 = vmatprep.mubr.f32.mxu0 %v7442_v31  ;;  %v9481_v31 = vld [vmem:[#allocation15_spill] sm:$0xff] }
 0x117   : > { %2102 = vmatmul.mubr.f32.gmra.mxu1 %v7405_v10 }
 0x118   : > { %2106 = vmatprep.mubr.f32.mxu1 %v7455_v39 }
 0x119   : > { %1882 = vmatmul.mubr.f32.gmra.mxu0 %v7413_v14  ;;  %v9480_v14 = vld [vmem:[#allocation20_spill] sm:$0xff] }
 0x11a   : > { %1886 = vmatprep.mubr.f32.mxu0 %v7463_v44 }
 0x11b   : > { %2107 = vmatmul.mubr.f32.gmra.mxu1 %v7425_v21 }
 0x11c   : > { %2111 = vmatprep.mubr.f32.mxu1 %v7476_v51 }
 0x11d   : > { %1887 = vmatmul.mubr.f32.gmra.mxu0 %v7435_v26 }
 0x11e   : > { %1891 = vmatprep.mubr.f32.mxu0 %v7481_v54  ;;  %v3492_v54 = vld [vmem:[#allocation4 + $0x70] sm:$0xff] }
 0x11f   : > { %2112 = vmatmul.mubr.f32.gmra.mxu1 %v7446_v34 }
 0x120   : > { %2116 = vmatprep.mubr.f32.mxu1 %v7498_v1  ;;  %3625 = vmatpush1.msra.mxu1 %v3492_v54 }
 0x121   : > { %1892 = vmatmul.mubr.f32.gmra.mxu0 %v7455_v39  ;;  %v9482_v39 = vld [vmem:[#allocation22_spill] sm:$0xff]  ;;  %3626 = vmatprep.subr.mxu1 %v7574_v49 }
 0x122   : > { %1896 = vmatprep.mubr.f32.mxu0 %v7505_v6  ;;  %3627 = vmatpush1.msra.mxu1 %v3491_v62 }
 0x123   : > { %2117 = vmatmul.mubr.f32.gmra.mxu1 %v7468_v46  ;;  %3628 = vmatprep.subr.mxu1 %v7574_v49 }
 0x124   : > { %2121 = vmatprep.mubr.f32.mxu1 %v7518_v19  ;;  %3629 = vmatpush1.msra.mxu1 %v3490_v25 }
 0x125   : > { %v1368_v35 = vpop.f32.mrf.mxu0  ;;  %1897 = vmatmul.mubr.f32.gmra.mxu0 %v7476_v51  ;;  %v9483_v51 = vld [vmem:[#allocation23_spill] sm:$0xff]  ;;  %3630 = vmatprep.subr.mxu1 %v7574_v49 }
 0x126   : > { %1901 = vmatprep.mubr.f32.mxu0 %v7526_v29 }
 0x127   : > { %v1593_v37 = vpop.f32.mrf.mxu1  ;;  %v1370_v38 = vpop.f32.mrf.mxu0  ;;  %2122 = vmatmul.mubr.f32.gmra.mxu1 %v9472_v40  ;;  %v3489_v40 = vld [vmem:[#allocation4 + $0x58] sm:$0xff] }
 0x128   : > { %v7909_v42 = vadd.f32 %v1593_v37, %v1368_v35  ;;  %2126 = vmatprep.mubr.f32.mxu1 %v9473_v43  ;;  %v9492_v38 = vld [vmem:[#allocation32_spill] sm:$0xff]  ;;  %3631 = vmatpush1.msra.mxu1 %v3489_v40 }
 0x129   : > { %v1595_v45 = vpop.f32.mrf.mxu1  ;;  %v1373_v47 = vpop.f32.mrf.mxu0  ;;  %1902 = vmatmul.mubr.f32.gmra.mxu0 %v7498_v1  ;;  %3632 = vmatprep.subr.mxu1 %v7574_v49 }
 0x12a   : > { %1906 = vmatprep.mubr.f32.mxu0 %v9474_v48 }
 0x12b   : > { %v1598_v50 = vpop.f32.mrf.mxu1  ;;  %v1375_v52 = vpop.f32.mrf.mxu0  ;;  %2127 = vmatmul.mubr.f32.gmra.mxu1 %v9475_v53 }
 0x12c   : > { %v7915_v55 = vadd.f32 %v1598_v50, %v1373_v47  ;;  %2131 = vmatprep.mubr.f32.mxu1 %v9476_v57  ;;  %v9493_v47 = vld [vmem:[#allocation27_spill] sm:$0xff]  ;;  %v9494_v50 = vld [vmem:[#allocation34_spill] sm:$0xff] }
 0x12d   : > { %v1600_v58 = vpop.f32.mrf.mxu1  ;;  %v1378_v60 = vpop.f32.mrf.mxu0  ;;  %1907 = vmatmul.mubr.f32.gmra.mxu0 %v7518_v19  ;;  %v9484_v19 = vld [vmem:[#allocation18_spill] sm:$0xff] }
 0x12e   : > { %1911 = vmatprep.mubr.f32.mxu0 %v9477_v61  ;;  %v3488_v58 = vld [vmem:[#allocation4 + $0x50] sm:$0xff] }
 0x12f   : > { %v1603_v63 = vpop.f32.mrf.mxu1  ;;  %v1380_v2 = vpop.f32.mrf.mxu0  ;;  %2132 = vmatmul.mubr.f32.gmra.mxu1 %v9478_v4  ;;  %v9497_v4 = vld [vmem:[#allocation36_spill] sm:$0xff] }
 0x130   : > { %v7921_v5 = vadd.f32 %v1603_v63, %v1378_v60  ;;  %2136 = vmatprep.mubr.f32.mxu1 %v9479_v7  ;;  %v9496_v63 = vld [vmem:[#allocation30_spill] sm:$0xff]  ;;  %3633 = vmatpush1.msra.mxu1 %v3488_v58 }
 0x131   : > { %v1605_v9 = vpop.f32.mrf.mxu1  ;;  %v1383_v10 = vpop.f32.mrf.mxu0  ;;  %1912 = vmatmul.mubr.f32.gmra.mxu0 %v9473_v43  ;;  %3634 = vmatprep.subr.mxu1 %v7574_v49 }
 0x132   : > { %1916 = vmatprep.mubr.f32.mxu0 %v9480_v14  ;;  %v3487_v14 = vld [vmem:[#allocation4 + $0x48] sm:$0xff] }
 0x133   : > { %v1608_v21 = vpop.f32.mrf.mxu1  ;;  %v1385_v26 = vpop.f32.mrf.mxu0  ;;  %2137 = vmatmul.mubr.f32.gmra.mxu1 %v9481_v31 }
 0x134   : > { %v7927_v34 = vadd.f32 %v1608_v21, %v1383_v10  ;;  %2141 = vmatprep.mubr.f32.mxu1 %v9482_v39  ;;  %v9498_v10 = vld [vmem:[#allocation37_spill] sm:$0xff]  ;;  %3635 = vmatpush1.msra.mxu1 %v3487_v14 }
 0x135   : > { %v1610_v44 = vpop.f32.mrf.mxu1  ;;  %v1388_v46 = vpop.f32.mrf.mxu0  ;;  %1917 = vmatmul.mubr.f32.gmra.mxu0 %v9476_v57  ;;  %v9495_v57 = vld [vmem:[#allocation35_spill] sm:$0xff]  ;;  %v9499_v26 = vld [vmem:[#allocation33_spill] sm:$0xff]  ;;  %3636 = vmatprep.subr.mxu1 %v7574_v49 }
 0x136   : > { %1921 = vmatprep.mubr.f32.mxu0 %v9483_v51  ;;  %v3486_v51 = vld [vmem:[#allocation4 + $0x40] sm:$0xff] }
 0x137   : > { %v1613_v1 = vpop.f32.mrf.mxu1  ;;  %v1390_v6 = vpop.f32.mrf.mxu0  ;;  %2142 = vmatmul.mubr.f32.gmra.mxu1 %v9484_v19  ;;  %v6202_v14 = vld [vmem:[%s7116_s19 + $0x4a] sm:$0xff] }
 0x138   : > { %v7934_v29 = vadd.f32 %v1613_v1, %v1388_v46  ;;  %2146 = vmatprep.mubr.f32.mxu1 %v9485_v56  ;;  %3637 = vmatpush1.msra.mxu1 %v3486_v51 }
 0x139   : > { %v1615_v41 = vpop.f32.mrf.mxu1  ;;  %v1393_v12 = vpop.f32.mrf.mxu0  ;;  %1922 = vmatmul.mubr.f32.gmra.mxu0 %v9479_v7  ;;  %3638 = vmatprep.subr.mxu1 %v7574_v49 }
 0x13a   : > { %1926 = vmatprep.mubr.f32.mxu0 %v9486_v24  ;;  %v6196_v41 = vld [vmem:[%s7116_s19 + $0x181] sm:$0xff] }
 0x13b   : > { %v1618_v11 = vpop.f32.mrf.mxu1  ;;  %v1395_v17 = vpop.f32.mrf.mxu0  ;;  %2147 = vmatmul.mubr.f32.gmra.mxu1 %v9487_v13  ;;  %v6197_v13 = vld [vmem:[%s7116_s19 + $0x189] sm:$0xff] }
 0x13c   : > { %v7941_v15 = vadd.f32 %v1618_v11, %v1393_v12  ;;  %2151 = vmatprep.mubr.f32.mxu1 %v9488_v18  ;;  %v9501_v12 = vld [vmem:[#allocation40_spill] sm:$0xff] }
 0x13d   : > { %v1620_v20 = vpop.f32.mrf.mxu1  ;;  %v1398_v22 = vpop.f32.mrf.mxu0  ;;  %1927 = vmatmul.mubr.f32.gmra.mxu0 %v9482_v39  ;;  %v9500_v39 = vld [vmem:[#allocation38_spill] sm:$0xff] }
 0x13e   : > { %1931 = vmatprep.mubr.f32.mxu0 %v9489_v23  ;;  %v9502_v23 = vld [vmem:[#allocation39_spill] sm:$0xff] }
 0x13f   : > { %v1623_v27 = vpop.f32.mrf.mxu1  ;;  %v1400_v28 = vpop.f32.mrf.mxu0  ;;  %2152 = vmatmul.mubr.f32.gmra.mxu1 %v9490_v30  ;;  %v6198_v30 = vld [vmem:[%s7116_s19 + $0x199] sm:$0xff] }
 0x140   : > { %v7948_v32 = vadd.f32 %v1623_v27, %v1398_v22  ;;  %2156 = vmatprep.mubr.f32.mxu1 %v9491_v33 }
 0x141   : > { %v1625_v35 = vpop.f32.mrf.mxu1  ;;  %v1403_v37 = vpop.f32.mrf.mxu0  ;;  %1932 = vmatmul.mubr.f32.gmra.mxu0 %v9485_v56 }
 0x142   : > { %1936 = vmatprep.mubr.f32.mxu0 %v9492_v38  ;;  %v8002_v38 = vld [vmem:[%s7116_s19 + $0x18a] sm:$0xff] }
 0x143   : > { %v1628_v43 = vpop.f32.mrf.mxu1  ;;  %v1405_v45 = vpop.f32.mrf.mxu0  ;;  %2157 = vmatmul.mubr.f32.gmra.mxu1 %v9493_v47  ;;  %v6199_v47 = vld [vmem:[%s7116_s19 + $0x1a1] sm:$0xff] }
 0x144   : > { %v7955_v48 = vadd.f32 %v1628_v43, %v1403_v37  ;;  %2161 = vmatprep.mubr.f32.mxu1 %v9494_v50  ;;  %v9503_v37 = vld [vmem:[#allocation41_spill] sm:$0xff]  ;;  %v6166_v43 = vld [vmem:[%s7116_s19 + $0x198] sm:$0xff] }
 0x145   : > { %v1630_v52 = vpop.f32.mrf.mxu1  ;;  %v1408_v53 = vpop.f32.mrf.mxu0  ;;  %1937 = vmatmul.mubr.f32.gmra.mxu0 %v9488_v18  ;;  %v3484_v18 = vld [vmem:[#allocation4 + $0x30] sm:$0xff] }
 0x146   : > { %1941 = vmatprep.mubr.f32.mxu0 %v9495_v57  ;;  %v6200_v57 = vld [vmem:[%s7116_s19 + $0x32] sm:$0xff] }
 0x147   : > { %v1633_v60 = vpop.f32.mrf.mxu1  ;;  %v1410_v61 = vpop.f32.mrf.mxu0  ;;  %2162 = vmatmul.mubr.f32.gmra.mxu1 %v9496_v63 }
 0x148   : > { %v7962_v2 = vadd.f32 %v1633_v60, %v1408_v53  ;;  %2166 = vmatprep.mubr.f32.mxu1 %v9497_v4  ;;  %v6167_v60 = vld [vmem:[%s7116_s19 + $0x1a0] sm:$0xff] }
 0x149   : > { %v1635_v7 = vpop.f32.mrf.mxu1  ;;  %v1413_v9 = vpop.f32.mrf.mxu0  ;;  %1942 = vmatmul.mubr.f32.gmra.mxu0 %v9491_v33 }
 0x14a   : > { %1946 = vmatprep.mubr.f32.mxu0 %v9498_v10  ;;  %v3481_v7 = vld [vmem:[#allocation4 + $0x18] sm:$0xff] }
 0x14b   : > { %v1638_v16 = vpop.f32.mrf.mxu1  ;;  %v1415_v21 = vpop.f32.mrf.mxu0  ;;  %2167 = vmatmul.mubr.f32.gmra.mxu1 %v9499_v26 }
 0x14c   : > { %v7969_v31 = vadd.f32 %v1638_v16, %v1413_v9  ;;  %2171 = vmatprep.mubr.f32.mxu1 %v9500_v39 }
 0x14d   : > { %v1640_v44 = vpop.f32.mrf.mxu1  ;;  %v1418_v46 = vpop.f32.mrf.mxu0  ;;  %1947 = vmatmul.mubr.f32.gmra.mxu0 %v9494_v50  ;;  %v3482_v50 = vld [vmem:[#allocation4 + $0x20] sm:$0xff] }
 0x14e   : > { %1951 = vmatprep.mubr.f32.mxu0 %v7735_v3  ;;  %v3485_v3 = vld [vmem:[#allocation4 + $0x38] sm:$0xff]  ;;  %v3480_v44 = vld [vmem:[#allocation4 + $0x10] sm:$0xff] }
 0x14f   : > { %v1643_v54 = vpop.f32.mrf.mxu1  ;;  %v1420_v1 = vpop.f32.mrf.mxu0  ;;  %2172 = vmatmul.mubr.f32.gmra.mxu1 %v7700_v0 }
 0x150   : > { %v7976_v6 = vadd.f32 %v1643_v54, %v1418_v46  ;;  %2176 = vmatprep.mubr.f32.mxu1 %v7752_v36  ;;  %3639 = vmatpush1.msra.mxu1 %v3485_v3  ;;  %v6204_v54 = vld [vmem:[%s7116_s19 + $0x62] sm:$0xff] }
 0x151   : > { %v1645_v19 = vpop.f32.mrf.mxu1  ;;  %v1423_v56 = vpop.f32.mrf.mxu0  ;;  %1952 = vmatmul.mubr.f32.gmra.mxu0 %v9497_v4  ;;  %3640 = vmatprep.subr.mxu1 %v7574_v49  ;;  %v6201_v4 = vld [vmem:[%s7116_s19 + $0x3a] sm:$0xff] }
 0x152   : > { %1956 = vmatprep.mubr.f32.mxu0 %v9501_v12  ;;  %3641 = vmatpush1.msra.mxu1 %v3484_v18  ;;  %v3479_v12 = vld [vmem:[#allocation4 + $0x8] sm:$0xff]  ;;  %v6207_v18 = vld [vmem:[%s7116_s19 + $0x82] sm:$0xff] }
 0x153   : > { %v1648_v24 = vpop.f32.mrf.mxu1  ;;  %v1425_v62 = vpop.f32.mrf.mxu0  ;;  %2177 = vmatmul.mubr.f32.gmra.mxu1 %v7722_v8  ;;  %v7992_v8 = vld [vmem:[%s7116_s19 + $0x182] sm:$0xff]  ;;  %3642 = vmatprep.subr.mxu1 %v7574_v49 }
 0x154   : > { %v7984_v0 = vadd.f32 %v1648_v24, %v1423_v56  ;;  %2181 = vmatprep.mubr.f32.mxu1 %v6196_v41  ;;  %v6206_v62 = vld [vmem:[%s7116_s19 + $0x7a] sm:$0xff] }
 0x155   : > { %v1650_v11 = vpop.f32.mrf.mxu1  ;;  %v1428_v17 = vpop.f32.mrf.mxu0  ;;  %1957 = vmatmul.mubr.f32.gmra.mxu0 %v9500_v39  ;;  %v6203_v39 = vld [vmem:[%s7116_s19 + $0x52] sm:$0xff] }
 0x156   : > { %1961 = vmatprep.mubr.f32.mxu0 %v7778_v59  ;;  %v3483_v59 = vld [vmem:[#allocation4 + $0x28] sm:$0xff] }
 0x157   : > { %v1653_v20 = vpop.f32.mrf.mxu1  ;;  %v1430_v22 = vpop.f32.mrf.mxu0  ;;  %2182 = vmatmul.mubr.f32.gmra.mxu1 %v9502_v23 }
 0x158   : > { %v7994_v25 = vadd.f32 %v1653_v20, %v1428_v17  ;;  %2186 = vmatprep.mubr.f32.mxu1 %v6197_v13  ;;  %3643 = vmatpush1.msra.mxu1 %v3483_v59  ;;  %v3478_v20 = vld [vmem:[#allocation4] sm:$0xff] }
 0x159   : > { %v1655_v27 = vpop.f32.mrf.mxu1  ;;  %v1433_v28 = vpop.f32.mrf.mxu0  ;;  %1962 = vmatmul.mubr.f32.gmra.mxu0 %v7752_v36  ;;  %3644 = vmatprep.subr.mxu1 %v7574_v49 }
 0x15a   : > { %1966 = vmatprep.mubr.f32.mxu0 %v7992_v8  ;;  %3645 = vmatpush1.msra.mxu1 %v3482_v50  ;;  %v6208_v27 = vld [vmem:[%s7116_s19 + $0x92] sm:$0xff] }
 0x15b   : > { %v1658_v33 = vpop.f32.mrf.mxu1  ;;  %v1435_v35 = vpop.f32.mrf.mxu0  ;;  %2187 = vmatmul.mubr.f32.gmra.mxu1 %v9503_v37  ;;  %3646 = vmatprep.subr.mxu1 %v7574_v49 }
 0x15c   : > { %v8004_v40 = vadd.f32 %v1658_v33, %v1433_v28  ;;  %2191 = vmatprep.mubr.f32.mxu1 %v6198_v30  ;;  %3647 = vmatpush1.msra.mxu1 %v3481_v7  ;;  %v6209_v33 = vld [vmem:[%s7116_s19 + $0x9a] sm:$0xff]  ;;  %v3509_v35 = vld [vmem:[#allocation4 + $0xf8] sm:$0xff] }
 0x15d   : > { %v1660_v36 = vpop.f32.mrf.mxu1  ;;  %v1438_v45 = vpop.f32.mrf.mxu0  ;;  %1967 = vmatmul.mubr.f32.gmra.mxu0 %v6196_v41  ;;  %3648 = vmatprep.subr.mxu1 %v7574_v49  ;;  %v6205_v41 = vld [vmem:[%s7116_s19 + $0x6a] sm:$0xff] }
 0x15e   : > { %1971 = vmatprep.mubr.f32.mxu0 %v8002_v38  ;;  %3649 = vmatpush1.msra.mxu1 %v3480_v44  ;;  %v6210_v36 = vld [vmem:[%s7116_s19 + $0xaa] sm:$0xff] }
 0x15f   : > { %v1663_v52 = vpop.f32.mrf.mxu1  ;;  %v1440_v53 = vpop.f32.mrf.mxu0  ;;  %2192 = vmatmul.mubr.f32.gmra.mxu1 %v6166_v43  ;;  %3650 = vmatprep.subr.mxu1 %v7574_v49 }
 0x160   : > { %v8011_v58 = vadd.f32 %v1663_v52, %v1438_v45  ;;  %2196 = vmatprep.mubr.f32.mxu1 %v6199_v47  ;;  %3651 = vmatpush1.msra.mxu1 %v3479_v12  ;;  %v6211_v52 = vld [vmem:[%s7116_s19 + $0xb2] sm:$0xff]  ;;  %v3508_v53 = vld [vmem:[#allocation4 + $0xf0] sm:$0xff] }
 0x161   : > { %v1665_v61 = vpop.f32.mrf.mxu1  ;;  %v1443_v63 = vpop.f32.mrf.mxu0  ;;  %1972 = vmatmul.mubr.f32.gmra.mxu0 %v6197_v13  ;;  %3652 = vmatprep.subr.mxu1 %v7574_v49 }
 0x162   : > { %6434 = vmatprep.mubr.f32.mxu0 %v6200_v57  ;;  %3653 = vmatpush1.msra.mxu1 %v3478_v20  ;;  %v6212_v61 = vld [vmem:[%s7116_s19 + $0xc2] sm:$0xff]  ;;  %v6217_v20 = vld [vmem:[%s7116_s19 + $0xfa] sm:$0xff] }
 0x163   : > { %v1668_v9 = vpop.f32.mrf.mxu1  ;;  %v1445_v10 = vpop.f32.mrf.mxu0  ;;  %2197 = vmatmul.mubr.f32.gmra.mxu1 %v6167_v60  ;;  %3654 = vmatprep.subr.mxu1 %v7574_v49 }
 0x164   : > { %v8017_v16 = vadd.f32 %v1668_v9, %v1443_v63  ;;  %3655 = vmatpush2.msra.mxu1 %v3509_v35  ;;  %v6213_v9 = vld [vmem:[%s7116_s19 + $0xca] sm:$0xff]  ;;  %v3507_v10 = vld [vmem:[#allocation4 + $0xe8] sm:$0xff]  ;;  %v3520_v35 = vld [vmem:[#allocation4 + $0x150] sm:$0xff] }
 0x165   : > { %v1670_v21 = vpop.f32.mrf.mxu1  ;;  %v1448_v26 = vpop.f32.mrf.mxu0  ;;  %6435 = vmatmul.mubr.f32.vlgmr.msra.gmra.mxu0 %v6201_v4  ;;  %3656 = vmatprep.subr.mxu1 %v7574_v49 }
 0x166   : > { %6437 = vmatprep.mubr.f32.mxu0 %v6202_v14  ;;  %3657 = vmatpush2.msra.mxu1 %v3508_v53  ;;  %v3525_v14 = vld [vmem:[#allocation4 + $0x178] sm:$0xff] }
 0x167   : > { %v1673_v46 = vpop.f32.mrf.mxu1  ;;  %v1450_v51 = vpop.f32.mrf.mxu0  ;;  %3658 = vmatprep.subr.mxu1 %v7574_v49  ;;  %3848 = vmatpush1.msra.mxu0 %v3525_v14  ;;  %v3524_v49 = vld [vmem:[#allocation4 + $0x170] sm:$0xff]  ;;  %v3517_v14 = vld [vmem:[#allocation4 + $0x138] sm:$0xff] }
 0x168   : > { %v8022_v1 = vadd.f32 %v1673_v46, %v1448_v26  ;;  %3659 = vmatpush2.msra.mxu1 %v3507_v10  ;;  %v8049_v46 = vld [vmem:[#allocation2 + $0x8] sm:$0xff]  ;;  %v3503_v10 = vld [vmem:[#allocation4 + $0xc8] sm:$0xff] }
 0x169   : > { %v1675_v19 = vpop.f32.mrf.mxu1  ;;  %v1453_v56 = vpop.f32.mrf.mxu0  ;;  %6438 = vmatmul.mubr.f32.gmra.mxu0 %v6203_v39  ;;  %v6214_v39 = vld [vmem:[%s7116_s19 + $0xda] sm:$0xff]  ;;  %3849 = vmatprep.subr.mxu0 %v8049_v46 }
 0x16a   : > { %6440 = vmatprep.mubr.f32.mxu0 %v6204_v54  ;;  %3660 = vmatprep.subr.mxu1 %v8049_v46  ;;  %v6215_v19 = vld [vmem:[%s7116_s19 + $0xe2] sm:$0xff] }
 0x16b   : > { %v1678_v3 = vpop.f32.mrf.mxu1  ;;  %v1455_v24 = vpop.f32.mrf.mxu0  ;;  %3850 = vmatpush1.msra.mxu0 %v3524_v49 }
 0x16c   : > { %v8027_v11 = vadd.f32 %v1678_v3, %v1453_v56  ;;  %v3506_v56 = vld [vmem:[#allocation4 + $0xe0] sm:$0xff]  ;;  %3851 = vmatprep.subr.mxu0 %v8049_v46 }
 0x16d   : > { %v1680_v17 = vpop.f32.mrf.mxu1  ;;  %v1458_v13 = vpop.f32.mrf.mxu0  ;;  %6441 = vmatmul.mubr.f32.gmra.mxu0 %v6205_v41  ;;  %v3523_v41 = vld [vmem:[#allocation4 + $0x168] sm:$0xff]  ;;  %3661 = vmatpush2.msra.mxu1 %v3506_v56  ;;  %v6223_v56 = vld [vmem:[%s7116_s19 + $0x142] sm:$0xff] }
 0x16e   : > { %6443 = vmatprep.mubr.f32.mxu0 %v6206_v62  ;;  %v6216_v24 = vld [vmem:[%s7116_s19 + $0xf2] sm:$0xff]  ;;  %3852 = vmatpush1.msra.mxu0 %v3523_v41 }
 0x16f   : > { %v1683_v22 = vpop.f32.mrf.mxu1  ;;  %v1460_v23 = vpop.f32.mrf.mxu0  ;;  %v3522_v17 = vld [vmem:[#allocation4 + $0x160] sm:$0xff]  ;;  %3662 = vmatprep.subr.mxu1 %v8049_v46  ;;  %3853 = vmatprep.subr.mxu0 %v8049_v46 }
 0x170   : > { %v8032_v28 = vadd.f32 %v1683_v22, %v1458_v13  ;;  %3854 = vmatpush1.msra.mxu0 %v3522_v17  ;;  %v3505_v22 = vld [vmem:[#allocation4 + $0xd8] sm:$0xff]  ;;  %v3502_v41 = vld [vmem:[#allocation4 + $0xc0] sm:$0xff] }
 0x171   : > { %v1685_v30 = vpop.f32.mrf.mxu1  ;;  %v1463_v59 = vpop.f32.mrf.mxu0  ;;  %6444 = vmatmul.mubr.f32.gmra.mxu0 %v6207_v18  ;;  %v3521_v23 = vld [vmem:[#allocation4 + $0x158] sm:$0xff]  ;;  %3855 = vmatprep.subr.mxu0 %v8049_v46  ;;  %v6224_v17 = vld [vmem:[%s7116_s19 + $0x152] sm:$0xff] }
 0x172   : > { %6446 = vmatprep.mubr.f32.mxu0 %v6208_v27  ;;  %3663 = vmatpush2.msra.mxu1 %v3505_v22 }
 0x173   : > { %v1688_v37 = vpop.f32.mrf.mxu1  ;;  %v1465_v43 = vpop.f32.mrf.mxu0  ;;  %3856 = vmatpush1.msra.mxu0 %v3521_v23  ;;  %3664 = vmatprep.subr.mxu1 %v8049_v46  ;;  %v6225_v23 = vld [vmem:[%s7116_s19 + $0x15a] sm:$0xff] }
 0x174   : > { %v8037_v45 = vadd.f32 %v1688_v37, %v1463_v59  ;;  %v6218_v59 = vld [vmem:[%s7116_s19 + $0x10a] sm:$0xff]  ;;  %3857 = vmatprep.subr.mxu0 %v8049_v46 }
 0x175   : > { %v1690_v47 = vpop.f32.mrf.mxu1  ;;  %v1468_v50 = vpop.f32.mrf.mxu0  ;;  %6447 = vmatmul.mubr.f32.gmra.mxu0 %v6209_v33 }
 0x176   : > { %6449 = vmatprep.mubr.f32.mxu0 %v6210_v36  ;;  %v6219_v36 = vld [vmem:[%s7116_s19 + $0x112] sm:$0xff]  ;;  %3858 = vmatpush1.msra.mxu0 %v3520_v35  ;;  %v3504_v47 = vld [vmem:[#allocation4 + $0xd0] sm:$0xff] }
 0x177   : > { %v1693_v57 = vpop.f32.mrf.mxu1  ;;  %v1470_v60 = vpop.f32.mrf.mxu0  ;;  %3859 = vmatprep.subr.mxu0 %v8049_v46  ;;  %3665 = vmatpush2.msra.mxu1 %v3504_v47 }
 0x178   : > { %v8042_v63 = vadd.f32 %v1693_v57, %v1468_v50  ;;  %v3519_v50 = vld [vmem:[#allocation4 + $0x148] sm:$0xff]  ;;  %v6220_v57 = vld [vmem:[%s7116_s19 + $0x122] sm:$0xff]  ;;  %3666 = vmatprep.subr.mxu1 %v8049_v46 }
 0x179   : > { %v1695_v4 = vpop.f32.mrf.mxu1  ;;  %v1473_v7 = vpop.f32.mrf.mxu0  ;;  %6450 = vmatmul.mubr.f32.gmra.mxu0 %v6211_v52  ;;  %3667 = vmatpush2.msra.mxu1 %v3503_v10 }
 0x17a   : > { %6452 = vmatprep.mubr.f32.mxu0 %v6212_v61  ;;  %3860 = vmatpush1.msra.mxu0 %v3519_v50  ;;  %v3518_v61 = vld [vmem:[#allocation4 + $0x140] sm:$0xff] }
 0x17b   : > { %v1698_v21 = vpop.f32.mrf.mxu1  ;;  %v1475_v26 = vpop.f32.mrf.mxu0  ;;  %3861 = vmatprep.subr.mxu0 %v8049_v46  ;;  %3668 = vmatprep.subr.mxu1 %v8049_v46 }
 0x17c   : > { %v8047_v44 = vadd.f32 %v1698_v21, %v1473_v7  ;;  %3862 = vmatpush1.msra.mxu0 %v3518_v61  ;;  %3669 = vmatpush2.msra.mxu1 %v3502_v41 }
 0x17d   : > { %v1700_v51 = vpop.f32.mrf.mxu1  ;;  %v1478_v54 = vpop.f32.mrf.mxu0  ;;  %6453 = vmatmul.mubr.f32.gmra.mxu0 %v6213_v9  ;;  %v6221_v9 = vld [vmem:[%s7116_s19 + $0x12a] sm:$0xff]  ;;  %3863 = vmatprep.subr.mxu0 %v8049_v46 }
 0x17e   : > { %6455 = vmatprep.mubr.f32.mxu0 %v6214_v39  ;;  %v6222_v39 = vld [vmem:[%s7116_s19 + $0x13a] sm:$0xff]  ;;  %3864 = vmatpush1.msra.mxu0 %v3517_v14 }
 0x17f   : > { %v1703_v12 = vpop.f32.mrf.mxu1  ;;  %v1480_v3 = vpop.f32.mrf.mxu0  ;;  %v3516_v51 = vld [vmem:[#allocation4 + $0x130] sm:$0xff]  ;;  %3865 = vmatprep.subr.mxu0 %v8049_v46  ;;  %3670 = vmatprep.subr.mxu1 %v8049_v46 }
 0x180   : > { %v8056_v62 = vadd.f32 %v1703_v12, %v1478_v54  ;;  %3866 = vmatpush1.msra.mxu0 %v3516_v51  ;;  %v3515_v12 = vld [vmem:[#allocation4 + $0x128] sm:$0xff] }
 0x181   : > { %v1705_v13 = vpop.f32.mrf.mxu1  ;;  %v1483_v18 = vpop.f32.mrf.mxu0  ;;  %6456 = vmatmul.mubr.f32.gmra.mxu0 %v6215_v19  ;;  %3867 = vmatprep.subr.mxu0 %v8049_v46 }
 0x182   : > { %6458 = vmatprep.mubr.f32.mxu0 %v6216_v24  ;;  %3868 = vmatpush1.msra.mxu0 %v3515_v12 }
 0x183   : > { %v1708_v27 = vpop.f32.mrf.mxu1  ;;  %v1485_v30 = vpop.f32.mrf.mxu0  ;;  %3869 = vmatprep.subr.mxu0 %v8049_v46 }
 0x184   : > { %v8063_v33 = vadd.f32 %v1708_v27, %v1483_v18  ;;  %v3514_v18 = vld [vmem:[#allocation4 + $0x120] sm:$0xff]  ;;  %v3501_v27 = vld [vmem:[#allocation4 + $0xb8] sm:$0xff] }
 0x185   : > { %v1710_v37 = vpop.f32.mrf.mxu1  ;;  %v1488_v43 = vpop.f32.mrf.mxu0  ;;  %6459 = vmatmul.mubr.f32.gmra.mxu0 %v6217_v20  ;;  %v3513_v30 = vld [vmem:[#allocation4 + $0x118] sm:$0xff]  ;;  %3671 = vmatpush2.msra.mxu1 %v3501_v27 }
 0x186   : > { %6461 = vmatprep.mubr.f32.mxu0 %v6218_v59  ;;  %3870 = vmatpush1.msra.mxu0 %v3514_v18  ;;  %v6226_v37 = vld [vmem:[%s7116_s19 + $0x16a] sm:$0xff] }
 0x187   : > { %v1713_v52 = vpop.f32.mrf.mxu1  ;;  %v1490_v53 = vpop.f32.mrf.mxu0  ;;  %3871 = vmatprep.subr.mxu0 %v8049_v46  ;;  %3672 = vmatprep.subr.mxu1 %v8049_v46  ;;  %v3497_v27 = vld [vmem:[#allocation4 + $0x98] sm:$0xff] }
 0x188   : > { %v8070_v60 = vadd.f32 %v1713_v52, %v1488_v43  ;;  %3872 = vmatpush1.msra.mxu0 %v3513_v30  ;;  %v6227_v52 = vld [vmem:[%s7116_s19 + $0x172] sm:$0xff]  ;;  %v3500_v53 = vld [vmem:[#allocation4 + $0xb0] sm:$0xff]  ;;  %v3537_v30 = vld [vmem:[#allocation4 + $0x1d8] sm:$0xff] }
 0x189   : > { %v1715_v4 = vpop.f32.mrf.mxu1  ;;  %v1493_v7 = vpop.f32.mrf.mxu0  ;;  %6462 = vmatmul.mubr.f32.gmra.mxu0 %v6219_v36  ;;  %v3512_v36 = vld [vmem:[#allocation4 + $0x110] sm:$0xff]  ;;  %3873 = vmatprep.subr.mxu0 %v8049_v46 }
 0x18a   : > { %6464 = vmatprep.mubr.f32.mxu0 %v6220_v57  ;;  %3874 = vmatpush1.msra.mxu0 %v3512_v36  ;;  %v3511_v57 = vld [vmem:[#allocation4 + $0x108] sm:$0xff]  ;;  %v3536_v36 = vld [vmem:[#allocation4 + $0x1d0] sm:$0xff] }
 0x18b   : > { %v1718_v21 = vpop.f32.mrf.mxu1  ;;  %v1495_v26 = vpop.f32.mrf.mxu0  ;;  %3875 = vmatprep.subr.mxu0 %v8049_v46  ;;  %3673 = vmatpush2.msra.mxu1 %v3500_v53 }
 0x18c   : > { %v8077_v49 = vadd.f32 %v1718_v21, %v1493_v7  ;;  %3876 = vmatpush1.msra.mxu0 %v3511_v57  ;;  %3674 = vmatprep.subr.mxu1 %v8049_v46  ;;  %v3499_v21 = vld [vmem:[#allocation4 + $0xa8] sm:$0xff]  ;;  %v3541_v26 = vld [vmem:[#allocation4 + $0x1f8] sm:$0xff] }
 0x18d   : > { %v1720_v54 = vpop.f32.mrf.mxu1  ;;  %v1498_v19 = vpop.f32.mrf.mxu0  ;;  %6465 = vmatmul.mubr.f32.gmra.mxu0 %v6221_v9  ;;  %v3510_v9 = vld [vmem:[#allocation4 + $0x100] sm:$0xff]  ;;  %3877 = vmatprep.subr.mxu0 %v8049_v46 }
 0x18e   : > { %6467 = vmatprep.mubr.f32.mxu0 %v6222_v39  ;;  %3878 = vmatpush1.msra.mxu0 %v3510_v9  ;;  %v6230_v54 = vld [vmem:[%s7116_s19 + $0x19a] sm:$0xff] }
 0x18f   : > { %v1723_v3 = vpop.f32.mrf.mxu1  ;;  %v1500_v24 = vpop.f32.mrf.mxu0  ;;  %3879 = vmatprep.subr.mxu0 %v8049_v46  ;;  %3675 = vmatpush2.msra.mxu1 %v3499_v21  ;;  %v3534_v21 = vld [vmem:[#allocation4 + $0x1c0] sm:$0xff] }
 0x190   : > { %v8084_v13 = vadd.f32 %v1723_v3, %v1498_v19  ;;  %3880 = vmatpush2.msra.mxu0 %v3541_v26  ;;  %3676 = vmatprep.subr.mxu1 %v8049_v46  ;;  %v3498_v3 = vld [vmem:[#allocation4 + $0xa0] sm:$0xff]  ;;  %v3539_v24 = vld [vmem:[#allocation4 + $0x1e8] sm:$0xff] }
 0x191   : > { %v1725_v20 = vpop.f32.mrf.mxu1  ;;  %v1503_v22 = vpop.f32.mrf.mxu0  ;;  %6468 = vmatmul.mubr.f32.gmra.mxu0 %v6223_v56  ;;  %v3540_v56 = vld [vmem:[#allocation4 + $0x1f0] sm:$0xff]  ;;  %3881 = vmatprep.subr.mxu0 %v8049_v46  ;;  %v3495_v26 = vld [vmem:[#allocation4 + $0x88] sm:$0xff] }
 0x192   : > { %6470 = vmatprep.mubr.f32.mxu0 %v6224_v17  ;;  %3882 = vmatpush2.msra.mxu0 %v3540_v56  ;;  %v3494_v56 = vld [vmem:[#allocation4 + $0x80] sm:$0xff] }
 0x193   : > { %v1728_v59 = vpop.f32.mrf.mxu1  ;;  %v1505_v35 = vpop.f32.mrf.mxu0  ;;  %3883 = vmatprep.subr.mxu0 %v8049_v46  ;;  %3677 = vmatpush2.msra.mxu1 %v3498_v3 }
 0x194   : > { %v8091_v43 = vadd.f32 %v1728_v59, %v1503_v22  ;;  %3884 = vmatpush2.msra.mxu0 %v3539_v24  ;;  %v3538_v22 = vld [vmem:[#allocation4 + $0x1e0] sm:$0xff]  ;;  %3678 = vmatprep.subr.mxu1 %v8049_v46 }
 0x195   : > { %v1730_v47 = vpop.f32.mrf.mxu1  ;;  %v1508_v50 = vpop.f32.mrf.mxu0  ;;  %6471 = vmatmul.mubr.f32.gmra.mxu0 %v6225_v23  ;;  %3885 = vmatprep.subr.mxu0 %v8049_v46 }
 0x196   : > { %6473 = vmatprep.mubr.f32.mxu0 %v6226_v37  ;;  %3886 = vmatpush2.msra.mxu0 %v3538_v22 }
 0x197   : > { %v1733_v61 = vpop.f32.mrf.mxu1  ;;  %v1510_v4 = vpop.f32.mrf.mxu0  ;;  %3887 = vmatprep.subr.mxu0 %v8049_v46  ;;  %3679 = vmatpush2.msra.mxu1 %v3497_v27 }
 0x198   : > { %v8097_v7 = vadd.f32 %v1733_v61, %v1508_v50  ;;  %3888 = vmatpush2.msra.mxu0 %v3537_v30  ;;  %3680 = vmatprep.subr.mxu1 %v8049_v46  ;;  %v3496_v61 = vld [vmem:[#allocation4 + $0x90] sm:$0xff]  ;;  %v3535_v4 = vld [vmem:[#allocation4 + $0x1c8] sm:$0xff] }
 0x199   : > { %v1735_v10 = vpop.f32.mrf.mxu1  ;;  %v1513_v14 = vpop.f32.mrf.mxu0  ;;  %6474 = vmatmul.mubr.f32.gmra.mxu0 %v6227_v52  ;;  %3889 = vmatprep.subr.mxu0 %v8049_v46 }
 0x19a   : > { %6476 = vmatprep.mubr.f32.mxu0 %v7992_v8  ;;  %v6231_v8 = vld [vmem:[%s7116_s19 + $0x1a2] sm:$0xff]  ;;  %3890 = vmatpush2.msra.mxu0 %v3536_v36 }
 0x19b   : > { %v1738_v39 = vpop.f32.mrf.mxu1  ;;  %v1515_v51 = vpop.f32.mrf.mxu0  ;;  %3891 = vmatprep.subr.mxu0 %v8049_v46  ;;  %3681 = vmatpush2.msra.mxu1 %v3496_v61  ;;  %v3528_v61 = vld [vmem:[#allocation4 + $0x190] sm:$0xff] }
 0x19c   : > { %v8104_v19 = vadd.f32 %v1738_v39, %v1513_v14  ;;  %3892 = vmatpush2.msra.mxu0 %v3535_v4  ;;  %3682 = vmatprep.subr.mxu1 %v8049_v46 }
 0x19d   : > { %v1740_v41 = vpop.f32.mrf.mxu1  ;;  %v1518_v12 = vpop.f32.mrf.mxu0  ;;  %6477 = vmatmul.mubr.f32.gmra.mxu0 %v8002_v38  ;;  %3893 = vmatprep.subr.mxu0 %v8049_v46 }
 0x19e   : > { %6479 = vmatprep.mubr.f32.mxu0 %v6230_v54  ;;  %3894 = vmatpush2.msra.mxu0 %v3534_v21  ;;  %v3533_v54 = vld [vmem:[#allocation4 + $0x1b8] sm:$0xff] }
 0x19f   : > { %v1743_v17 = vpop.f32.mrf.mxu1  ;;  %v1520_v18 = vpop.f32.mrf.mxu0  ;;  %3683 = vmatpush2.msra.mxu1 %v3495_v26  ;;  %3895 = vmatprep.subr.mxu0 %v8049_v46  ;;  %v2677_v41 = vld [vmem:[#allocation2 + $0x1] sm:$0xff] }
 0x1a0   : > { %v8111_v20 = vadd.f32 %v1743_v17, %v1518_v12  ;;  %3684 = vmatprep.subr.mxu1 %v8049_v46  ;;  %3896 = vmatpush2.msra.mxu0 %v3533_v54  ;;  %v3557_v54 = vld [vmem:[#allocation4 + $0x278] sm:$0xff] }
 0x1a1   : > { %v1745_v23 = vpop.f32.mrf.mxu1  ;;  %v1523_v38 = vpop.f32.mrf.mxu0  ;;  %6480 = vmatmul.mubr.f32.gmra.mxu0 %v6231_v8  ;;  %3685 = vmatpush2.msra.mxu1 %v3494_v56  ;;  %v2613_v8 = vld [vmem:[#allocation2] sm:$0xff] }
 0x1a2   : > { %3897 = vmatprep.subr.mxu0 %v8049_v46  ;;  %3686 = vmatprep.mubr.f32.mxu1 %v2677_v41  ;;  %v3531_v23 = vld [vmem:[#allocation4 + $0x1a8] sm:$0xff] }
 0x1a3   : > { %v1748_v59 = vpop.f32.mrf.mxu1  ;;  %v1525_v35 = vpop.f32.mrf.mxu0  ;;  %3687 = vmatmul.mubr.f32.vlgmr.msra.gmra.mxu1 %v2613_v8  ;;  %4072 = vmatprep.subr.mxu1 %v8049_v46 }
 0x1a4   : > { %v8116_v37 = vadd.f32 %v1748_v59, %v1523_v38  ;;  %v2678_v38 = vld [vmem:[#allocation2 + $0x9] sm:$0xff]  ;;  %4073 = vmatpush1.msra.mxu1 %v3557_v54  ;;  %v3552_v54 = vld [vmem:[#allocation4 + $0x250] sm:$0xff] }
 0x1a5   : > { %v1750_v47 = vpop.f32.mrf.mxu1  ;;  %v1818_v50 = vpop.f32.mrf.mxu0  ;;  %3691 = vmatprep.mubr.f32.mxu1 %v2678_v38  ;;  %v3530_v35 = vld [vmem:[#allocation4 + $0x1a0] sm:$0xff]  ;;  %4074 = vmatprep.subr.mxu1 %v8049_v46 }
 0x1a6   : > { %v1819_v52 = vadd.f32 %v1818_v50, %v7909_v42  ;;  %v3529_v50 = vld [vmem:[#allocation4 + $0x198] sm:$0xff] }
 0x1a7   : > { %v1820_v53 = vpop.f32.mrf.mxu0  ;;  %v2043_v57 = vpop.f32.mrf.mxu1  ;;  %3692 = vmatmul.mubr.f32.gmra.mxu1 %v8049_v46 }
 0x1a8   : > { %v8122_v9 = vadd.f32 %v2043_v57, %v1819_v52 }
 0x1a9   : > { %v1823_v10 = vpop.f32.mrf.mxu0  ;;  %v2045_v14 = vpop.f32.mrf.mxu1 }
 0x1aa   : > { %v1824_v42 = vadd.f32 %v1823_v10, %v7915_v55  ;;  %v3532_v55 = vld [vmem:[#allocation4 + $0x1b0] sm:$0xff]  ;;  %v3527_v14 = vld [vmem:[#allocation4 + $0x188] sm:$0xff] }
 0x1ab   : > { %v1825_v39 = vpop.f32.mrf.mxu0  ;;  %v2048_v51 = vpop.f32.mrf.mxu1  ;;  %3898 = vmatpush2.msra.mxu0 %v3532_v55  ;;  %v3556_v55 = vld [vmem:[#allocation4 + $0x270] sm:$0xff] }
 0x1ac   : > { %v8129_v12 = vadd.f32 %v2048_v51, %v1824_v42  ;;  %3899 = vmatprep.subr.mxu0 %v8049_v46  ;;  %v3526_v39 = vld [vmem:[#allocation4 + $0x180] sm:$0xff]  ;;  %4075 = vmatpush1.msra.mxu1 %v3556_v55  ;;  %v3551_v55 = vld [vmem:[#allocation4 + $0x248] sm:$0xff] }
 0x1ad   : > { %v1828_v3 = vpop.f32.mrf.mxu0  ;;  %v2050_v24 = vpop.f32.mrf.mxu1  ;;  %3900 = vmatpush2.msra.mxu0 %v3531_v23  ;;  %4076 = vmatprep.subr.mxu1 %v8049_v46 }
 0x1ae   : > { %v1829_v17 = vadd.f32 %v1828_v3, %v7921_v5  ;;  %3901 = vmatprep.subr.mxu0 %v8049_v46 }
 0x1af   : > { %v1830_v18 = vpop.f32.mrf.mxu0  ;;  %v2053_v22 = vpop.f32.mrf.mxu1  ;;  %3902 = vmatpush2.msra.mxu0 %v3530_v35 }
 0x1b0   : > { %v8135_v27 = vadd.f32 %v2053_v22, %v1829_v17  ;;  %3903 = vmatprep.subr.mxu0 %v8049_v46 }
 0x1b1   : > { %v1833_v30 = vpop.f32.mrf.mxu0  ;;  %v2055_v59 = vpop.f32.mrf.mxu1  ;;  %3904 = vmatpush2.msra.mxu0 %v3529_v50  ;;  %v3554_v50 = vld [vmem:[#allocation4 + $0x260] sm:$0xff] }
 0x1b2   : > { %v1834_v5 = vadd.f32 %v1833_v30, %v7927_v34  ;;  %3905 = vmatprep.subr.mxu0 %v8049_v46  ;;  %v3555_v30 = vld [vmem:[#allocation4 + $0x268] sm:$0xff] }
 0x1b3   : > { %v1835_v36 = vpop.f32.mrf.mxu0  ;;  %v2058_v47 = vpop.f32.mrf.mxu1  ;;  %3906 = vmatpush2.msra.mxu0 %v3528_v61  ;;  %4077 = vmatpush1.msra.mxu1 %v3555_v30  ;;  %v3550_v30 = vld [vmem:[#allocation4 + $0x240] sm:$0xff] }
 0x1b4   : > { %v8141_v52 = vadd.f32 %v2058_v47, %v1834_v5  ;;  %3907 = vmatprep.subr.mxu0 %v8049_v46  ;;  %4078 = vmatprep.subr.mxu1 %v8049_v46 }
 0x1b5   : > { %v1838_v53 = vpop.f32.mrf.mxu0  ;;  %v2060_v57 = vpop.f32.mrf.mxu1  ;;  %3908 = vmatpush2.msra.mxu0 %v3527_v14  ;;  %4079 = vmatpush1.msra.mxu1 %v3554_v50  ;;  %v3549_v50 = vld [vmem:[#allocation4 + $0x238] sm:$0xff] }
 0x1b6   : > { %v1839_v4 = vadd.f32 %v1838_v53, %v7934_v29  ;;  %3909 = vmatprep.subr.mxu0 %v8049_v46  ;;  %4080 = vmatprep.subr.mxu1 %v8049_v46 }
 0x1b7   : > { %v1840_v34 = vpop.f32.mrf.mxu0  ;;  %v2063_v10 = vpop.f32.mrf.mxu1  ;;  %3910 = vmatpush2.msra.mxu0 %v3526_v39 }
 0x1b8   : > { %v8146_v21 = vadd.f32 %v2063_v10, %v1839_v4  ;;  %4297 = vmatprep.subr.mxu0 %v8049_v46  ;;  %v3553_v10 = vld [vmem:[#allocation4 + $0x258] sm:$0xff] }
 0x1b9   : > { %v1843_v26 = vpop.f32.mrf.mxu0  ;;  %v2065_v42 = vpop.f32.mrf.mxu1  ;;  %4081 = vmatpush1.msra.mxu1 %v3553_v10  ;;  %v3548_v10 = vld [vmem:[#allocation4 + $0x230] sm:$0xff] }
 0x1ba   : > { %v1844_v51 = vadd.f32 %v1843_v26, %v7941_v15  ;;  %4082 = vmatprep.subr.mxu1 %v8049_v46 }
 0x1bb   : > { %v1845_v56 = vpop.f32.mrf.mxu0  ;;  %v2068_v29 = vpop.f32.mrf.mxu1  ;;  %4083 = vmatpush1.msra.mxu1 %v3552_v54  ;;  %v3547_v54 = vld [vmem:[#allocation4 + $0x228] sm:$0xff] }
 0x1bc   : > { %v8151_v41 = vadd.f32 %v2068_v29, %v1844_v51  ;;  %4084 = vmatprep.subr.mxu1 %v8049_v46 }
 0x1bd   : > { %v1848_v8 = vpop.f32.mrf.mxu0  ;;  %v2070_v3 = vpop.f32.mrf.mxu1  ;;  %4085 = vmatpush1.msra.mxu1 %v3551_v55  ;;  %v3546_v55 = vld [vmem:[#allocation4 + $0x220] sm:$0xff] }
 0x1be   : > { %v1849_v24 = vadd.f32 %v1848_v8, %v7948_v32  ;;  %4086 = vmatprep.subr.mxu1 %v8049_v46 }
 0x1bf   : > { %v1850_v17 = vpop.f32.mrf.mxu0  ;;  %v2073_v18 = vpop.f32.mrf.mxu1  ;;  %4087 = vmatpush1.msra.mxu1 %v3550_v30  ;;  %v3545_v30 = vld [vmem:[#allocation4 + $0x218] sm:$0xff] }
 0x1c0   : > { %v8155_v15 = vadd.f32 %v2073_v18, %v1849_v24  ;;  %4088 = vmatprep.subr.mxu1 %v8049_v46 }
 0x1c1   : > { %v1853_v22 = vpop.f32.mrf.mxu0  ;;  %v2075_v23 = vpop.f32.mrf.mxu1  ;;  %4089 = vmatpush1.msra.mxu1 %v3549_v50 }
 0x1c2   : > { %v1854_v38 = vadd.f32 %v1853_v22, %v7955_v48  ;;  %4090 = vmatprep.subr.mxu1 %v8049_v46 }
 0x1c3   : > { %v1855_v59 = vpop.f32.mrf.mxu0  ;;  %v2078_v35 = vpop.f32.mrf.mxu1  ;;  %4091 = vmatpush1.msra.mxu1 %v3548_v10 }
 0x1c4   : > { %v8159_v5 = vadd.f32 %v2078_v35, %v1854_v38  ;;  %4092 = vmatprep.subr.mxu1 %v8049_v46 }
 0x1c5   : > { %v1858_v32 = vpop.f32.mrf.mxu0  ;;  %v2080_v36 = vpop.f32.mrf.mxu1  ;;  %4093 = vmatpush1.msra.mxu1 %v3547_v54 }
 0x1c6   : > { %v1859_v47 = vadd.f32 %v1858_v32, %v7962_v2  ;;  %4094 = vmatprep.subr.mxu1 %v8049_v46 }
 0x1c7   : > { %v1860_v53 = vpop.f32.mrf.mxu0  ;;  %v2083_v57 = vpop.f32.mrf.mxu1  ;;  %4095 = vmatpush1.msra.mxu1 %v3546_v55 }
 0x1c8   : > { %v8163_v61 = vadd.f32 %v2083_v57, %v1859_v47  ;;  %4096 = vmatprep.subr.mxu1 %v8049_v46 }
 0x1c9   : > { %v1863_v48 = vpop.f32.mrf.mxu0  ;;  %v2085_v4 = vpop.f32.mrf.mxu1  ;;  %4097 = vmatpush1.msra.mxu1 %v3545_v30 }
 0x1ca   : > { %v1864_v34 = vadd.f32 %v1863_v48, %v7969_v31  ;;  %4098 = vmatprep.subr.mxu1 %v8049_v46 }
 0x1cb   : > { %v1865_v14 = vpop.f32.mrf.mxu0  ;;  %v2088_v26 = vpop.f32.mrf.mxu1 }
 0x1cc   : > { %v8167_v42 = vadd.f32 %v2088_v26, %v1864_v34 }
 0x1cd   : > { %v1868_v2 = vpop.f32.mrf.mxu0  ;;  %v2090_v39 = vpop.f32.mrf.mxu1 }
 0x1ce   : > { %v1869_v51 = vadd.f32 %v1868_v2, %v7976_v6 }
 0x1cf   : > { %v1870_v56 = vpop.f32.mrf.mxu0  ;;  %v2093_v29 = vpop.f32.mrf.mxu1 }
 0x1d0   : > { %v8171_v8 = vadd.f32 %v2093_v29, %v1869_v51 }
 0x1d1   : > { %v1873_v31 = vpop.f32.mrf.mxu0  ;;  %v2095_v3 = vpop.f32.mrf.mxu1 }
 0x1d2   : > { %v1874_v24 = vadd.f32 %v1873_v31, %v7984_v0 }
 0x1d3   : > { %v1875_v17 = vpop.f32.mrf.mxu0  ;;  %v2098_v18 = vpop.f32.mrf.mxu1 }
 0x1d4   : > { %v8175_v22 = vadd.f32 %v2098_v18, %v1874_v24 }
 0x1d5   : > { %v1878_v6 = vpop.f32.mrf.mxu0  ;;  %v2100_v23 = vpop.f32.mrf.mxu1 }
 0x1d6   : > { %v1879_v38 = vadd.f32 %v1878_v6, %v7994_v25 }
 0x1d7   : > { %v1880_v59 = vpop.f32.mrf.mxu0  ;;  %v2103_v35 = vpop.f32.mrf.mxu1 }
 0x1d8   : > { %v8179_v32 = vadd.f32 %v2103_v35, %v1879_v38 }
 0x1d9   : > { %v1883_v0 = vpop.f32.mrf.mxu0  ;;  %v2105_v36 = vpop.f32.mrf.mxu1 }
 0x1da   : > { %v1884_v47 = vadd.f32 %v1883_v0, %v8004_v40  ;;  %v3543_v36 = vld [vmem:[#allocation4 + $0x208] sm:$0xff] }
 0x1db   : > { %v1885_v53 = vpop.f32.mrf.mxu0  ;;  %v2108_v57 = vpop.f32.mrf.mxu1 }
 0x1dc   : > { %v8183_v48 = vadd.f32 %v2108_v57, %v1884_v47  ;;  %v3542_v57 = vld [vmem:[#allocation4 + $0x200] sm:$0xff] }
 0x1dd   : > { %v1888_v25 = vpop.f32.mrf.mxu0  ;;  %v2110_v4 = vpop.f32.mrf.mxu1 }
 0x1de   : > { %v1889_v34 = vadd.f32 %v1888_v25, %v8011_v58 }
 0x1df   : > { %v1890_v14 = vpop.f32.mrf.mxu0  ;;  %v2113_v26 = vpop.f32.mrf.mxu1 }
 0x1e0   : > { %v8187_v2 = vadd.f32 %v2113_v26, %v1889_v34  ;;  %v3573_v26 = vld [vmem:[#allocation4 + $0x2f8] sm:$0xff] }
 0x1e1   : > { %v1893_v40 = vpop.f32.mrf.mxu0  ;;  %v2115_v39 = vpop.f32.mrf.mxu1 }
 0x1e2   : > { %v1894_v51 = vadd.f32 %v1893_v40, %v8017_v16 }
 0x1e3   : > { %v1895_v56 = vpop.f32.mrf.mxu0  ;;  %v2118_v29 = vpop.f32.mrf.mxu1 }
 0x1e4   : > { %v8191_v31 = vadd.f32 %v2118_v29, %v1894_v51  ;;  %v3572_v29 = vld [vmem:[#allocation4 + $0x2f0] sm:$0xff] }
 0x1e5   : > { %v1898_v58 = vpop.f32.mrf.mxu0  ;;  %v2120_v3 = vpop.f32.mrf.mxu1 }
 0x1e6   : > { %v1899_v24 = vadd.f32 %v1898_v58, %v8022_v1  ;;  %v3544_v1 = vld [vmem:[#allocation4 + $0x210] sm:$0xff] }
 0x1e7   : > { %v1900_v17 = vpop.f32.mrf.mxu0  ;;  %v2123_v18 = vpop.f32.mrf.mxu1  ;;  %4099 = vmatpush1.msra.mxu1 %v3544_v1 }
 0x1e8   : > { %v8195_v6 = vadd.f32 %v2123_v18, %v1899_v24  ;;  %4100 = vmatprep.subr.mxu1 %v8049_v46  ;;  %v3571_v18 = vld [vmem:[#allocation4 + $0x2e8] sm:$0xff] }
 0x1e9   : > { %v1903_v16 = vpop.f32.mrf.mxu0  ;;  %v2125_v23 = vpop.f32.mrf.mxu1  ;;  %4101 = vmatpush1.msra.mxu1 %v3543_v36 }
 0x1ea   : > { %v1904_v38 = vadd.f32 %v1903_v16, %v8027_v11  ;;  %4102 = vmatprep.subr.mxu1 %v8049_v46 }
 0x1eb   : > { %v1905_v59 = vpop.f32.mrf.mxu0  ;;  %v2128_v35 = vpop.f32.mrf.mxu1  ;;  %4103 = vmatpush1.msra.mxu1 %v3542_v57  ;;  %v3569_v57 = vld [vmem:[#allocation4 + $0x2d8] sm:$0xff] }
 0x1ec   : > { %v8199_v0 = vadd.f32 %v2128_v35, %v1904_v38  ;;  %4104 = vmatprep.subr.mxu1 %v8049_v46  ;;  %v3570_v35 = vld [vmem:[#allocation4 + $0x2e0] sm:$0xff] }
 0x1ed   : > { %v1908_v47 = vpop.f32.mrf.mxu0  ;;  %v2130_v50 = vpop.f32.mrf.mxu1  ;;  %4105 = vmatpush2.msra.mxu1 %v3573_v26  ;;  %v3568_v26 = vld [vmem:[#allocation4 + $0x2d0] sm:$0xff] }
 0x1ee   : > { %v1909_v53 = vadd.f32 %v1908_v47, %v8032_v28  ;;  %4106 = vmatprep.subr.mxu1 %v8049_v46 }
 0x1ef   : > { %v1910_v25 = vpop.f32.mrf.mxu0  ;;  %v2133_v11 = vpop.f32.mrf.mxu1  ;;  %4107 = vmatpush2.msra.mxu1 %v3572_v29  ;;  %v3567_v29 = vld [vmem:[#allocation4 + $0x2c8] sm:$0xff] }
 0x1f0   : > { %v8204_v4 = vadd.f32 %v2133_v11, %v1909_v53  ;;  %4108 = vmatprep.subr.mxu1 %v8049_v46 }
 0x1f1   : > { %v1913_v34 = vpop.f32.mrf.mxu0  ;;  %v2135_v10 = vpop.f32.mrf.mxu1  ;;  %4109 = vmatpush2.msra.mxu1 %v3571_v18  ;;  %v3566_v18 = vld [vmem:[#allocation4 + $0x2c0] sm:$0xff] }
 0x1f2   : > { %v1914_v14 = vadd.f32 %v1913_v34, %v8037_v45  ;;  %4110 = vmatprep.subr.mxu1 %v8049_v46 }
 0x1f3   : > { %v1915_v40 = vpop.f32.mrf.mxu0  ;;  %v2138_v28 = vpop.f32.mrf.mxu1  ;;  %4111 = vmatpush2.msra.mxu1 %v3570_v35  ;;  %v3565_v35 = vld [vmem:[#allocation4 + $0x2b8] sm:$0xff] }
 0x1f4   : > { %v8209_v39 = vadd.f32 %v2138_v28, %v1914_v14  ;;  %4112 = vmatprep.subr.mxu1 %v8049_v46 }
 0x1f5   : > { %v1918_v51 = vpop.f32.mrf.mxu0  ;;  %v2140_v54 = vpop.f32.mrf.mxu1  ;;  %4113 = vmatpush2.msra.mxu1 %v3569_v57  ;;  %v3564_v57 = vld [vmem:[#allocation4 + $0x2b0] sm:$0xff] }
 0x1f6   : > { %v1919_v56 = vadd.f32 %v1918_v51, %v8042_v63  ;;  %4114 = vmatprep.subr.mxu1 %v8049_v46 }
 0x1f7   : > { %v1920_v58 = vpop.f32.mrf.mxu0  ;;  %v2143_v3 = vpop.f32.mrf.mxu1  ;;  %4115 = vmatpush2.msra.mxu1 %v3568_v26  ;;  %v3563_v26 = vld [vmem:[#allocation4 + $0x2a8] sm:$0xff] }
 0x1f8   : > { %v8213_v24 = vadd.f32 %v2143_v3, %v1919_v56  ;;  %4116 = vmatprep.subr.mxu1 %v8049_v46 }
 0x1f9   : > { %v1923_v45 = vpop.f32.mrf.mxu0  ;;  %v2145_v55 = vpop.f32.mrf.mxu1  ;;  %4117 = vmatpush2.msra.mxu1 %v3567_v29  ;;  %v3562_v29 = vld [vmem:[#allocation4 + $0x2a0] sm:$0xff] }
 0x1fa   : > { %v1924_v17 = vadd.f32 %v1923_v45, %v8047_v44  ;;  %4118 = vmatprep.subr.mxu1 %v8049_v46 }
 0x1fb   : > { %v1925_v16 = vpop.f32.mrf.mxu0  ;;  %v2148_v23 = vpop.f32.mrf.mxu1  ;;  %4119 = vmatpush2.msra.mxu1 %v3566_v18 }
 0x1fc   : > { %v8217_v38 = vadd.f32 %v2148_v23, %v1924_v17  ;;  %4120 = vmatprep.subr.mxu1 %v8049_v46 }
 0x1fd   : > { %v1928_v63 = vpop.f32.mrf.mxu0  ;;  %v2150_v30 = vpop.f32.mrf.mxu1  ;;  %4121 = vmatpush2.msra.mxu1 %v3565_v35  ;;  %v8270_v35 = vld [vmem:[%s9388_s3] ss:$0 sm:$0xff] }
 0x1fe   : > { %v1929_v59 = vadd.f32 %v1928_v63, %v8056_v62  ;;  %4122 = vmatprep.subr.mxu1 %v8049_v46 }
 0x1ff   : > { %v1930_v1 = vpop.f32.mrf.mxu0  ;;  %v2153_v36 = vpop.f32.mrf.mxu1  ;;  %4123 = vmatpush2.msra.mxu1 %v3564_v57 }
 0x200   : > { %v8221_v47 = vadd.f32 %v2153_v36, %v1929_v59  ;;  %4124 = vmatprep.subr.mxu1 %v8049_v46 }
 0x201   : > { %v1933_v44 = vpop.f32.mrf.mxu0  ;;  %v2155_v50 = vpop.f32.mrf.mxu1  ;;  %4125 = vmatpush2.msra.mxu1 %v3563_v26 }
 0x202   : > { %v1934_v53 = vadd.f32 %v1933_v44, %v8063_v33  ;;  %4126 = vmatprep.subr.mxu1 %v8049_v46 }
 0x203   : > { %v1935_v25 = vpop.f32.mrf.mxu0  ;;  %v2158_v11 = vpop.f32.mrf.mxu1  ;;  %4127 = vmatpush2.msra.mxu1 %v3562_v29 }
 0x204   : > { %v8225_v34 = vadd.f32 %v2158_v11, %v1934_v53  ;;  %4128 = vmatprep.subr.mxu1 %v8049_v46 }
 0x205   : > { %v1938_v62 = vpop.f32.mrf.mxu0  ;;  %v2160_v10 = vpop.f32.mrf.mxu1 }
 0x206   : > { %v1939_v14 = vadd.f32 %v1938_v62, %v8070_v60 }
 0x207   : > { %v1940_v40 = vpop.f32.mrf.mxu0  ;;  %v2163_v28 = vpop.f32.mrf.mxu1 }
 0x208   : > { %v8229_v51 = vadd.f32 %v2163_v28, %v1939_v14 }
 0x209   : > { %v1943_v33 = vpop.f32.mrf.mxu0  ;;  %v2165_v54 = vpop.f32.mrf.mxu1 }
 0x20a   : > { %v1944_v56 = vadd.f32 %v1943_v33, %v8077_v49 }
 0x20b   : > { %v1945_v58 = vpop.f32.mrf.mxu0  ;;  %v2168_v3 = vpop.f32.mrf.mxu1 }
 0x20c   : > { %v8233_v45 = vadd.f32 %v2168_v3, %v1944_v56 }
 0x20d   : > { %v1948_v60 = vpop.f32.mrf.mxu0  ;;  %v2170_v55 = vpop.f32.mrf.mxu1 }
 0x20e   : > { %v1949_v17 = vadd.f32 %v1948_v60, %v8084_v13 }
 0x20f   : > { %v1950_v16 = vpop.f32.mrf.mxu0  ;;  %v2173_v23 = vpop.f32.mrf.mxu1 }
 0x210   : > { %v8237_v63 = vadd.f32 %v2173_v23, %v1949_v17  ;;  %v3561_v17 = vld [vmem:[#allocation4 + $0x298] sm:$0xff] }
 0x211   : > { %v1953_v49 = vpop.f32.mrf.mxu0  ;;  %v2175_v30 = vpop.f32.mrf.mxu1  ;;  %4129 = vmatpush2.msra.mxu1 %v3561_v17  ;;  %v8293_v17 = vld [vmem:[#allocation4 + $0x478] sm:$0xff] }
 0x212   : > { %v1954_v59 = vadd.f32 %v1953_v49, %v8091_v43  ;;  %4130 = vmatprep.subr.mxu1 %v8049_v46 }
 0x213   : > { %v1955_v1 = vpop.f32.mrf.mxu0  ;;  %v2178_v36 = vpop.f32.mrf.mxu1 }
 0x214   : > { %v8241_v44 = vadd.f32 %v2178_v36, %v1954_v59  ;;  %v3560_v59 = vld [vmem:[#allocation4 + $0x290] sm:$0xff] }
 0x215   : > { %v1958_v13 = vpop.f32.mrf.mxu0  ;;  %v2180_v50 = vpop.f32.mrf.mxu1  ;;  %4131 = vmatpush2.msra.mxu1 %v3560_v59 }
 0x216   : > { %v1959_v53 = vadd.f32 %v1958_v13, %v8097_v7  ;;  %v8274_v13 = vld [vmem:[#allocation2 + $0x8] sm:$0xff] }
 0x217   : > { %v1960_v25 = vpop.f32.mrf.mxu0  ;;  %v2183_v11 = vpop.f32.mrf.mxu1  ;;  %4132 = vmatprep.subr.mxu1 %v8274_v13 }
 0x218   : > { %v8245_v62 = vadd.f32 %v2183_v11, %v1959_v53  ;;  %v3559_v25 = vld [vmem:[#allocation4 + $0x288] sm:$0xff] }
 0x219   : > { %v1963_v43 = vpop.f32.mrf.mxu0  ;;  %v2185_v10 = vpop.f32.mrf.mxu1  ;;  %4133 = vmatpush2.msra.mxu1 %v3559_v25 }
 0x21a   : > { %v1964_v14 = vadd.f32 %v1963_v43, %v8104_v19  ;;  %4134 = vmatprep.subr.mxu1 %v8274_v13 }
 0x21b   : > { %v1965_v40 = vpop.f32.mrf.mxu0  ;;  %v2188_v28 = vpop.f32.mrf.mxu1 }
 0x21c   : > { %v8249_v33 = vadd.f32 %v2188_v28, %v1964_v14 }
 0x21d   : > { %v1968_v7 = vpop.f32.mrf.mxu0  ;;  %v2190_v54 = vpop.f32.mrf.mxu1 }
 0x21e   : > { %v1969_v56 = vadd.f32 %v1968_v7, %v8111_v20  ;;  %v8264_v20 = vld [vmem:[%s9387_s2] ss:$0 sm:$0xff]  ;;  %v3558_v54 = vld [vmem:[#allocation4 + $0x280] sm:$0xff] }
 0x21f   : > { %v1970_v58 = vpop.f32.mrf.mxu0  ;;  %v2193_v3 = vpop.f32.mrf.mxu1  ;;  %4135 = vmatpush2.msra.mxu1 %v3558_v54 }
 0x220   : > { %v8253_v60 = vadd.f32 %v2193_v3, %v1969_v56  ;;  %6482 = vmatprep.subr.mxu1 %v8293_v17 }
 0x221   : > { %v8256_v19 = vpop.f32.mrf.mxu0  ;;  %v2195_v55 = vpop.f32.mrf.mxu1 }
 0x223   : > { %v1975_v18 = vpop.f32.mrf.mxu0  ;;  %v8258_v16 = vpop.f32.mrf.mxu1 }
 0x225   : > { %v6436_v23 = vpop.f32.mrf.mxu0  ;;  %v2200_v49 = vpop.f32.mrf.mxu1 }
 0x226   : > { %v2274_v30 = vadd.f32 %v6436_v23, %v8129_v12 }
 0x227   : > { %v2268_v1 = vpop.f32.mrf.mxu0 }
 0x228   : > { %v2435_v36 = vmul.f32 %v8264_v20, %v2274_v30  ;;  %v2269_v46 = vadd.f32 %v2268_v1, %v8122_v9 }
 0x229   : > { %v6439_v50 = vpop.f32.mrf.mxu0 }
 0x22a   : > { %v2474_v53 = vadd.f32 %v8270_v35, %v2435_v36  ;;  %v2434_v12 = vmul.f32 %v8264_v20, %v2269_v46  ;;  %v2284_v57 = vadd.f32 %v6439_v50, %v8141_v52 }
 0x22b   : > { %v2278_v11 = vpop.f32.mrf.mxu0 }
 0x22c   : > { %v2506_v43 = vmax.f32 %v2474_v53, 0.0  ;;  %v2473_v10 = vadd.f32 %v8270_v35, %v2434_v12  ;;  %v2437_v14 = vmul.f32 %v8264_v20, %v2284_v57  ;;  %v2279_v9 = vadd.f32 %v2278_v11, %v8135_v27  ;;  %v2741_v57 = vld [vmem:[#allocation2 + $0x2] sm:$0xff] }
 0x22d   : > { %v6442_v26 = vpop.f32.mrf.mxu0 }
 0x22e   : > { %2539 = vst [vmem:[#allocation2 + $0x21] sm:$0xff] %v2506_v43  ;;  %v2505_v40 = vmax.f32 %v2473_v10, 0.0  ;;  %v8285_v28 = vadd.f32 %v8270_v35, %v2437_v14  ;;  %v2436_v52 = vmul.f32 %v8264_v20, %v2279_v9  ;;  %v2294_v7 = vadd.f32 %v6442_v26, %v8151_v41  ;;  %v3589_v10 = vld [vmem:[#allocation4 + $0x378] sm:$0xff] }
 0x22f   : > { %v2288_v56 = vpop.f32.mrf.mxu0 }
 0x230   : > { %2538 = vst [vmem:[#allocation2 + $0x19] sm:$0xff] %v2505_v40  ;;  %v2508_v29 = vmax.f32 %v8285_v28, 0.0  ;;  %v2475_v27 = vadd.f32 %v8270_v35, %v2436_v52  ;;  %v2439_v58 = vmul.f32 %v8264_v20, %v2294_v7  ;;  %v2289_v3 = vadd.f32 %v2288_v56, %v8146_v21  ;;  %3696 = vmatprep.mubr.f32.mxu1 %v2505_v40  ;;  %v3588_v52 = vld [vmem:[#allocation4 + $0x370] sm:$0xff] }
 0x231   : > { %v6445_v55 = vpop.f32.mrf.mxu0 }
 0x232   : > { %2541 = vst [vmem:[#allocation2 + $0x39] sm:$0xff] %v2508_v29  ;;  %v2507_v41 = vmax.f32 %v2475_v27, 0.0  ;;  %v8298_v18 = vadd.f32 %v8270_v35, %v2439_v58  ;;  %v2438_v23 = vmul.f32 %v8264_v20, %v2289_v3  ;;  %v2304_v49 = vadd.f32 %v6445_v55, %v8159_v5 }
 0x233   : > { %v2298_v30 = vpop.f32.mrf.mxu0 }
 0x234   : > { %2540 = vst [vmem:[#allocation2 + $0x31] sm:$0xff] %v2507_v41  ;;  %v2510_v21 = vmax.f32 %v8298_v18, 0.0  ;;  %v8305_v59 = vadd.f32 %v8270_v35, %v2438_v23  ;;  %v2441_v1 = vmul.f32 %v8264_v20, %v2304_v49  ;;  %v2299_v36 = vadd.f32 %v2298_v30, %v8155_v15 }
 0x235   : > { %v6448_v46 = vpop.f32.mrf.mxu0 }
 0x236   : > { %2543 = vst [vmem:[#allocation2 + $0x51] sm:$0xff] %v2510_v21  ;;  %v2509_v50 = vmax.f32 %v8305_v59, 0.0  ;;  %v8313_v5 = vadd.f32 %v8270_v35, %v2441_v1  ;;  %v2440_v53 = vmul.f32 %v8264_v20, %v2299_v36  ;;  %v2314_v12 = vadd.f32 %v6448_v46, %v8167_v42  ;;  %v3583_v59 = vld [vmem:[#allocation4 + $0x348] sm:$0xff] }
 0x237   : > { %v2308_v25 = vpop.f32.mrf.mxu0  ;;  %v2805_v11 = vld [vmem:[#allocation2 + $0x18] sm:$0xff]  ;;  %v2806_v42 = vld [vmem:[#allocation2 + $0x20] sm:$0xff] }
 0x238   : > { %2542 = vst [vmem:[#allocation2 + $0x49] sm:$0xff] %v2509_v50  ;;  %v2512_v15 = vmax.f32 %v8313_v5, 0.0  ;;  %v8321_v14 = vadd.f32 %v8270_v35, %v2440_v53  ;;  %v2443_v9 = vmul.f32 %v8264_v20, %v2314_v12  ;;  %v2309_v26 = vadd.f32 %v2308_v25, %v8163_v61  ;;  %3911 = vmatprep.mubr.f32.mxu0 %v2805_v11  ;;  %v2742_v61 = vld [vmem:[#allocation2 + $0xa] sm:$0xff] }
 0x239   : > { %3697 = vmatmul.mubr.f32.gmra.mxu1 %v2805_v11  ;;  %v6451_v40 = vpop.f32.mrf.mxu0  ;;  %3912 = vmatmul.mubr.f32.vlgmr.msra.gmra.mxu0 %v2741_v57  ;;  %v3586_v12 = vld [vmem:[#allocation4 + $0x360] sm:$0xff] }
 0x23a   : > { %3701 = vmatprep.mubr.f32.mxu1 %v2506_v43  ;;  %2545 = vst [vmem:[#allocation2 + $0x69] sm:$0xff] %v2512_v15  ;;  %v2511_v7 = vmax.f32 %v8321_v14, 0.0  ;;  %v8329_v54 = vadd.f32 %v8270_v35, %v2443_v9  ;;  %v2442_v56 = vmul.f32 %v8264_v20, %v2309_v26  ;;  %v2324_v27 = vadd.f32 %v6451_v40, %v8175_v22  ;;  %v3587_v22 = vld [vmem:[#allocation4 + $0x368] sm:$0xff]  ;;  %v3585_v26 = vld [vmem:[#allocation4 + $0x358] sm:$0xff] }
 0x23b   : > { %3916 = vmatprep.mubr.f32.mxu0 %v2806_v42  ;;  %4298 = vmatpush1.msra.mxu0 %v3589_v10  ;;  %v2318_v58 = vpop.f32.mrf.mxu0  ;;  %v2807_v30 = vld [vmem:[#allocation2 + $0x30] sm:$0xff]  ;;  %v2808_v9 = vld [vmem:[#allocation2 + $0x38] sm:$0xff] }
 0x23c   : > { %4299 = vmatprep.subr.mxu0 %v8274_v13  ;;  %2544 = vst [vmem:[#allocation2 + $0x61] sm:$0xff] %v2511_v7  ;;  %v2514_v43 = vmax.f32 %v8329_v54, 0.0  ;;  %v8338_v3 = vadd.f32 %v8270_v35, %v2442_v56  ;;  %v2445_v55 = vmul.f32 %v8264_v20, %v2324_v27  ;;  %v2319_v23 = vadd.f32 %v2318_v58, %v8171_v8  ;;  %v8382_v58 = vld [vmem:[#allocation2 + $0x22] sm:$0xff] }
 0x23d   : > { %3702 = vmatmul.mubr.f32.gmra.mxu1 %v2806_v42  ;;  %4300 = vmatpush1.msra.mxu0 %v3588_v52  ;;  %v6454_v49 = vpop.f32.mrf.mxu0  ;;  %v1974_v54 = vadd.f32 %v8256_v19, %v8116_v37  ;;  %v3575_v37 = vld [vmem:[#allocation4 + $0x308] sm:$0xff] }
 0x23e   : > { %3917 = vmatmul.mubr.f32.gmra.mxu0 %v2742_v61  ;;  %3706 = vmatprep.mubr.f32.mxu1 %v2507_v41  ;;  %2547 = vst [vmem:[#allocation2 + $0x81] sm:$0xff] %v2514_v43  ;;  %v2513_v1 = vmax.f32 %v8338_v3, 0.0  ;;  %v8346_v36 = vadd.f32 %v8270_v35, %v2445_v55  ;;  %v2444_v46 = vmul.f32 %v8264_v20, %v2319_v23 }
 0x23f   : > { %v2334_v53 = vadd.f32 %v6454_v49, %v8183_v48  ;;  %3921 = vmatprep.mubr.f32.mxu0 %v2807_v30  ;;  %4301 = vmatprep.subr.mxu0 %v8274_v13  ;;  %v2328_v8 = vpop.f32.mrf.mxu0  ;;  %v8359_v48 = vld [vmem:[#allocation2 + $0x1a] sm:$0xff]  ;;  %v2809_v23 = vld [vmem:[#allocation2 + $0x48] sm:$0xff] }
 0x240   : > { %4302 = vmatpush1.msra.mxu0 %v3587_v22  ;;  %2546 = vst [vmem:[#allocation2 + $0x79] sm:$0xff] %v2513_v1  ;;  %v2516_v41 = vmax.f32 %v8346_v36, 0.0  ;;  %v8355_v57 = vadd.f32 %v8270_v35, %v2444_v46  ;;  %v2329_v11 = vadd.f32 %v2328_v8, %v8179_v32 }
 0x241   : > { %v2447_v25 = vmul.f32 %v8264_v20, %v2334_v53  ;;  %3707 = vmatmul.mubr.f32.gmra.mxu1 %v2807_v30  ;;  %4303 = vmatprep.subr.mxu0 %v8274_v13  ;;  %v6457_v10 = vpop.f32.mrf.mxu0 }
 0x242   : > { %3922 = vmatmul.mubr.f32.gmra.mxu0 %v8359_v48  ;;  %3711 = vmatprep.mubr.f32.mxu1 %v2508_v29  ;;  %2549 = vst [vmem:[#allocation2 + $0x99] sm:$0xff] %v2516_v41  ;;  %v2515_v40 = vmax.f32 %v8355_v57, 0.0  ;;  %v2446_v42 = vmul.f32 %v8264_v20, %v2329_v11  ;;  %v2344_v52 = vadd.f32 %v6457_v10, %v8191_v31  ;;  %v3584_v31 = vld [vmem:[#allocation4 + $0x350] sm:$0xff]  ;;  %v8410_v11 = vld [vmem:[#allocation2 + $0x50] sm:$0xff] }
 0x243   : > { %v8369_v32 = vadd.f32 %v8270_v35, %v2447_v25  ;;  %3926 = vmatprep.mubr.f32.mxu0 %v2808_v9  ;;  %4304 = vmatpush1.msra.mxu0 %v3586_v12  ;;  %v2338_v56 = vpop.f32.mrf.mxu0  ;;  %v3582_v10 = vld [vmem:[#allocation4 + $0x340] sm:$0xff]  ;;  %v2199_v57 = vadd.f32 %v8258_v16, %v1974_v54 }
 0x244   : > { %4305 = vmatprep.subr.mxu0 %v8274_v13  ;;  %2548 = vst [vmem:[#allocation2 + $0x91] sm:$0xff] %v2515_v40  ;;  %v8378_v29 = vadd.f32 %v8270_v35, %v2446_v42  ;;  %v2449_v27 = vmul.f32 %v8264_v20, %v2344_v52  ;;  %v2339_v61 = vadd.f32 %v2338_v56, %v8187_v2 }
 0x245   : > { %v2518_v28 = vmax.f32 %v8369_v32, 0.0  ;;  %3712 = vmatmul.mubr.f32.gmra.mxu1 %v2808_v9  ;;  %4306 = vmatpush1.msra.mxu0 %v3585_v26  ;;  %v6460_v55 = vpop.f32.mrf.mxu0 }
 0x246   : > { %3927 = vmatmul.mubr.f32.gmra.mxu0 %v8382_v58  ;;  %3716 = vmatprep.mubr.f32.mxu1 %v2509_v50  ;;  %v2517_v22 = vmax.f32 %v8378_v29, 0.0  ;;  %v8391_v49 = vadd.f32 %v8270_v35, %v2449_v27  ;;  %v2448_v2 = vmul.f32 %v8264_v20, %v2339_v61  ;;  %v2354_v30 = vadd.f32 %v6460_v55, %v8199_v0  ;;  %v8404_v0 = vld [vmem:[#allocation2 + $0x32] sm:$0xff]  ;;  %v3581_v61 = vld [vmem:[#allocation4 + $0x338] sm:$0xff]  ;;  %v8436_v55 = vld [vmem:[#allocation2 + $0x60] sm:$0xff] }
 0x247   : > { %2551 = vst [vmem:[#allocation2 + $0xb1] sm:$0xff] %v2518_v28  ;;  %3931 = vmatprep.mubr.f32.mxu0 %v2809_v23  ;;  %4307 = vmatprep.subr.mxu0 %v8274_v13  ;;  %v2348_v46 = vpop.f32.mrf.mxu0 }
 0x248   : > { %4308 = vmatpush1.msra.mxu0 %v3584_v31  ;;  %2550 = vst [vmem:[#allocation2 + $0xa9] sm:$0xff] %v2517_v22  ;;  %v2520_v50 = vmax.f32 %v8391_v49, 0.0  ;;  %v8400_v53 = vadd.f32 %v8270_v35, %v2448_v2  ;;  %v2451_v8 = vmul.f32 %v8264_v20, %v2354_v30  ;;  %v2349_v12 = vadd.f32 %v2348_v46, %v8195_v6 }
 0x249   : > { %3717 = vmatmul.mubr.f32.gmra.mxu1 %v2809_v23  ;;  %4309 = vmatprep.subr.mxu0 %v8274_v13  ;;  %v6463_v25 = vpop.f32.mrf.mxu0 }
 0x24a   : > { %3932 = vmatmul.mubr.f32.gmra.mxu0 %v8404_v0  ;;  %3721 = vmatprep.mubr.f32.mxu1 %v2510_v21  ;;  %2553 = vst [vmem:[#allocation2 + $0xc9] sm:$0xff] %v2520_v50  ;;  %v2519_v9 = vmax.f32 %v8400_v53, 0.0  ;;  %v8416_v6 = vadd.f32 %v8270_v35, %v2451_v8  ;;  %v2450_v26 = vmul.f32 %v8264_v20, %v2349_v12 }
 0x24b   : > { %v2364_v42 = vadd.f32 %v6463_v25, %v8209_v39  ;;  %3936 = vmatprep.mubr.f32.mxu0 %v8410_v11  ;;  %4310 = vmatpush1.msra.mxu0 %v3583_v59  ;;  %v2358_v18 = vpop.f32.mrf.mxu0  ;;  %v8431_v39 = vld [vmem:[#allocation2 + $0x3a] sm:$0xff] }
 0x24c   : > { %4311 = vmatprep.subr.mxu0 %v8274_v13  ;;  %2552 = vst [vmem:[#allocation2 + $0xc1] sm:$0xff] %v2519_v9  ;;  %v2522_v21 = vmax.f32 %v8416_v6, 0.0  ;;  %v8426_v52 = vadd.f32 %v8270_v35, %v2450_v26  ;;  %v2359_v27 = vadd.f32 %v2358_v18, %v8204_v4  ;;  %v3579_v26 = vld [vmem:[#allocation4 + $0x328] sm:$0xff] }
 0x24d   : > { %v2453_v56 = vmul.f32 %v8264_v20, %v2364_v42  ;;  %3722 = vmatmul.mubr.f32.gmra.mxu1 %v8410_v11  ;;  %4312 = vmatpush1.msra.mxu0 %v3582_v10  ;;  %v6466_v31 = vpop.f32.mrf.mxu0  ;;  %v8463_v10 = vld [vmem:[#allocation2 + $0x68] sm:$0xff]  ;;  %v8572_v54 = vld [vmem:[#allocation2 + $0x98] sm:$0xff] }
 0x24e   : > { %3937 = vmatmul.mubr.f32.gmra.mxu0 %v8431_v39  ;;  %3726 = vmatprep.mubr.f32.mxu1 %v2511_v7  ;;  %2555 = vst [vmem:[#allocation2 + $0xe1] sm:$0xff] %v2522_v21  ;;  %v2521_v23 = vmax.f32 %v8426_v52, 0.0  ;;  %v2452_v2 = vmul.f32 %v8264_v20, %v2359_v27  ;;  %v2374_v30 = vadd.f32 %v6466_v31, %v8217_v38  ;;  %v3580_v7 = vld [vmem:[#allocation4 + $0x330] sm:$0xff]  ;;  %v8457_v38 = vld [vmem:[#allocation2 + $0x4a] sm:$0xff] }
 0x24f   : > { %v8442_v4 = vadd.f32 %v8270_v35, %v2453_v56  ;;  %3941 = vmatprep.mubr.f32.mxu0 %v8436_v55  ;;  %4313 = vmatprep.subr.mxu0 %v8274_v13  ;;  %v2368_v14 = vpop.f32.mrf.mxu0 }
 0x250   : > { %4314 = vmatpush1.msra.mxu0 %v3581_v61  ;;  %2554 = vst [vmem:[#allocation2 + $0xd9] sm:$0xff] %v2521_v23  ;;  %v8452_v59 = vadd.f32 %v8270_v35, %v2452_v2  ;;  %v2455_v8 = vmul.f32 %v8264_v20, %v2374_v30  ;;  %v2369_v12 = vadd.f32 %v2368_v14, %v8213_v24  ;;  %v3578_v2 = vld [vmem:[#allocation4 + $0x320] sm:$0xff]  ;;  %v8489_v14 = vld [vmem:[#allocation2 + $0x78] sm:$0xff] }
 0x251   : > { %v2524_v46 = vmax.f32 %v8442_v4, 0.0  ;;  %3727 = vmatmul.mubr.f32.gmra.mxu1 %v8436_v55  ;;  %4315 = vmatprep.subr.mxu0 %v8274_v13  ;;  %v6469_v25 = vpop.f32.mrf.mxu0 }
 0x252   : > { %3942 = vmatmul.mubr.f32.gmra.mxu0 %v8457_v38  ;;  %3731 = vmatprep.mubr.f32.mxu1 %v2512_v15  ;;  %v2523_v24 = vmax.f32 %v8452_v59, 0.0  ;;  %v8469_v42 = vadd.f32 %v8270_v35, %v2455_v8  ;;  %v2454_v18 = vmul.f32 %v8264_v20, %v2369_v12  ;;  %v2384_v56 = vadd.f32 %v6469_v25, %v8225_v34  ;;  %v8484_v34 = vld [vmem:[#allocation2 + $0x52] sm:$0xff] }
 0x253   : > { %2557 = vst [vmem:[#allocation2 + $0xf9] sm:$0xff] %v2524_v46  ;;  %3946 = vmatprep.mubr.f32.mxu0 %v8463_v10  ;;  %4316 = vmatpush1.msra.mxu0 %v3580_v7  ;;  %v2378_v5 = vpop.f32.mrf.mxu0  ;;  %v8626_v32 = vld [vmem:[#allocation2 + $0xc0] sm:$0xff]  ;;  %v8639_v53 = vld [vmem:[#allocation2 + $0xc8] sm:$0xff] }
 0x254   : > { %4317 = vmatprep.subr.mxu0 %v8274_v13  ;;  %2556 = vst [vmem:[#allocation2 + $0xf1] sm:$0xff] %v2523_v24  ;;  %v2526_v15 = vmax.f32 %v8469_v42, 0.0  ;;  %v8479_v27 = vadd.f32 %v8270_v35, %v2454_v18  ;;  %v2457_v61 = vmul.f32 %v8264_v20, %v2384_v56  ;;  %v2379_v31 = vadd.f32 %v2378_v5, %v8221_v47 }
 0x255   : > { %3732 = vmatmul.mubr.f32.gmra.mxu1 %v8463_v10  ;;  %4318 = vmatpush1.msra.mxu0 %v3579_v26  ;;  %v6472_v30 = vpop.f32.mrf.mxu0 }
 0x256   : > { %3947 = vmatmul.mubr.f32.gmra.mxu0 %v8484_v34  ;;  %3736 = vmatprep.mubr.f32.mxu1 %v2513_v1  ;;  %2559 = vst [vmem:[#allocation2 + $0x111] sm:$0xff] %v2526_v15  ;;  %v2525_v7 = vmax.f32 %v8479_v27, 0.0  ;;  %v8495_v47 = vadd.f32 %v8270_v35, %v2457_v61  ;;  %v2456_v8 = vmul.f32 %v8264_v20, %v2379_v31  ;;  %v3577_v1 = vld [vmem:[#allocation4 + $0x318] sm:$0xff]  ;;  %v8516_v61 = vld [vmem:[#allocation2 + $0x80] sm:$0xff] }
 0x257   : > { %v2394_v12 = vadd.f32 %v6472_v30, %v8233_v45  ;;  %3951 = vmatprep.mubr.f32.mxu0 %v8489_v14  ;;  %4319 = vmatprep.subr.mxu0 %v8274_v13  ;;  %v2388_v3 = vpop.f32.mrf.mxu0  ;;  %v8510_v45 = vld [vmem:[#allocation2 + $0x62] sm:$0xff]  ;;  %v8651_v49 = vld [vmem:[#allocation2 + $0xd8] sm:$0xff] }
 0x258   : > { %4320 = vmatpush1.msra.mxu0 %v3578_v2  ;;  %2558 = vst [vmem:[#allocation2 + $0x109] sm:$0xff] %v2525_v7  ;;  %v2528_v25 = vmax.f32 %v8495_v47, 0.0  ;;  %v8505_v26 = vadd.f32 %v8270_v35, %v2456_v8  ;;  %v2389_v56 = vadd.f32 %v2388_v3, %v8229_v51  ;;  %v3576_v31 = vld [vmem:[#allocation4 + $0x310] sm:$0xff] }
 0x259   : > { %v2459_v18 = vmul.f32 %v8264_v20, %v2394_v12  ;;  %3737 = vmatmul.mubr.f32.gmra.mxu1 %v8489_v14  ;;  %4321 = vmatprep.subr.mxu0 %v8274_v13  ;;  %v6475_v5 = vpop.f32.mrf.mxu0  ;;  %v8662_v52 = vld [vmem:[#allocation2 + $0xe0] sm:$0xff] }
 0x25a   : > { %3952 = vmatmul.mubr.f32.gmra.mxu0 %v8510_v45  ;;  %3741 = vmatprep.mubr.f32.mxu1 %v2514_v43  ;;  %2561 = vst [vmem:[#allocation2 + $0x129] sm:$0xff] %v2528_v25  ;;  %v2527_v51 = vmax.f32 %v8505_v26, 0.0  ;;  %v2458_v30 = vmul.f32 %v8264_v20, %v2389_v56  ;;  %v2404_v8 = vadd.f32 %v6475_v5, %v8241_v44  ;;  %v8544_v56 = vld [vmem:[#allocation2 + $0x90] sm:$0xff] }
 0x25b   : > { %v8522_v2 = vadd.f32 %v8270_v35, %v2459_v18  ;;  %3956 = vmatprep.mubr.f32.mxu0 %v8516_v61  ;;  %4322 = vmatpush1.msra.mxu0 %v3577_v1  ;;  %v2398_v43 = vpop.f32.mrf.mxu0  ;;  %v8539_v1 = vld [vmem:[#allocation2 + $0x6a] sm:$0xff]  ;;  %v8683_v59 = vld [vmem:[#allocation2 + $0xf8] sm:$0xff] }
 0x25c   : > { %4323 = vmatprep.subr.mxu0 %v8274_v13  ;;  %2560 = vst [vmem:[#allocation2 + $0x121] sm:$0xff] %v2527_v51  ;;  %v8534_v3 = vadd.f32 %v8270_v35, %v2458_v30  ;;  %v2461_v18 = vmul.f32 %v8264_v20, %v2404_v8  ;;  %v2399_v44 = vadd.f32 %v2398_v43, %v8237_v63  ;;  %v3574_v8 = vld [vmem:[#allocation4 + $0x300] sm:$0xff] }
 0x25d   : > { %v9435_v12 = vmax.f32 %v8522_v2, 0.0  ;;  %3742 = vmatmul.mubr.f32.gmra.mxu1 %v8516_v61  ;;  %4324 = vmatpush1.msra.mxu0 %v3576_v31  ;;  %v6478_v19 = vpop.f32.mrf.mxu0  ;;  %v8672_v6 = vld [vmem:[#allocation2 + $0xf0] sm:$0xff] }
 0x25e   : > { %3957 = vmatmul.mubr.f32.gmra.mxu0 %v8539_v1  ;;  %3746 = vmatprep.mubr.f32.mxu1 %v2515_v40  ;;  %v2529_v5 = vmax.f32 %v8534_v3, 0.0  ;;  %v8550_v63 = vadd.f32 %v8270_v35, %v2461_v18  ;;  %v2460_v30 = vmul.f32 %v8264_v20, %v2399_v44  ;;  %v2414_v31 = vadd.f32 %v6478_v19, %v8249_v33  ;;  %v8566_v19 = vld [vmem:[#allocation2 + $0x7a] sm:$0xff]  ;;  %v8727_v26 = vld [vmem:[#allocation2 + $0x112] sm:$0xff] }
 0x25f   : > { %2563 = vst [vmem:[#allocation2 + $0x141] sm:$0xff] %v9435_v12  ;;  %3961 = vmatprep.mubr.f32.mxu0 %v8544_v56  ;;  %4325 = vmatprep.subr.mxu0 %v8274_v13  ;;  %v2408_v40 = vpop.f32.mrf.mxu0  ;;  %v8693_v4 = vld [vmem:[#allocation2 + $0x108] sm:$0xff]  ;;  %v8704_v27 = vld [vmem:[#allocation2 + $0x110] sm:$0xff] }
 0x260   : > { %4326 = vmatpush1.msra.mxu0 %v3575_v37  ;;  %2562 = vst [vmem:[#allocation2 + $0x139] sm:$0xff] %v2529_v5  ;;  %v9436_v43 = vmax.f32 %v8550_v63, 0.0  ;;  %v8561_v18 = vadd.f32 %v8270_v35, %v2460_v30  ;;  %v2463_v44 = vmul.f32 %v8264_v20, %v2414_v31  ;;  %v2409_v33 = vadd.f32 %v2408_v40, %v8245_v62  ;;  %v3605_v37 = vld [vmem:[#allocation4 + $0x3f8] sm:$0xff] }
 0x261   : > { %3747 = vmatmul.mubr.f32.gmra.mxu1 %v8544_v56  ;;  %4327 = vmatprep.subr.mxu0 %v8274_v13  ;;  %v6481_v16 = vpop.f32.mrf.mxu0  ;;  %v8745_v3 = vld [vmem:[#allocation2 + $0x12a] sm:$0xff] }
 0x262   : > { %3962 = vmatmul.mubr.f32.gmra.mxu0 %v8566_v19  ;;  %3751 = vmatprep.mubr.f32.mxu1 %v2516_v41  ;;  %2565 = vst [vmem:[#allocation2 + $0x159] sm:$0xff] %v9436_v43  ;;  %v2531_v62 = vmax.f32 %v8561_v18, 0.0  ;;  %v8578_v30 = vadd.f32 %v8270_v35, %v2463_v44  ;;  %v2462_v31 = vmul.f32 %v8264_v20, %v2409_v33  ;;  %v8597_v33 = vld [vmem:[#allocation2 + $0xa8] sm:$0xff] }
 0x263   : > { %v2424_v40 = vadd.f32 %v6481_v16, %v2199_v57  ;;  %3966 = vmatprep.mubr.f32.mxu0 %v8572_v54  ;;  %4328 = vmatpush1.msra.mxu0 %v3574_v8  ;;  %v2418_v12 = vpop.f32.mrf.mxu0  ;;  %v8592_v57 = vld [vmem:[#allocation2 + $0x82] sm:$0xff] }
 0x264   : > { %4329 = vmatprep.subr.mxu0 %v8274_v13  ;;  %2564 = vst [vmem:[#allocation2 + $0x151] sm:$0xff] %v2531_v62  ;;  %v2534_v36 = vmax.f32 %v8578_v30, 0.0  ;;  %v8587_v41 = vadd.f32 %v8270_v35, %v2462_v31  ;;  %v2419_v43 = vadd.f32 %v2418_v12, %v8253_v60  ;;  %v3604_v8 = vld [vmem:[#allocation4 + $0x3f0] sm:$0xff]  ;;  %v8610_v31 = vld [vmem:[#allocation2 + $0x92] sm:$0xff] }
 0x265   : > { %v2465_v44 = vmul.f32 %v8264_v20, %v2424_v40  ;;  %3752 = vmatmul.mubr.f32.gmra.mxu1 %v8572_v54  ;;  %4330 = vmatpush2.msra.mxu0 %v3605_v37  ;;  %v3603_v37 = vld [vmem:[#allocation4 + $0x3e8] sm:$0xff]  ;;  %v8714_v42 = vld [vmem:[#allocation2 + $0x120] sm:$0xff] }
 0x266   : > { %3967 = vmatmul.mubr.f32.gmra.mxu0 %v8592_v57  ;;  %3756 = vmatprep.mubr.f32.mxu1 %v2517_v22  ;;  %2567 = vst [vmem:[#allocation2 + $0x171] sm:$0xff] %v2534_v36  ;;  %v2533_v16 = vmax.f32 %v8587_v41, 0.0  ;;  %v2464_v12 = vmul.f32 %v8264_v20, %v2419_v43  ;;  %v8616_v20 = vld [vmem:[#allocation2 + $0xb0] sm:$0xff]  ;;  %v8736_v47 = vld [vmem:[#allocation2 + $0x122] sm:$0xff] }
 0x267   : > { %v2504_v60 = vadd.f32 %v8270_v35, %v2465_v44  ;;  %3971 = vmatprep.mubr.f32.mxu0 %v8597_v33  ;;  %4331 = vmatprep.subr.mxu0 %v8274_v13  ;;  %v3602_v43 = vld [vmem:[#allocation4 + $0x3e0] sm:$0xff]  ;;  %v3601_v44 = vld [vmem:[#allocation4 + $0x3d8] sm:$0xff]  ;;  %v3620_v30 = vld [vmem:[#allocation4 + $0x470] sm:$0xff] }
 0x268   : > { %4332 = vmatpush2.msra.mxu0 %v3604_v8  ;;  %2566 = vst [vmem:[#allocation2 + $0x169] sm:$0xff] %v2533_v16  ;;  %v2503_v22 = vadd.f32 %v8270_v35, %v2464_v12  ;;  %v8621_v35 = vld [vmem:[#allocation2 + $0x9a] sm:$0xff]  ;;  %v8763_v18 = vld [vmem:[#allocation2 + $0x142] sm:$0xff] }
 0x269   : > { %v2536_v29 = vmax.f32 %v2504_v60, 0.0  ;;  %3757 = vmatmul.mubr.f32.gmra.mxu1 %v8597_v33  ;;  %4333 = vmatprep.subr.mxu0 %v8274_v13  ;;  %v3600_v8 = vld [vmem:[#allocation4 + $0x3d0] sm:$0xff]  ;;  %v8633_v60 = vld [vmem:[#allocation2 + $0xaa] sm:$0xff] }
 0x26a   : > { %3972 = vmatmul.mubr.f32.gmra.mxu0 %v8610_v31  ;;  %3761 = vmatprep.mubr.f32.mxu1 %v2518_v28  ;;  %v2535_v40 = vmax.f32 %v2503_v22, 0.0  ;;  %v8630_v28 = vpop.f32.mrf.mxu1  ;;  %v3598_v22 = vld [vmem:[#allocation4 + $0x3c0] sm:$0xff]  ;;  %v8781_v41 = vld [vmem:[#allocation2 + $0x15a] sm:$0xff] }
 0x26b   : > { %2569 = vst [vmem:[#allocation2 + $0x189] sm:$0xff] %v2536_v29  ;;  %3976 = vmatprep.mubr.f32.mxu0 %v8616_v20  ;;  %4334 = vmatpush2.msra.mxu0 %v3603_v37  ;;  %v8646_v29 = vld [vmem:[#allocation2 + $0xb2] sm:$0xff] }
 0x26c   : > { %4335 = vmatprep.subr.mxu0 %v8274_v13  ;;  %2568 = vst [vmem:[#allocation2 + $0x181] sm:$0xff] %v2535_v40  ;;  %v3690_v12 = vpop.f32.mrf.mxu1  ;;  %v8656_v40 = vld [vmem:[#allocation2 + $0xc2] sm:$0xff] }
 0x26d   : > { %3762 = vmatmul.mubr.f32.gmra.mxu1 %v8616_v20  ;;  %4336 = vmatpush2.msra.mxu0 %v3602_v43  ;;  %v8677_v12 = vld [vmem:[#allocation2 + $0xda] sm:$0xff] }
 0x26e   : > { %3977 = vmatmul.mubr.f32.gmra.mxu0 %v8621_v35  ;;  %3766 = vmatprep.mubr.f32.mxu1 %v2519_v9  ;;  %v3599_v9 = vld [vmem:[#allocation4 + $0x3c8] sm:$0xff]  ;;  %v8642_v37 = vpop.f32.mrf.mxu1 }
 0x26f   : > { %3981 = vmatprep.mubr.f32.mxu0 %v8626_v32  ;;  %4337 = vmatprep.subr.mxu0 %v8274_v13  ;;  %9504 = vst [vmem:[#allocation10_spill] sm:$0xff] %v8642_v37  ;;  %v3617_v37 = vld [vmem:[#allocation4 + $0x458] sm:$0xff] }
 0x270   : > { %4338 = vmatpush2.msra.mxu0 %v3601_v44  ;;  %v3695_v43 = vpop.f32.mrf.mxu1  ;;  %v8667_v44 = vld [vmem:[#allocation2 + $0xca] sm:$0xff] }
 0x271   : > { %3767 = vmatmul.mubr.f32.gmra.mxu1 %v8626_v32  ;;  %4339 = vmatprep.subr.mxu0 %v8274_v13  ;;  %v8698_v43 = vld [vmem:[#allocation2 + $0xf2] sm:$0xff] }
 0x272   : > { %3982 = vmatmul.mubr.f32.gmra.mxu0 %v8633_v60  ;;  %3771 = vmatprep.mubr.f32.mxu1 %v2520_v50  ;;  %v3597_v50 = vld [vmem:[#allocation4 + $0x3b8] sm:$0xff] }
 0x273   : > { %3986 = vmatprep.mubr.f32.mxu0 %v8639_v53  ;;  %4340 = vmatpush2.msra.mxu0 %v3600_v8  ;;  %v3595_v8 = vld [vmem:[#allocation4 + $0x3a8] sm:$0xff] }
 0x274   : > { %4341 = vmatprep.subr.mxu0 %v8274_v13 }
 0x275   : > { %3772 = vmatmul.mubr.f32.gmra.mxu1 %v8639_v53  ;;  %4342 = vmatpush2.msra.mxu0 %v3599_v9  ;;  %v8688_v9 = vld [vmem:[#allocation2 + $0xe2] sm:$0xff] }
 0x276   : > { %3987 = vmatmul.mubr.f32.gmra.mxu0 %v8646_v29  ;;  %3776 = vmatprep.mubr.f32.mxu1 %v2521_v23  ;;  %v3596_v23 = vld [vmem:[#allocation4 + $0x3b0] sm:$0xff] }
 0x277   : > { %3991 = vmatprep.mubr.f32.mxu0 %v8651_v49  ;;  %4343 = vmatprep.subr.mxu0 %v8274_v13 }
 0x278   : > { %4344 = vmatpush2.msra.mxu0 %v3598_v22  ;;  %v3592_v22 = vld [vmem:[#allocation4 + $0x390] sm:$0xff] }
 0x279   : > { %3777 = vmatmul.mubr.f32.gmra.mxu1 %v8651_v49  ;;  %4345 = vmatprep.subr.mxu0 %v8274_v13 }
 0x27a   : > { %3992 = vmatmul.mubr.f32.gmra.mxu0 %v8656_v40  ;;  %3781 = vmatprep.mubr.f32.mxu1 %v2522_v21  ;;  %v3594_v21 = vld [vmem:[#allocation4 + $0x3a0] sm:$0xff] }
 0x27b   : > { %3996 = vmatprep.mubr.f32.mxu0 %v8662_v52  ;;  %4346 = vmatpush2.msra.mxu0 %v3597_v50  ;;  %v8709_v50 = vld [vmem:[#allocation2 + $0xfa] sm:$0xff] }
 0x27c   : > { %4347 = vmatprep.subr.mxu0 %v8274_v13 }
 0x27d   : > { %3782 = vmatmul.mubr.f32.gmra.mxu1 %v8662_v52  ;;  %4348 = vmatpush2.msra.mxu0 %v3596_v23  ;;  %v8741_v23 = vld [vmem:[#allocation2 + $0x140] sm:$0xff] }
 0x27e   : > { %3997 = vmatmul.mubr.f32.gmra.mxu0 %v8667_v44  ;;  %3786 = vmatprep.mubr.f32.mxu1 %v2523_v24  ;;  %v3593_v24 = vld [vmem:[#allocation4 + $0x398] sm:$0xff] }
 0x27f   : > { %4001 = vmatprep.mubr.f32.mxu0 %v8672_v6  ;;  %4349 = vmatprep.subr.mxu0 %v8274_v13 }
 0x280   : > { %4350 = vmatpush2.msra.mxu0 %v3595_v8  ;;  %v9506_v8 = vmax.f32 %v8550_v63, 0.0  ;;  %v8772_v63 = vld [vmem:[#allocation2 + $0x152] sm:$0xff] }
 0x281   : > { %3787 = vmatmul.mubr.f32.gmra.mxu1 %v8672_v6  ;;  %4351 = vmatprep.subr.mxu0 %v8274_v13 }
 0x282   : > { %4002 = vmatmul.mubr.f32.gmra.mxu0 %v8677_v12  ;;  %3791 = vmatprep.mubr.f32.mxu1 %v2524_v46  ;;  %v3591_v46 = vld [vmem:[#allocation4 + $0x388] sm:$0xff] }
 0x283   : > { %4006 = vmatprep.mubr.f32.mxu0 %v8683_v59  ;;  %4352 = vmatpush2.msra.mxu0 %v3594_v21  ;;  %v8759_v21 = vld [vmem:[#allocation2 + $0x158] sm:$0xff] }
 0x284   : > { %4353 = vmatprep.subr.mxu0 %v8274_v13 }
 0x285   : > { %3792 = vmatmul.mubr.f32.gmra.mxu1 %v8683_v59  ;;  %4354 = vmatpush2.msra.mxu0 %v3593_v24  ;;  %v8777_v24 = vld [vmem:[#allocation2 + $0x170] sm:$0xff] }
 0x286   : > { %4007 = vmatmul.mubr.f32.gmra.mxu0 %v8688_v9  ;;  %3796 = vmatprep.mubr.f32.mxu1 %v2525_v7  ;;  %v3590_v7 = vld [vmem:[#allocation4 + $0x380] sm:$0xff] }
 0x287   : > { %4011 = vmatprep.mubr.f32.mxu0 %v8693_v4  ;;  %4355 = vmatprep.subr.mxu0 %v8274_v13 }
 0x288   : > { %4356 = vmatpush2.msra.mxu0 %v3592_v22  ;;  %v2869_v22 = vld [vmem:[#allocation2 + $0x19] sm:$0xff] }
 0x289   : > { %3797 = vmatmul.mubr.f32.gmra.mxu1 %v8693_v4  ;;  %4357 = vmatprep.subr.mxu0 %v8274_v13 }
 0x28a   : > { %4012 = vmatmul.mubr.f32.gmra.mxu0 %v8698_v43  ;;  %3801 = vmatprep.mubr.f32.mxu1 %v2526_v15  ;;  %v8718_v15 = vld [vmem:[#allocation2 + $0x10a] sm:$0xff] }
 0x28b   : > { %4016 = vmatprep.mubr.f32.mxu0 %v8704_v27  ;;  %4358 = vmatpush2.msra.mxu0 %v3591_v46  ;;  %v8788_v46 = vld [vmem:[#allocation2 + $0x16a] sm:$0xff] }
 0x28c   : > { %4359 = vmatprep.subr.mxu0 %v8274_v13  ;;  %v8723_v13 = vld [vmem:[#allocation2 + $0x128] sm:$0xff] }
 0x28d   : > { %3802 = vmatmul.mubr.f32.gmra.mxu1 %v8704_v27  ;;  %4360 = vmatpush2.msra.mxu0 %v3590_v7  ;;  %v2870_v7 = vld [vmem:[#allocation2 + $0x21] sm:$0xff] }
 0x28e   : > { %4017 = vmatmul.mubr.f32.gmra.mxu0 %v8709_v50  ;;  %3806 = vmatprep.mubr.f32.mxu1 %v2527_v51  ;;  %v8732_v51 = vld [vmem:[#allocation2 + $0x138] sm:$0xff] }
 0x28f   : > { %4021 = vmatprep.mubr.f32.mxu0 %v8714_v42 }
 0x291   : > { %3807 = vmatmul.mubr.f32.gmra.mxu1 %v8714_v42 }
 0x292   : > { %4022 = vmatmul.mubr.f32.gmra.mxu0 %v8718_v15  ;;  %3811 = vmatprep.mubr.f32.mxu1 %v2528_v25  ;;  %v9505_v25 = vmax.f32 %v8522_v2, 0.0  ;;  %v8754_v2 = vld [vmem:[#allocation2 + $0x13a] sm:$0xff] }
 0x293   : > { %4026 = vmatprep.mubr.f32.mxu0 %v8723_v13 }
 0x295   : > { %3812 = vmatmul.mubr.f32.gmra.mxu1 %v8723_v13 }
 0x296   : > { %4027 = vmatmul.mubr.f32.gmra.mxu0 %v8727_v26  ;;  %3816 = vmatprep.mubr.f32.mxu1 %v2529_v5  ;;  %v8750_v5 = vld [vmem:[#allocation2 + $0x150] sm:$0xff] }
 0x297   : > { %4031 = vmatprep.mubr.f32.mxu0 %v8732_v51 }
 0x299   : > { %3817 = vmatmul.mubr.f32.gmra.mxu1 %v8732_v51 }
 0x29a   : > { %4032 = vmatmul.mubr.f32.gmra.mxu0 %v8736_v47  ;;  %3821 = vmatprep.mubr.f32.mxu1 %v9505_v25  ;;  %v3619_v25 = vld [vmem:[#allocation4 + $0x468] sm:$0xff] }
 0x29b   : > { %4036 = vmatprep.mubr.f32.mxu0 %v8741_v23 }
 0x29d   : > { %3822 = vmatmul.mubr.f32.gmra.mxu1 %v8741_v23 }
 0x29e   : > { %4037 = vmatmul.mubr.f32.gmra.mxu0 %v8745_v3  ;;  %3826 = vmatprep.mubr.f32.mxu1 %v2531_v62  ;;  %v8768_v62 = vld [vmem:[#allocation2 + $0x168] sm:$0xff] }
 0x29f   : > { %4041 = vmatprep.mubr.f32.mxu0 %v8750_v5 }
 0x2a1   : > { %3827 = vmatmul.mubr.f32.gmra.mxu1 %v8750_v5 }
 0x2a2   : > { %4042 = vmatmul.mubr.f32.gmra.mxu0 %v8754_v2  ;;  %3831 = vmatprep.mubr.f32.mxu1 %v9506_v8  ;;  %v3062_v8 = vld [vmem:[#allocation2 + $0x31] sm:$0xff] }
 0x2a3   : > { %4046 = vmatprep.mubr.f32.mxu0 %v8759_v21 }
 0x2a5   : > { %3832 = vmatmul.mubr.f32.gmra.mxu1 %v8759_v21 }
 0x2a6   : > { %4047 = vmatmul.mubr.f32.gmra.mxu0 %v8763_v18  ;;  %3836 = vmatprep.mubr.f32.mxu1 %v2533_v16  ;;  %v8784_v16 = vld [vmem:[#allocation2 + $0x180] sm:$0xff] }
 0x2a7   : > { %4051 = vmatprep.mubr.f32.mxu0 %v8768_v62 }
 0x2a9   : > { %3837 = vmatmul.mubr.f32.gmra.mxu1 %v8768_v62 }
 0x2aa   : > { %4052 = vmatmul.mubr.f32.gmra.mxu0 %v8772_v63  ;;  %3841 = vmatprep.mubr.f32.mxu1 %v2534_v36  ;;  %v8791_v36 = vld [vmem:[#allocation2 + $0x188] sm:$0xff] }
 0x2ab   : > { %4056 = vmatprep.mubr.f32.mxu0 %v8777_v24 }
 0x2ad   : > { %3842 = vmatmul.mubr.f32.gmra.mxu1 %v8777_v24 }
 0x2ae   : > { %4057 = vmatmul.mubr.f32.gmra.mxu0 %v8781_v41  ;;  %4136 = vmatprep.mubr.f32.mxu1 %v8359_v48  ;;  %v8796_v48 = vld [vmem:[#allocation2 + $0x172] sm:$0xff] }
 0x2af   : > { %4061 = vmatprep.mubr.f32.mxu0 %v8784_v16 }
 0x2b1   : > { %4137 = vmatmul.mubr.f32.vlgmr.msra.gmra.mxu1 %v2869_v22  ;;  %v3618_v22 = vld [vmem:[#allocation4 + $0x460] sm:$0xff] }
 0x2b2   : > { %4062 = vmatmul.mubr.f32.gmra.mxu0 %v8788_v46  ;;  %4141 = vmatprep.mubr.f32.mxu1 %v8382_v58  ;;  %v2998_v58 = vld [vmem:[#allocation2 + $0x30] sm:$0xff] }
 0x2b3   : > { %4066 = vmatprep.mubr.f32.mxu0 %v8791_v36  ;;  %6483 = vmatpush3.msra.mxu1 %v8293_v17  ;;  %v3063_v17 = vld [vmem:[#allocation2 + $0x39] sm:$0xff] }
 0x2b4   : > { %6484 = vmatprep.subr.mxu1 %v3620_v30 }
 0x2b5   : > { %4142 = vmatmul.mubr.f32.gmra.mxu1 %v2870_v7  ;;  %v2999_v7 = vld [vmem:[#allocation2 + $0x38] sm:$0xff] }
 0x2b6   : > { %4067 = vmatmul.mubr.f32.gmra.mxu0 %v8796_v48  ;;  %4146 = vmatprep.mubr.f32.mxu1 %v8404_v0  ;;  %v3064_v0 = vld [vmem:[#allocation2 + $0x49] sm:$0xff] }
 0x2b7   : > { %4361 = vmatprep.mubr.f32.mxu0 %v3062_v8  ;;  %6485 = vmatpush3.msra.mxu1 %v3620_v30  ;;  %v3000_v30 = vld [vmem:[#allocation2 + $0x48] sm:$0xff] }
 0x2b8   : > { %6486 = vmatprep.subr.mxu1 %v3619_v25 }
 0x2b9   : > { %4147 = vmatmul.mubr.f32.gmra.mxu1 %v3062_v8  ;;  %v3616_v8 = vld [vmem:[#allocation4 + $0x450] sm:$0xff] }
 0x2ba   : > { %4362 = vmatmul.mubr.f32.vlgmr.msra.gmra.mxu0 %v2998_v58  ;;  %4151 = vmatprep.mubr.f32.mxu1 %v8431_v39  ;;  %v3065_v39 = vld [vmem:[#allocation2 + $0x51] sm:$0xff] }
 0x2bb   : > { %4366 = vmatprep.mubr.f32.mxu0 %v3063_v17  ;;  %6487 = vmatpush3.msra.mxu1 %v3619_v25  ;;  %v3615_v25 = vld [vmem:[#allocation4 + $0x448] sm:$0xff]  ;;  %v3614_v58 = vld [vmem:[#allocation4 + $0x440] sm:$0xff] }
 0x2bc   : > { %6488 = vmatprep.subr.mxu1 %v3618_v22 }
 0x2bd   : > { %4152 = vmatmul.mubr.f32.gmra.mxu1 %v3063_v17 }
 0x2be   : > { %4367 = vmatmul.mubr.f32.gmra.mxu0 %v2999_v7  ;;  %4156 = vmatprep.mubr.f32.mxu1 %v8457_v38  ;;  %v3066_v38 = vld [vmem:[#allocation2 + $0x61] sm:$0xff] }
 0x2bf   : > { %4371 = vmatprep.mubr.f32.mxu0 %v3064_v0  ;;  %6489 = vmatpush3.msra.mxu1 %v3618_v22 }
 0x2c0   : > { %6490 = vmatprep.subr.mxu1 %v3617_v37 }
 0x2c1   : > { %4157 = vmatmul.mubr.f32.gmra.mxu1 %v3064_v0 }
 0x2c2   : > { %4372 = vmatmul.mubr.f32.gmra.mxu0 %v3000_v30  ;;  %4161 = vmatprep.mubr.f32.mxu1 %v8484_v34  ;;  %v3067_v34 = vld [vmem:[#allocation2 + $0x69] sm:$0xff] }
 0x2c3   : > { %4376 = vmatprep.mubr.f32.mxu0 %v3065_v39  ;;  %6491 = vmatpush3.msra.mxu1 %v3617_v37  ;;  %v3613_v37 = vld [vmem:[#allocation4 + $0x438] sm:$0xff] }
 0x2c4   : > { %6492 = vmatprep.subr.mxu1 %v3616_v8 }
 0x2c5   : > { %4162 = vmatmul.mubr.f32.gmra.mxu1 %v3065_v39  ;;  %v3082_v39 = vld [vmem:[#allocation2 + $0x121] sm:$0xff] }
 0x2c6   : > { %4377 = vmatmul.mubr.f32.gmra.mxu0 %v8410_v11  ;;  %4166 = vmatprep.mubr.f32.mxu1 %v8510_v45  ;;  %v3068_v11 = vld [vmem:[#allocation2 + $0x79] sm:$0xff] }
 0x2c7   : > { %4381 = vmatprep.mubr.f32.mxu0 %v3066_v38  ;;  %6493 = vmatpush3.msra.mxu1 %v3616_v8  ;;  %v3612_v45 = vld [vmem:[#allocation4 + $0x430] sm:$0xff] }
 0x2c8   : > { %6494 = vmatprep.subr.mxu1 %v3615_v25 }
 0x2c9   : > { %4167 = vmatmul.mubr.f32.gmra.mxu1 %v3066_v38 }
 0x2ca   : > { %4382 = vmatmul.mubr.f32.gmra.mxu0 %v8436_v55  ;;  %4171 = vmatprep.mubr.f32.mxu1 %v8539_v1  ;;  %v3069_v55 = vld [vmem:[#allocation2 + $0x81] sm:$0xff]  ;;  %v3611_v1 = vld [vmem:[#allocation4 + $0x428] sm:$0xff] }
 0x2cb   : > { %4386 = vmatprep.mubr.f32.mxu0 %v3067_v34  ;;  %6495 = vmatpush3.msra.mxu1 %v3615_v25 }
 0x2cc   : > { %6496 = vmatprep.subr.mxu1 %v3614_v58 }
 0x2cd   : > { %4172 = vmatmul.mubr.f32.gmra.mxu1 %v3067_v34  ;;  %v3083_v34 = vld [vmem:[#allocation2 + $0x129] sm:$0xff] }
 0x2ce   : > { %4387 = vmatmul.mubr.f32.gmra.mxu0 %v8463_v10  ;;  %4176 = vmatprep.mubr.f32.mxu1 %v8566_v19  ;;  %v3070_v10 = vld [vmem:[#allocation2 + $0x91] sm:$0xff] }
 0x2cf   : > { %4391 = vmatprep.mubr.f32.mxu0 %v3068_v11  ;;  %6497 = vmatpush3.msra.mxu1 %v3614_v58  ;;  %v3610_v19 = vld [vmem:[#allocation4 + $0x420] sm:$0xff] }
 0x2d0   : > { %6498 = vmatprep.subr.mxu1 %v3613_v37 }
 0x2d1   : > { %4177 = vmatmul.mubr.f32.gmra.mxu1 %v3068_v11 }
 0x2d2   : > { %4392 = vmatmul.mubr.f32.gmra.mxu0 %v8489_v14  ;;  %4181 = vmatprep.mubr.f32.mxu1 %v8592_v57  ;;  %v3071_v14 = vld [vmem:[#allocation2 + $0x99] sm:$0xff]  ;;  %v3609_v57 = vld [vmem:[#allocation4 + $0x418] sm:$0xff] }
 0x2d3   : > { %4396 = vmatprep.mubr.f32.mxu0 %v3069_v55  ;;  %6499 = vmatpush3.msra.mxu1 %v3613_v37 }
 0x2d4   : > { %6500 = vmatprep.subr.mxu1 %v3612_v45 }
 0x2d5   : > { %4182 = vmatmul.mubr.f32.gmra.mxu1 %v3069_v55  ;;  %v3084_v55 = vld [vmem:[#allocation2 + $0x139] sm:$0xff] }
 0x2d6   : > { %4397 = vmatmul.mubr.f32.gmra.mxu0 %v8516_v61  ;;  %4186 = vmatprep.mubr.f32.mxu1 %v8610_v31  ;;  %v3072_v61 = vld [vmem:[#allocation2 + $0xa9] sm:$0xff]  ;;  %v3608_v31 = vld [vmem:[#allocation4 + $0x410] sm:$0xff] }
 0x2d7   : > { %4401 = vmatprep.mubr.f32.mxu0 %v3070_v10  ;;  %6501 = vmatpush3.msra.mxu1 %v3612_v45 }
 0x2d8   : > { %6502 = vmatprep.subr.mxu1 %v3611_v1 }
 0x2d9   : > { %4187 = vmatmul.mubr.f32.gmra.mxu1 %v3070_v10 }
 0x2da   : > { %4402 = vmatmul.mubr.f32.gmra.mxu0 %v8544_v56  ;;  %4191 = vmatprep.mubr.f32.mxu1 %v8621_v35  ;;  %v3073_v56 = vld [vmem:[#allocation2 + $0xb1] sm:$0xff] }
 0x2db   : > { %4406 = vmatprep.mubr.f32.mxu0 %v3071_v14  ;;  %6503 = vmatpush3.msra.mxu1 %v3611_v1  ;;  %v3607_v35 = vld [vmem:[#allocation4 + $0x408] sm:$0xff] }
 0x2dc   : > { %6504 = vmatprep.subr.mxu1 %v3610_v19 }
 0x2dd   : > { %4192 = vmatmul.mubr.f32.gmra.mxu1 %v3071_v14  ;;  %v3085_v14 = vld [vmem:[#allocation2 + $0x141] sm:$0xff] }
 0x2de   : > { %4407 = vmatmul.mubr.f32.gmra.mxu0 %v8572_v54  ;;  %4196 = vmatprep.mubr.f32.mxu1 %v8633_v60  ;;  %v3074_v54 = vld [vmem:[#allocation2 + $0xc1] sm:$0xff]  ;;  %v3606_v60 = vld [vmem:[#allocation4 + $0x400] sm:$0xff] }
 0x2df   : > { %4411 = vmatprep.mubr.f32.mxu0 %v3072_v61  ;;  %6505 = vmatpush3.msra.mxu1 %v3610_v19 }
 0x2e0   : > { %6506 = vmatprep.subr.mxu1 %v3609_v57 }
 0x2e1   : > { %4197 = vmatmul.mubr.f32.gmra.mxu1 %v3072_v61 }
 0x2e2   : > { %4412 = vmatmul.mubr.f32.gmra.mxu0 %v8597_v33  ;;  %4201 = vmatprep.mubr.f32.mxu1 %v8646_v29  ;;  %v3075_v33 = vld [vmem:[#allocation2 + $0xc9] sm:$0xff]  ;;  %v3078_v29 = vld [vmem:[#allocation2 + $0xf1] sm:$0xff] }
 0x2e3   : > { %4416 = vmatprep.mubr.f32.mxu0 %v3073_v56  ;;  %6507 = vmatpush3.msra.mxu1 %v3609_v57 }
 0x2e4   : > { %6508 = vmatprep.subr.mxu1 %v3608_v31 }
 0x2e5   : > { %4202 = vmatmul.mubr.f32.gmra.mxu1 %v3073_v56  ;;  %v3086_v56 = vld [vmem:[#allocation2 + $0x151] sm:$0xff] }
 0x2e6   : > { %4417 = vmatmul.mubr.f32.gmra.mxu0 %v8616_v20  ;;  %4206 = vmatprep.mubr.f32.mxu1 %v8656_v40  ;;  %v3076_v20 = vld [vmem:[#allocation2 + $0xd9] sm:$0xff] }
 0x2e7   : > { %4421 = vmatprep.mubr.f32.mxu0 %v3074_v54  ;;  %6509 = vmatpush3.msra.mxu1 %v3608_v31 }
 0x2e8   : > { %6510 = vmatprep.subr.mxu1 %v3607_v35 }
 0x2e9   : > { %4207 = vmatmul.mubr.f32.gmra.mxu1 %v3074_v54 }
 0x2ea   : > { %4422 = vmatmul.mubr.f32.gmra.mxu0 %v8626_v32  ;;  %4211 = vmatprep.mubr.f32.mxu1 %v8667_v44  ;;  %v3077_v32 = vld [vmem:[#allocation2 + $0xe1] sm:$0xff] }
 0x2eb   : > { %4426 = vmatprep.mubr.f32.mxu0 %v3075_v33  ;;  %6511 = vmatpush3.msra.mxu1 %v3607_v35 }
 0x2ec   : > { %6512 = vmatprep.subr.mxu1 %v3606_v60 }
 0x2ed   : > { %4212 = vmatmul.mubr.f32.gmra.mxu1 %v3075_v33  ;;  %v3087_v33 = vld [vmem:[#allocation2 + $0x159] sm:$0xff] }
 0x2ee   : > { %4427 = vmatmul.mubr.f32.gmra.mxu0 %v8639_v53  ;;  %4216 = vmatprep.mubr.f32.mxu1 %v8677_v12 }
 0x2ef   : > { %4431 = vmatprep.mubr.f32.mxu0 %v3076_v20  ;;  %6513 = vmatpush3.msra.mxu1 %v3606_v60 }
 0x2f1   : > { %4217 = vmatmul.mubr.f32.gmra.mxu1 %v3076_v20 }
 0x2f2   : > { %4432 = vmatmul.mubr.f32.gmra.mxu0 %v8651_v49  ;;  %4221 = vmatprep.mubr.f32.mxu1 %v8688_v9  ;;  %v3079_v49 = vld [vmem:[#allocation2 + $0xf9] sm:$0xff] }
 0x2f3   : > { %4436 = vmatprep.mubr.f32.mxu0 %v3077_v32 }
 0x2f5   : > { %4222 = vmatmul.mubr.f32.gmra.mxu1 %v3077_v32 }
 0x2f6   : > { %4437 = vmatmul.mubr.f32.gmra.mxu0 %v8662_v52  ;;  %4226 = vmatprep.mubr.f32.mxu1 %v8698_v43  ;;  %v3080_v52 = vld [vmem:[#allocation2 + $0x109] sm:$0xff] }
 0x2f7   : > { %4441 = vmatprep.mubr.f32.mxu0 %v3078_v29 }
 0x2f9   : > { %v3698_v53 = vpop.f32.mrf.mxu1  ;;  %4227 = vmatmul.mubr.f32.gmra.mxu1 %v3078_v29  ;;  %v8829_v40 = vpop.f32.mrf.mxu0 }
 0x2fa   : > { %4442 = vmatmul.mubr.f32.gmra.mxu0 %v8672_v6  ;;  %4231 = vmatprep.mubr.f32.mxu1 %v8709_v50  ;;  %v3081_v50 = vld [vmem:[#allocation2 + $0x111] sm:$0xff] }
 0x2fb   : > { %4446 = vmatprep.mubr.f32.mxu0 %v3079_v49  ;;  %v3700_v44 = vpop.f32.mrf.mxu1  ;;  %v3915_v12 = vpop.f32.mrf.mxu0 }
 0x2fd   : > { %v3703_v9 = vpop.f32.mrf.mxu1  ;;  %4232 = vmatmul.mubr.f32.gmra.mxu1 %v3079_v49 }
 0x2fe   : > { %v8833_v22 = vpop.f32.mrf.mxu0  ;;  %4447 = vmatmul.mubr.f32.gmra.mxu0 %v8683_v59  ;;  %4236 = vmatprep.mubr.f32.mxu1 %v8718_v15 }
 0x2ff   : > { %4451 = vmatprep.mubr.f32.mxu0 %v3080_v52  ;;  %v3705_v43 = vpop.f32.mrf.mxu1 }
 0x300   : > { %v3920_v17 = vpop.f32.mrf.mxu0 }
 0x301   : > { %v3708_v7 = vpop.f32.mrf.mxu1  ;;  %4237 = vmatmul.mubr.f32.gmra.mxu1 %v3080_v52 }
 0x302   : > { %v3923_v6 = vpop.f32.mrf.mxu0  ;;  %4452 = vmatmul.mubr.f32.gmra.mxu0 %v8693_v4  ;;  %4241 = vmatprep.mubr.f32.mxu1 %v8727_v26 }
 0x303   : > { %v8839_v0 = vadd.f32 %v3923_v6, %v3698_v53  ;;  %4456 = vmatprep.mubr.f32.mxu0 %v3081_v50  ;;  %v3710_v30 = vpop.f32.mrf.mxu1  ;;  %v3088_v53 = vld [vmem:[#allocation2 + $0x169] sm:$0xff] }
 0x304   : > { %v3925_v8 = vpop.f32.mrf.mxu0 }
 0x305   : > { %v3713_v59 = vpop.f32.mrf.mxu1  ;;  %4242 = vmatmul.mubr.f32.gmra.mxu1 %v3081_v50  ;;  %v3090_v50 = vld [vmem:[#allocation2 + $0x181] sm:$0xff] }
 0x306   : > { %v3928_v15 = vpop.f32.mrf.mxu0  ;;  %4457 = vmatmul.mubr.f32.gmra.mxu0 %v8704_v27  ;;  %4246 = vmatprep.mubr.f32.mxu1 %v8736_v47 }
 0x307   : > { %v8843_v25 = vadd.f32 %v3928_v15, %v3703_v9  ;;  %4461 = vmatprep.mubr.f32.mxu0 %v3082_v39  ;;  %v3715_v4 = vpop.f32.mrf.mxu1  ;;  %v3089_v9 = vld [vmem:[#allocation2 + $0x171] sm:$0xff] }
 0x308   : > { %v3930_v38 = vpop.f32.mrf.mxu0  ;;  %v8879_v15 = vld [vmem:[#allocation2 + $0x18a] sm:$0xff] }
 0x309   : > { %v3718_v26 = vpop.f32.mrf.mxu1  ;;  %4247 = vmatmul.mubr.f32.gmra.mxu1 %v3082_v39  ;;  %v3091_v4 = vld [vmem:[#allocation2 + $0x189] sm:$0xff] }
 0x30a   : > { %v3933_v58 = vpop.f32.mrf.mxu0  ;;  %4462 = vmatmul.mubr.f32.gmra.mxu0 %v8714_v42  ;;  %4251 = vmatprep.mubr.f32.mxu1 %v8745_v3 }
 0x30b   : > { %v8847_v37 = vadd.f32 %v3933_v58, %v3708_v7  ;;  %4466 = vmatprep.mubr.f32.mxu0 %v3083_v34  ;;  %v3720_v27 = vpop.f32.mrf.mxu1  ;;  %v8873_v7 = vld [vmem:[#allocation2 + $0x182] sm:$0xff]  ;;  %v3092_v58 = vld [vmem:[#allocation2 + $0x199] sm:$0xff] }
 0x30c   : > { %v3935_v11 = vpop.f32.mrf.mxu0  ;;  %v3126_v27 = vld [vmem:[#allocation2 + $0x32] sm:$0xff] }
 0x30d   : > { %v3723_v47 = vpop.f32.mrf.mxu1  ;;  %4252 = vmatmul.mubr.f32.gmra.mxu1 %v3083_v34 }
 0x30e   : > { %v3938_v45 = vpop.f32.mrf.mxu0  ;;  %4467 = vmatmul.mubr.f32.gmra.mxu0 %v8723_v13  ;;  %4256 = vmatprep.mubr.f32.mxu1 %v8754_v2 }
 0x30f   : > { %v8851_v1 = vadd.f32 %v3938_v45, %v3713_v59  ;;  %4471 = vmatprep.mubr.f32.mxu0 %v3084_v55  ;;  %v3725_v42 = vpop.f32.mrf.mxu1 }
 0x310   : > { %v3940_v10 = vpop.f32.mrf.mxu0  ;;  %v3127_v42 = vld [vmem:[#allocation2 + $0x3a] sm:$0xff] }
 0x311   : > { %v3728_v3 = vpop.f32.mrf.mxu1  ;;  %4257 = vmatmul.mubr.f32.gmra.mxu1 %v3084_v55  ;;  %v3093_v10 = vld [vmem:[#allocation2 + $0x1a1] sm:$0xff] }
 0x312   : > { %v3943_v19 = vpop.f32.mrf.mxu0  ;;  %4472 = vmatmul.mubr.f32.gmra.mxu0 %v8732_v51  ;;  %4261 = vmatprep.mubr.f32.mxu1 %v8763_v18 }
 0x313   : > { %v8855_v57 = vadd.f32 %v3943_v19, %v3718_v26  ;;  %4476 = vmatprep.mubr.f32.mxu0 %v3085_v14  ;;  %v3730_v13 = vpop.f32.mrf.mxu1  ;;  %v3128_v19 = vld [vmem:[#allocation2 + $0x4a] sm:$0xff] }
 0x314   : > { %v3945_v61 = vpop.f32.mrf.mxu0 }
 0x315   : > { %v3733_v2 = vpop.f32.mrf.mxu1  ;;  %4262 = vmatmul.mubr.f32.gmra.mxu1 %v3085_v14 }
 0x316   : > { %v3948_v31 = vpop.f32.mrf.mxu0  ;;  %4477 = vmatmul.mubr.f32.gmra.mxu0 %v8741_v23  ;;  %4266 = vmatprep.mubr.f32.mxu1 %v8772_v63 }
 0x317   : > { %v8859_v35 = vadd.f32 %v3948_v31, %v3723_v47  ;;  %4481 = vmatprep.mubr.f32.mxu0 %v3086_v56  ;;  %v3735_v51 = vpop.f32.mrf.mxu1 }
 0x318   : > { %v3950_v54 = vpop.f32.mrf.mxu0 }
 0x319   : > { %v3738_v18 = vpop.f32.mrf.mxu1  ;;  %4267 = vmatmul.mubr.f32.gmra.mxu1 %v3086_v56  ;;  %v3130_v56 = vld [vmem:[#allocation2 + $0x62] sm:$0xff] }
 0x31a   : > { %v3953_v60 = vpop.f32.mrf.mxu0  ;;  %4482 = vmatmul.mubr.f32.gmra.mxu0 %v8750_v5  ;;  %4271 = vmatprep.mubr.f32.mxu1 %v8781_v41  ;;  %v6622_v54 = vld [vmem:[#allocation2 + $0x8] sm:$0xff] }
 0x31b   : > { %v8863_v20 = vadd.f32 %v3953_v60, %v3728_v3  ;;  %4486 = vmatprep.mubr.f32.mxu0 %v3087_v33  ;;  %v3740_v23 = vpop.f32.mrf.mxu1 }
 0x31c   : > { %v3955_v32 = vpop.f32.mrf.mxu0  ;;  %v3131_v23 = vld [vmem:[#allocation2 + $0x6a] sm:$0xff] }
 0x31d   : > { %v3743_v63 = vpop.f32.mrf.mxu1  ;;  %4272 = vmatmul.mubr.f32.gmra.mxu1 %v3087_v33 }
 0x31e   : > { %v3958_v29 = vpop.f32.mrf.mxu0  ;;  %4487 = vmatmul.mubr.f32.gmra.mxu0 %v8759_v21  ;;  %4276 = vmatprep.mubr.f32.mxu1 %v8788_v46 }
 0x31f   : > { %v8867_v49 = vadd.f32 %v3958_v29, %v3733_v2  ;;  %4491 = vmatprep.mubr.f32.mxu0 %v3088_v53  ;;  %v3745_v5 = vpop.f32.mrf.mxu1  ;;  %v3129_v2 = vld [vmem:[#allocation2 + $0x52] sm:$0xff] }
 0x320   : > { %v3960_v44 = vpop.f32.mrf.mxu0 }
 0x321   : > { %v3748_v41 = vpop.f32.mrf.mxu1  ;;  %4277 = vmatmul.mubr.f32.gmra.mxu1 %v3088_v53 }
 0x322   : > { %v3963_v12 = vpop.f32.mrf.mxu0  ;;  %4492 = vmatmul.mubr.f32.gmra.mxu0 %v8768_v62  ;;  %4281 = vmatprep.mubr.f32.mxu1 %v8796_v48 }
 0x323   : > { %v8871_v52 = vadd.f32 %v3963_v12, %v3738_v18  ;;  %4496 = vmatprep.mubr.f32.mxu0 %v3089_v9  ;;  %v3750_v21 = vpop.f32.mrf.mxu1 }
 0x324   : > { %v3965_v43 = vpop.f32.mrf.mxu0 }
 0x325   : > { %v3753_v17 = vpop.f32.mrf.mxu1  ;;  %4282 = vmatmul.mubr.f32.gmra.mxu1 %v3089_v9  ;;  %v3134_v9 = vld [vmem:[#allocation2 + $0x92] sm:$0xff] }
 0x326   : > { %v3968_v6 = vpop.f32.mrf.mxu0  ;;  %4497 = vmatmul.mubr.f32.gmra.mxu0 %v8777_v24  ;;  %4286 = vmatprep.mubr.f32.mxu1 %v8873_v7 }
 0x327   : > { %v8877_v30 = vadd.f32 %v3968_v6, %v3743_v63  ;;  %4501 = vmatprep.mubr.f32.mxu0 %v3090_v50  ;;  %v3755_v62 = vpop.f32.mrf.mxu1  ;;  %v3132_v63 = vld [vmem:[#allocation2 + $0x7a] sm:$0xff] }
 0x328   : > { %v3970_v8 = vpop.f32.mrf.mxu0 }
 0x329   : > { %v3758_v59 = vpop.f32.mrf.mxu1  ;;  %4287 = vmatmul.mubr.f32.gmra.mxu1 %v3090_v50  ;;  %v3135_v50 = vld [vmem:[#allocation2 + $0x9a] sm:$0xff]  ;;  %v3136_v8 = vld [vmem:[#allocation2 + $0xaa] sm:$0xff] }
 0x32a   : > { %v3973_v39 = vpop.f32.mrf.mxu0  ;;  %4502 = vmatmul.mubr.f32.gmra.mxu0 %v8784_v16  ;;  %4291 = vmatprep.mubr.f32.mxu1 %v8879_v15  ;;  %v3028_v16 = vld [vmem:[#allocation2 + $0x198] sm:$0xff] }
 0x32b   : > { %v8883_v38 = vadd.f32 %v3973_v39, %v3748_v41  ;;  %4506 = vmatprep.mubr.f32.mxu0 %v3091_v4  ;;  %v3760_v24 = vpop.f32.mrf.mxu1  ;;  %v3133_v41 = vld [vmem:[#allocation2 + $0x82] sm:$0xff] }
 0x32c   : > { %v3975_v26 = vpop.f32.mrf.mxu0 }
 0x32d   : > { %v3763_v34 = vpop.f32.mrf.mxu1  ;;  %4292 = vmatmul.mubr.f32.gmra.mxu1 %v3091_v4  ;;  %v3137_v26 = vld [vmem:[#allocation2 + $0xb2] sm:$0xff] }
 0x32e   : > { %v3978_v11 = vpop.f32.mrf.mxu0  ;;  %4507 = vmatmul.mubr.f32.gmra.mxu0 %v8791_v36  ;;  %6514 = vmatprep.mubr.f32.mxu1 %v3126_v27 }
 0x32f   : > { %v8886_v47 = vadd.f32 %v3978_v11, %v3753_v17  ;;  %v3765_v45 = vpop.f32.mrf.mxu1  ;;  %4511 = vmatprep.mubr.f32.mxu0 %v3092_v58 }
 0x330   : > { %v3980_v55 = vpop.f32.mrf.mxu0 }
 0x331   : > { %v3768_v3 = vpop.f32.mrf.mxu1  ;;  %6515 = vmatmul.mubr.f32.vlgmr.msra.gmra.mxu1 %v3127_v42  ;;  %v3139_v55 = vld [vmem:[#allocation2 + $0xca] sm:$0xff] }
 0x332   : > { %v3983_v14 = vpop.f32.mrf.mxu0  ;;  %4512 = vmatmul.mubr.f32.gmra.mxu0 %v3028_v16  ;;  %6517 = vmatprep.mubr.f32.mxu1 %v3128_v19 }
 0x333   : > { %v8888_v13 = vadd.f32 %v3983_v14, %v3758_v59  ;;  %v3770_v61 = vpop.f32.mrf.mxu1  ;;  %4516 = vmatprep.mubr.f32.mxu0 %v3093_v10  ;;  %v3140_v10 = vld [vmem:[#allocation2 + $0xda] sm:$0xff] }
 0x334   : > { %v3985_v36 = vpop.f32.mrf.mxu0 }
 0x335   : > { %v3773_v31 = vpop.f32.mrf.mxu1  ;;  %6518 = vmatmul.mubr.f32.gmra.mxu1 %v3129_v2  ;;  %v3141_v36 = vld [vmem:[#allocation2 + $0xe2] sm:$0xff] }
 0x336   : > { %v3988_v51 = vpop.f32.mrf.mxu0  ;;  %4517 = vmatmul.mubr.f32.gmra.mxu0 %v6622_v54  ;;  %6520 = vmatprep.mubr.f32.mxu1 %v3130_v56 }
 0x337   : > { %v8890_v18 = vadd.f32 %v3988_v51, %v3763_v34  ;;  %v3775_v60 = vpop.f32.mrf.mxu1  ;;  %v3138_v34 = vld [vmem:[#allocation2 + $0xc2] sm:$0xff] }
 0x338   : > { %v3990_v33 = vpop.f32.mrf.mxu0 }
 0x339   : > { %v3778_v32 = vpop.f32.mrf.mxu1  ;;  %6521 = vmatmul.mubr.f32.gmra.mxu1 %v3131_v23  ;;  %v3143_v33 = vld [vmem:[#allocation2 + $0xfa] sm:$0xff] }
 0x33a   : > { %v3993_v29 = vpop.f32.mrf.mxu0  ;;  %6523 = vmatprep.mubr.f32.mxu1 %v3132_v63 }
 0x33b   : > { %v8892_v53 = vadd.f32 %v3993_v29, %v3768_v3  ;;  %v3780_v5 = vpop.f32.mrf.mxu1 }
 0x33c   : > { %v3995_v44 = vpop.f32.mrf.mxu0 }
 0x33d   : > { %v3783_v12 = vpop.f32.mrf.mxu1  ;;  %6524 = vmatmul.mubr.f32.gmra.mxu1 %v3133_v41  ;;  %v3145_v41 = vld [vmem:[#allocation2 + $0x112] sm:$0xff] }
 0x33e   : > { %v3998_v21 = vpop.f32.mrf.mxu0  ;;  %6526 = vmatprep.mubr.f32.mxu1 %v3134_v9  ;;  %v3146_v9 = vld [vmem:[#allocation2 + $0x122] sm:$0xff] }
 0x33f   : > { %v8894_v43 = vadd.f32 %v3998_v21, %v3773_v31  ;;  %v3785_v17 = vpop.f32.mrf.mxu1  ;;  %v3142_v31 = vld [vmem:[#allocation2 + $0xf2] sm:$0xff] }
 0x340   : > { %v4000_v6 = vpop.f32.mrf.mxu0 }
 0x341   : > { %v3788_v62 = vpop.f32.mrf.mxu1  ;;  %6527 = vmatmul.mubr.f32.gmra.mxu1 %v3135_v50 }
 0x342   : > { %v4003_v59 = vpop.f32.mrf.mxu0  ;;  %6529 = vmatprep.mubr.f32.mxu1 %v3136_v8 }
 0x343   : > { %v8896_v39 = vadd.f32 %v4003_v59, %v3778_v32  ;;  %v3790_v4 = vpop.f32.mrf.mxu1  ;;  %v3144_v32 = vld [vmem:[#allocation2 + $0x10a] sm:$0xff]  ;;  %v3148_v59 = vld [vmem:[#allocation2 + $0x13a] sm:$0xff] }
 0x344   : > { %v4005_v24 = vpop.f32.mrf.mxu0 }
 0x345   : > { %v3793_v58 = vpop.f32.mrf.mxu1  ;;  %6530 = vmatmul.mubr.f32.gmra.mxu1 %v3137_v26 }
 0x346   : > { %v4008_v27 = vpop.f32.mrf.mxu0  ;;  %6532 = vmatprep.mubr.f32.mxu1 %v3138_v34  ;;  %v3149_v34 = vld [vmem:[#allocation2 + $0x142] sm:$0xff] }
 0x347   : > { %v8898_v11 = vadd.f32 %v4008_v27, %v3783_v12  ;;  %v3795_v45 = vpop.f32.mrf.mxu1 }
 0x348   : > { %v4010_v16 = vpop.f32.mrf.mxu0  ;;  %v3150_v45 = vld [vmem:[#allocation2 + $0x152] sm:$0xff] }
 0x349   : > { %v3798_v42 = vpop.f32.mrf.mxu1  ;;  %6533 = vmatmul.mubr.f32.gmra.mxu1 %v3139_v55 }
 0x34a   : > { %v4013_v3 = vpop.f32.mrf.mxu0  ;;  %6535 = vmatprep.mubr.f32.mxu1 %v3140_v10 }
 0x34b   : > { %v8900_v19 = vadd.f32 %v4013_v3, %v3788_v62  ;;  %v3800_v14 = vpop.f32.mrf.mxu1  ;;  %v3147_v62 = vld [vmem:[#allocation2 + $0x12a] sm:$0xff]  ;;  %v3151_v3 = vld [vmem:[#allocation2 + $0x15a] sm:$0xff] }
 0x34c   : > { %v4015_v61 = vpop.f32.mrf.mxu0 }
 0x34d   : > { %v3803_v2 = vpop.f32.mrf.mxu1  ;;  %6536 = vmatmul.mubr.f32.gmra.mxu1 %v3141_v36 }
 0x34e   : > { %v4018_v56 = vpop.f32.mrf.mxu0  ;;  %6538 = vmatprep.mubr.f32.mxu1 %v3142_v31 }
 0x34f   : > { %v8902_v51 = vadd.f32 %v4018_v56, %v3793_v58  ;;  %v3805_v54 = vpop.f32.mrf.mxu1 }
 0x350   : > { %v4020_v60 = vpop.f32.mrf.mxu0 }
 0x351   : > { %v3808_v23 = vpop.f32.mrf.mxu1  ;;  %6539 = vmatmul.mubr.f32.gmra.mxu1 %v3143_v33 }
 0x352   : > { %v4023_v63 = vpop.f32.mrf.mxu0  ;;  %6541 = vmatprep.mubr.f32.mxu1 %v3144_v32 }
 0x353   : > { %v8904_v29 = vadd.f32 %v4023_v63, %v3798_v42  ;;  %v3810_v5 = vpop.f32.mrf.mxu1 }
 0x354   : > { %v4025_v44 = vpop.f32.mrf.mxu0 }
 0x355   : > { %v3813_v12 = vpop.f32.mrf.mxu1  ;;  %6542 = vmatmul.mubr.f32.gmra.mxu1 %v3145_v41 }
 0x356   : > { %v4028_v21 = vpop.f32.mrf.mxu0  ;;  %6544 = vmatprep.mubr.f32.mxu1 %v3146_v9 }
 0x357   : > { %v8906_v17 = vadd.f32 %v4028_v21, %v3803_v2  ;;  %v3815_v6 = vpop.f32.mrf.mxu1 }
 0x358   : > { %v4030_v50 = vpop.f32.mrf.mxu0  ;;  %v3914_v6 = vadd.f32 %v8829_v40, %v8630_v28 }
 0x359   : > { %v3818_v8 = vpop.f32.mrf.mxu1  ;;  %6545 = vmatmul.mubr.f32.gmra.mxu1 %v3147_v62 }
 0x35a   : > { %v4033_v4 = vpop.f32.mrf.mxu0  ;;  %6547 = vmatprep.mubr.f32.mxu1 %v3148_v59 }
 0x35b   : > { %v8908_v24 = vadd.f32 %v4033_v4, %v3808_v23  ;;  %v3820_v26 = vpop.f32.mrf.mxu1  ;;  %v3156_v23 = vld [vmem:[#allocation2 + $0x19a] sm:$0xff] }
 0x35c   : > { %v4035_v58 = vpop.f32.mrf.mxu0  ;;  %v9507_v26 = vld [vmem:[#allocation10_spill] sm:$0xff] }
 0x35d   : > { %v3823_v27 = vpop.f32.mrf.mxu1  ;;  %6548 = vmatmul.mubr.f32.gmra.mxu1 %v3149_v34  ;;  %v3919_v58 = vadd.f32 %v8833_v22, %v9507_v26 }
 0x35e   : > { %v4038_v16 = vpop.f32.mrf.mxu0  ;;  %6550 = vmatprep.mubr.f32.mxu1 %v3150_v45 }
 0x35f   : > { %v8910_v55 = vadd.f32 %v4038_v16, %v3813_v12  ;;  %v3825_v42 = vpop.f32.mrf.mxu1 }
 0x360   : > { %v4040_v10 = vpop.f32.mrf.mxu0 }
 0x361   : > { %v3828_v14 = vpop.f32.mrf.mxu1  ;;  %6551 = vmatmul.mubr.f32.gmra.mxu1 %v3151_v3 }
 0x362   : > { %v4043_v61 = vpop.f32.mrf.mxu0  ;;  %6553 = vmatprep.mubr.f32.mxu1 %v8788_v46  ;;  %v3157_v46 = vld [vmem:[#allocation2 + $0x1a2] sm:$0xff] }
 0x363   : > { %v8913_v36 = vadd.f32 %v4043_v61, %v3818_v8  ;;  %v3830_v2 = vpop.f32.mrf.mxu1 }
 0x364   : > { %v4045_v31 = vpop.f32.mrf.mxu0 }
 0x365   : > { %v3833_v56 = vpop.f32.mrf.mxu1  ;;  %6554 = vmatmul.mubr.f32.gmra.mxu1 %v8796_v48 }
 0x366   : > { %v4048_v54 = vpop.f32.mrf.mxu0  ;;  %6556 = vmatprep.mubr.f32.mxu1 %v8873_v7 }
 0x367   : > { %v8917_v60 = vadd.f32 %v4048_v54, %v3823_v27  ;;  %v3835_v33 = vpop.f32.mrf.mxu1 }
 0x368   : > { %v4050_v32 = vpop.f32.mrf.mxu0 }
 0x369   : > { %v3838_v63 = vpop.f32.mrf.mxu1  ;;  %6557 = vmatmul.mubr.f32.gmra.mxu1 %v8879_v15 }
 0x36a   : > { %v4053_v5 = vpop.f32.mrf.mxu0  ;;  %6559 = vmatprep.mubr.f32.mxu1 %v3156_v23 }
 0x36b   : > { %v8920_v44 = vadd.f32 %v4053_v5, %v3828_v14  ;;  %v3840_v41 = vpop.f32.mrf.mxu1 }
 0x36c   : > { %v4055_v12 = vpop.f32.mrf.mxu0 }
 0x36d   : > { %v3843_v9 = vpop.f32.mrf.mxu1  ;;  %6560 = vmatmul.mubr.f32.gmra.mxu1 %v3157_v46 }
 0x36e   : > { %v4058_v48 = vpop.f32.mrf.mxu0 }
 0x36f   : > { %v8922_v21 = vadd.f32 %v4058_v48, %v3833_v56  ;;  %v3845_v7 = vpop.f32.mrf.mxu1 }
 0x370   : > { %v4060_v50 = vpop.f32.mrf.mxu0 }
 0x371   : > { %v4138_v62 = vpop.f32.mrf.mxu1 }
 0x372   : > { %v4063_v8 = vpop.f32.mrf.mxu0  ;;  %v4139_v15 = vadd.f32 %v4138_v62, %v3914_v6 }
 0x373   : > { %v8926_v59 = vadd.f32 %v4063_v8, %v3838_v63  ;;  %v4140_v4 = vpop.f32.mrf.mxu1 }
 0x374   : > { %v4065_v34 = vpop.f32.mrf.mxu0 }
 0x375   : > { %v4143_v27 = vpop.f32.mrf.mxu1 }
 0x376   : > { %v4068_v45 = vpop.f32.mrf.mxu0  ;;  %v4144_v16 = vadd.f32 %v4143_v27, %v3919_v58 }
 0x377   : > { %v8930_v42 = vadd.f32 %v4068_v45, %v3843_v9  ;;  %v4145_v10 = vpop.f32.mrf.mxu1 }
 0x378   : > { %v4070_v3 = vpop.f32.mrf.mxu0 }
 0x379   : > { %v4148_v14 = vpop.f32.mrf.mxu1 }
 0x37a   : > { %v4149_v28 = vadd.f32 %v4148_v14, %v8839_v0  ;;  %v4363_v40 = vpop.f32.mrf.mxu0 }
 0x37b   : > { %v8933_v61 = vadd.f32 %v4363_v40, %v4139_v15  ;;  %v4150_v2 = vpop.f32.mrf.mxu1 }
 0x37c   : > { %v4365_v31 = vpop.f32.mrf.mxu0 }
 0x37d   : > { %v4153_v56 = vpop.f32.mrf.mxu1 }
 0x37e   : > { %v4154_v54 = vadd.f32 %v4153_v56, %v8843_v25  ;;  %v4368_v22 = vpop.f32.mrf.mxu0 }
 0x37f   : > { %v8936_v33 = vadd.f32 %v4368_v22, %v4144_v16  ;;  %v4155_v23 = vpop.f32.mrf.mxu1 }
 0x380   : > { %v4370_v32 = vpop.f32.mrf.mxu0 }
 0x381   : > { %v4158_v63 = vpop.f32.mrf.mxu1 }
 0x382   : > { %v4159_v5 = vadd.f32 %v4158_v63, %v8847_v37  ;;  %v4373_v46 = vpop.f32.mrf.mxu0 }
 0x383   : > { %v8939_v41 = vadd.f32 %v4373_v46, %v4149_v28  ;;  %v4160_v0 = vpop.f32.mrf.mxu1 }
 0x384   : > { %v4375_v12 = vpop.f32.mrf.mxu0 }
 0x385   : > { %v4163_v9 = vpop.f32.mrf.mxu1 }
 0x386   : > { %v4164_v48 = vadd.f32 %v4163_v9, %v8851_v1  ;;  %v4378_v7 = vpop.f32.mrf.mxu0 }
 0x387   : > { %v8942_v6 = vadd.f32 %v4378_v7, %v4154_v54  ;;  %v4165_v25 = vpop.f32.mrf.mxu1 }
 0x388   : > { %v4380_v50 = vpop.f32.mrf.mxu0 }
 0x389   : > { %v4168_v62 = vpop.f32.mrf.mxu1 }
 0x38a   : > { %v4169_v8 = vadd.f32 %v4168_v62, %v8855_v57  ;;  %v4383_v15 = vpop.f32.mrf.mxu0 }
 0x38b   : > { %v8945_v4 = vadd.f32 %v4383_v15, %v4159_v5  ;;  %v4170_v37 = vpop.f32.mrf.mxu1 }
 0x38c   : > { %v4385_v26 = vpop.f32.mrf.mxu0 }
 0x38d   : > { %v4173_v58 = vpop.f32.mrf.mxu1 }
 0x38e   : > { %v4174_v34 = vadd.f32 %v4173_v58, %v8859_v35  ;;  %v4388_v27 = vpop.f32.mrf.mxu0 }
 0x38f   : > { %v8948_v45 = vadd.f32 %v4388_v27, %v4164_v48  ;;  %v4175_v1 = vpop.f32.mrf.mxu1 }
 0x390   : > { %v4390_v16 = vpop.f32.mrf.mxu0 }
 0x391   : > { %v4178_v10 = vpop.f32.mrf.mxu1 }
 0x392   : > { %v4179_v3 = vadd.f32 %v4178_v10, %v8863_v20  ;;  %v4393_v14 = vpop.f32.mrf.mxu0 }
 0x393   : > { %v8951_v28 = vadd.f32 %v4393_v14, %v4169_v8  ;;  %v4180_v57 = vpop.f32.mrf.mxu1 }
 0x394   : > { %v4395_v40 = vpop.f32.mrf.mxu0 }
 0x395   : > { %v4183_v2 = vpop.f32.mrf.mxu1 }
 0x396   : > { %v4184_v31 = vadd.f32 %v4183_v2, %v8867_v49  ;;  %v4398_v56 = vpop.f32.mrf.mxu0 }
 0x397   : > { %v8954_v54 = vadd.f32 %v4398_v56, %v4174_v34  ;;  %v4185_v35 = vpop.f32.mrf.mxu1 }
 0x398   : > { %v4400_v22 = vpop.f32.mrf.mxu0 }
 0x399   : > { %v4188_v23 = vpop.f32.mrf.mxu1 }
 0x39a   : > { %v4189_v32 = vadd.f32 %v4188_v23, %v8871_v52  ;;  %v4403_v63 = vpop.f32.mrf.mxu0 }
 0x39b   : > { %v8957_v5 = vadd.f32 %v4403_v63, %v4179_v3  ;;  %v4190_v20 = vpop.f32.mrf.mxu1 }
 0x39c   : > { %v4405_v46 = vpop.f32.mrf.mxu0 }
 0x39d   : > { %v4193_v0 = vpop.f32.mrf.mxu1 }
 0x39e   : > { %v4194_v12 = vadd.f32 %v4193_v0, %v8877_v30  ;;  %v4408_v9 = vpop.f32.mrf.mxu0 }
 0x39f   : > { %v8960_v48 = vadd.f32 %v4408_v9, %v4184_v31  ;;  %v4195_v49 = vpop.f32.mrf.mxu1 }
 0x3a0   : > { %v4410_v7 = vpop.f32.mrf.mxu0 }
 0x3a1   : > { %v4198_v25 = vpop.f32.mrf.mxu1 }
 0x3a2   : > { %v4199_v50 = vadd.f32 %v4198_v25, %v8883_v38  ;;  %v4413_v62 = vpop.f32.mrf.mxu0 }
 0x3a3   : > { %v8963_v8 = vadd.f32 %v4413_v62, %v4189_v32  ;;  %v4200_v52 = vpop.f32.mrf.mxu1 }
 0x3a4   : > { %v4415_v15 = vpop.f32.mrf.mxu0 }
 0x3a5   : > { %v4203_v37 = vpop.f32.mrf.mxu1 }
 0x3a6   : > { %v4204_v26 = vadd.f32 %v4203_v37, %v8886_v47  ;;  %v4418_v58 = vpop.f32.mrf.mxu0 }
 0x3a7   : > { %v8966_v34 = vadd.f32 %v4418_v58, %v4194_v12  ;;  %v4205_v30 = vpop.f32.mrf.mxu1 }
 0x3a8   : > { %v4420_v27 = vpop.f32.mrf.mxu0 }
 0x3a9   : > { %v4208_v1 = vpop.f32.mrf.mxu1 }
 0x3aa   : > { %v4209_v16 = vadd.f32 %v4208_v1, %v8888_v13  ;;  %v4423_v10 = vpop.f32.mrf.mxu0 }
 0x3ab   : > { %v8969_v3 = vadd.f32 %v4423_v10, %v4199_v50  ;;  %v4210_v38 = vpop.f32.mrf.mxu1 }
 0x3ac   : > { %v4425_v14 = vpop.f32.mrf.mxu0 }
 0x3ad   : > { %v4213_v57 = vpop.f32.mrf.mxu1 }
 0x3ae   : > { %v4214_v40 = vadd.f32 %v4213_v57, %v8890_v18  ;;  %v4428_v2 = vpop.f32.mrf.mxu0 }
 0x3af   : > { %v8972_v31 = vadd.f32 %v4428_v2, %v4204_v26  ;;  %v4215_v47 = vpop.f32.mrf.mxu1 }
 0x3b0   : > { %v4430_v56 = vpop.f32.mrf.mxu0 }
 0x3b1   : > { %v4218_v35 = vpop.f32.mrf.mxu1 }
 0x3b2   : > { %v4219_v22 = vadd.f32 %v4218_v35, %v8892_v53  ;;  %v4433_v23 = vpop.f32.mrf.mxu0 }
 0x3b3   : > { %v8975_v32 = vadd.f32 %v4433_v23, %v4209_v16  ;;  %v4220_v13 = vpop.f32.mrf.mxu1 }
 0x3b4   : > { %v4435_v63 = vpop.f32.mrf.mxu0 }
 0x3b5   : > { %v4223_v20 = vpop.f32.mrf.mxu1 }
 0x3b6   : > { %v4224_v46 = vadd.f32 %v4223_v20, %v8894_v43  ;;  %v4438_v0 = vpop.f32.mrf.mxu0 }
 0x3b7   : > { %v8978_v12 = vadd.f32 %v4438_v0, %v4214_v40  ;;  %v4225_v18 = vpop.f32.mrf.mxu1 }
 0x3b8   : > { %v4440_v9 = vpop.f32.mrf.mxu0 }
 0x3b9   : > { %v4228_v49 = vpop.f32.mrf.mxu1 }
 0x3ba   : > { %v4229_v7 = vadd.f32 %v4228_v49, %v8896_v39  ;;  %v4443_v25 = vpop.f32.mrf.mxu0 }
 0x3bb   : > { %v8981_v50 = vadd.f32 %v4443_v25, %v4219_v22  ;;  %v4230_v53 = vpop.f32.mrf.mxu1 }
 0x3bc   : > { %v4445_v62 = vpop.f32.mrf.mxu0 }
 0x3bd   : > { %v4233_v52 = vpop.f32.mrf.mxu1 }
 0x3be   : > { %v4234_v15 = vadd.f32 %v4233_v52, %v8898_v11  ;;  %v4448_v37 = vpop.f32.mrf.mxu0 }
 0x3bf   : > { %v8984_v26 = vadd.f32 %v4448_v37, %v4224_v46  ;;  %v4235_v43 = vpop.f32.mrf.mxu1 }
 0x3c0   : > { %v4450_v58 = vpop.f32.mrf.mxu0 }
 0x3c1   : > { %v4238_v30 = vpop.f32.mrf.mxu1 }
 0x3c2   : > { %v4239_v27 = vadd.f32 %v4238_v30, %v8900_v19  ;;  %v4453_v1 = vpop.f32.mrf.mxu0 }
 0x3c3   : > { %v8987_v16 = vadd.f32 %v4453_v1, %v4229_v7  ;;  %v4240_v39 = vpop.f32.mrf.mxu1 }
 0x3c4   : > { %v4455_v10 = vpop.f32.mrf.mxu0 }
 0x3c5   : > { %v4243_v38 = vpop.f32.mrf.mxu1 }
 0x3c6   : > { %v4244_v14 = vadd.f32 %v4243_v38, %v8902_v51  ;;  %v4458_v57 = vpop.f32.mrf.mxu0 }
 0x3c7   : > { %v8990_v40 = vadd.f32 %v4458_v57, %v4234_v15  ;;  %v4245_v11 = vpop.f32.mrf.mxu1 }
 0x3c8   : > { %v4460_v2 = vpop.f32.mrf.mxu0 }
 0x3c9   : > { %v4248_v47 = vpop.f32.mrf.mxu1 }
 0x3ca   : > { %v4249_v56 = vadd.f32 %v4248_v47, %v8904_v29  ;;  %v4463_v35 = vpop.f32.mrf.mxu0 }
 0x3cb   : > { %v8993_v22 = vadd.f32 %v4463_v35, %v4239_v27  ;;  %v4250_v19 = vpop.f32.mrf.mxu1 }
 0x3cc   : > { %v4465_v23 = vpop.f32.mrf.mxu0 }
 0x3cd   : > { %v4253_v13 = vpop.f32.mrf.mxu1 }
 0x3ce   : > { %v4254_v63 = vadd.f32 %v4253_v13, %v8906_v17  ;;  %v4468_v20 = vpop.f32.mrf.mxu0 }
 0x3cf   : > { %v8996_v46 = vadd.f32 %v4468_v20, %v4244_v14  ;;  %v4255_v51 = vpop.f32.mrf.mxu1 }
 0x3d0   : > { %v4470_v0 = vpop.f32.mrf.mxu0 }
 0x3d1   : > { %v4258_v18 = vpop.f32.mrf.mxu1 }
 0x3d2   : > { %v4259_v9 = vadd.f32 %v4258_v18, %v8908_v24  ;;  %v4473_v49 = vpop.f32.mrf.mxu0 }
 0x3d3   : > { %v8999_v7 = vadd.f32 %v4473_v49, %v4249_v56  ;;  %v4260_v29 = vpop.f32.mrf.mxu1 }
 0x3d4   : > { %v4475_v25 = vpop.f32.mrf.mxu0 }
 0x3d5   : > { %v4263_v53 = vpop.f32.mrf.mxu1 }
 0x3d6   : > { %v4264_v62 = vadd.f32 %v4263_v53, %v8910_v55  ;;  %v4478_v52 = vpop.f32.mrf.mxu0 }
 0x3d7   : > { %v9002_v15 = vadd.f32 %v4478_v52, %v4254_v63  ;;  %v4265_v17 = vpop.f32.mrf.mxu1 }
 0x3d8   : > { %v4480_v37 = vpop.f32.mrf.mxu0 }
 0x3d9   : > { %v4268_v43 = vpop.f32.mrf.mxu1  ;;  %v9025_v37 = vld [vmem:[%s9390_s5] ss:$0 sm:$0xff] }
 0x3da   : > { %v4269_v58 = vadd.f32 %v4268_v43, %v8913_v36  ;;  %v4483_v30 = vpop.f32.mrf.mxu0 }
 0x3db   : > { %v9005_v27 = vadd.f32 %v4483_v30, %v4259_v9  ;;  %v4270_v24 = vpop.f32.mrf.mxu1 }
 0x3dc   : > { %v4485_v1 = vpop.f32.mrf.mxu0  ;;  %v6721_v24 = vmov 1983009808  }
 0x3dd   : > { %v4273_v39 = vpop.f32.mrf.mxu1  ;;  %v4891_v1 = vunpack.c.l.s4 %v6721_v24 }
 0x3de   : > { %v4274_v10 = vadd.f32 %v4273_v39, %v8917_v60  ;;  %v4488_v38 = vpop.f32.mrf.mxu0 }
 0x3df   : > { %v9008_v14 = vadd.f32 %v4488_v38, %v4264_v62  ;;  %v4275_v55 = vpop.f32.mrf.mxu1 }
 0x3e0   : > { %v4490_v57 = vpop.f32.mrf.mxu0 }
 0x3e1   : > { %v4278_v11 = vpop.f32.mrf.mxu1 }
 0x3e2   : > { %v4279_v2 = vadd.f32 %v4278_v11, %v8920_v44  ;;  %v4493_v47 = vpop.f32.mrf.mxu0 }
 0x3e3   : > { %v9011_v56 = vadd.f32 %v4493_v47, %v4269_v58  ;;  %v4280_v36 = vpop.f32.mrf.mxu1 }
 0x3e4   : > { %v4495_v35 = vpop.f32.mrf.mxu0 }
 0x3e5   : > { %v4283_v19 = vpop.f32.mrf.mxu1  ;;  %v4892_v35 = vunpack.c.0.s8 %v4891_v1 }
 0x3e6   : > { %v4284_v23 = vadd.f32 %v4283_v19, %v8922_v21  ;;  %v4498_v13 = vpop.f32.mrf.mxu0 }
 0x3e7   : > { %v9014_v63 = vadd.f32 %v4498_v13, %v4274_v10  ;;  %v4285_v60 = vpop.f32.mrf.mxu1  ;;  %v9034_v10 = vld [vmem:[%s9391_s6] ss:$0 sm:$0xff] }
 0x3e8   : > { %v4500_v20 = vpop.f32.mrf.mxu0 }
 0x3e9   : > { %v4288_v51 = vpop.f32.mrf.mxu1 }
 0x3ea   : > { %v4289_v0 = vadd.f32 %v4288_v51, %v8926_v59  ;;  %v4503_v18 = vpop.f32.mrf.mxu0 }
 0x3eb   : > { %v9017_v9 = vadd.f32 %v4503_v18, %v4279_v2  ;;  %v4290_v44 = vpop.f32.mrf.mxu1 }
 0x3ec   : > { %v4505_v49 = vpop.f32.mrf.mxu0 }
 0x3ed   : > { %v4293_v29 = vpop.f32.mrf.mxu1 }
 0x3ee   : > { %v4294_v25 = vadd.f32 %v4293_v29, %v8930_v42  ;;  %v4508_v53 = vpop.f32.mrf.mxu0  ;;  %v4893_v42 = vlaneseq }
 0x3ef   : > { %v9020_v62 = vadd.f32 %v4508_v53, %v4284_v23  ;;  %v4295_v21 = vpop.f32.mrf.mxu1 }
 0x3f0   : > { %v4510_v52 = vpop.f32.mrf.mxu0  ;;  %v4894_v19 = vshrl.u32 %v4893_v42, 7 }
 0x3f1   : > { %v6516_v17 = vpop.f32.mrf.mxu1 }
 0x3f2   : > { %v4513_v59 = vpop.f32.mrf.mxu0  ;;  %v4594_v43 = vadd.f32 %v6516_v17, %v8936_v33  ;;  %v9048_v49 = vsub.s32 %v4892_v35, %v4894_v19 }
 0x3f3   : > { %v9028_v58 = vadd.f32 %v4513_v59, %v4289_v0  ;;  %v4588_v30 = vpop.f32.mrf.mxu1 }
 0x3f4   : > { %v4755_v39 = vmul.f32 %v9025_v37, %v4594_v43  ;;  %v4515_v38 = vpop.f32.mrf.mxu0  ;;  %v4589_v55 = vadd.f32 %v4588_v30, %v8933_v61 }
 0x3f5   : > { %v6519_v57 = vpop.f32.mrf.mxu1 }
 0x3f6   : > { %v4754_v11 = vmul.f32 %v9025_v37, %v4589_v55  ;;  %v4518_v33 = vpop.f32.mrf.mxu0  ;;  %v4604_v2 = vadd.f32 %v6519_v57, %v8942_v6  ;;  %v4794_v47 = vadd.f32 %v9034_v10, %v4755_v39  ;;  %v9057_v55 = vsub.s32 0, %v4894_v19 }
 0x3f7   : > { %v9040_v36 = vadd.f32 %v4518_v33, %v4294_v25  ;;  %v4598_v23 = vpop.f32.mrf.mxu1 }
 0x3f8   : > { %v4757_v13 = vmul.f32 %v9025_v37, %v4604_v2  ;;  %v4599_v60 = vadd.f32 %v4598_v23, %v8939_v41  ;;  %v4520_v20 = vpop.f32.mrf.mxu0  ;;  %v4793_v61 = vadd.f32 %v9034_v10, %v4754_v11  ;;  %v4826_v44 = vmax.f32 %v4794_v47, 0.0 }
 0x3f9   : > { %v6522_v51 = vpop.f32.mrf.mxu1 }
 0x3fa   : > { %v4796_v0 = vadd.f32 %v9034_v10, %v4757_v13  ;;  %v4756_v18 = vmul.f32 %v9025_v37, %v4599_v60  ;;  %v4614_v6 = vadd.f32 %v6522_v51, %v8948_v45  ;;  %v4825_v52 = vmax.f32 %v4793_v61, 0.0 }
 0x3fb   : > { %v4608_v29 = vpop.f32.mrf.mxu1 }
 0x3fc   : > { %v4828_v25 = vmax.f32 %v4796_v0, 0.0  ;;  %v4795_v53 = vadd.f32 %v9034_v10, %v4756_v18  ;;  %v4759_v21 = vmul.f32 %v9025_v37, %v4614_v6  ;;  %v4609_v41 = vadd.f32 %v4608_v29, %v8945_v4 }
 0x3fd   : > { %v6525_v17 = vpop.f32.mrf.mxu1 }
 0x3fe   : > { %v4858_v59 = vadd.f32 %v4828_v25, %v4826_v44  ;;  %v4827_v43 = vmax.f32 %v4795_v53, 0.0  ;;  %v4798_v30 = vadd.f32 %v9034_v10, %v4759_v21  ;;  %v4758_v24 = vmul.f32 %v9025_v37, %v4609_v41 }
 0x3ff   : > { %v4624_v45 = vadd.f32 %v6525_v17, %v8954_v54  ;;  %v4618_v1 = vpop.f32.mrf.mxu1 }
 0x400   : > { %v4906_v42 = vcombine.high %v4858_v59, %v4858_v59  ;;  %v4913_v39 = vrot.slane %v4858_v59, %v9048_v49  ;;  %v4857_v38 = vadd.f32 %v4827_v43, %v4825_v52  ;;  %v4830_v57 = vmax.f32 %v4798_v30, 0.0 }
 0x401   : > { %v9060_v4 = vadd.f32 %v9034_v10, %v4758_v24  ;;  %v4761_v11 = vmul.f32 %v9025_v37, %v4624_v45  ;;  %v6528_v33 = vpop.f32.mrf.mxu1  ;;  %v4619_v19 = vadd.f32 %v4618_v1, %v8951_v28 }
 0x402   : > { %v4920_v2 = vrot.slane %v4906_v42, %v9048_v49  ;;  %v4921_v47 = vcombine.high %v4913_v39, %v4913_v39  ;;  %v6240_v35 = vrot.slane %v4913_v39, 9  ;;  %v4889_v23 = vcombine.high %v4857_v38, %v4857_v38 }
 0x403   : > { %v4896_v54 = vrot.slane %v4857_v38, %v9048_v49  ;;  %v4829_v13 = vmax.f32 %v9060_v4, 0.0  ;;  %v4800_v60 = vadd.f32 %v9034_v10, %v4761_v11  ;;  %v4628_v25 = vpop.f32.mrf.mxu1  ;;  %v4760_v1 = vmul.f32 %v9025_v37, %v4619_v19 }
 0x404   : > { %v4922_v20 = vcombine.high %v4920_v2, %v4920_v2  ;;  %v6241_v61 = vrot.slane %v4921_v47, 9  ;;  %v6242_v51 = vrot.slane %v4920_v2, 9  ;;  %v5421_v0 = vadd.f32 %v6240_v35, %v4913_v39 }
 0x405   : > { %v4903_v18 = vrot.slane %v4889_v23, %v9048_v49  ;;  %v4904_v6 = vcombine.high %v4896_v54, %v4896_v54  ;;  %v6236_v44 = vrot.slane %v4896_v54, 9  ;;  %v4832_v29 = vmax.f32 %v4800_v60, 0.0 }
 0x406   : > { %v6243_v53 = vrot.slane %v4922_v20, 9  ;;  %v5422_v21 = vadd.f32 %v6241_v61, %v4921_v47  ;;  %v5423_v41 = vadd.f32 %v6242_v51, %v4920_v2  ;;  %v5485_v52 = vmul.f32 0.25, %v5421_v0  ;;  %v9070_v2 = vpop.f32.mrf.mxu1 }
 0x407   : > { %v4905_v17 = vcombine.high %v4903_v18, %v4903_v18  ;;  %v6237_v59 = vrot.slane %v4904_v6, 9  ;;  %v6238_v28 = vrot.slane %v4903_v18, 9  ;;  %v5417_v43 = vadd.f32 %v6236_v44, %v4896_v54 }
 0x408   : > { %v5424_v30 = vadd.f32 %v6243_v53, %v4922_v20  ;;  %v5486_v24 = vmul.f32 0.25, %v5422_v21  ;;  %v5487_v45 = vmul.f32 0.25, %v5423_v41  ;;  %v5628_v35 = vrot.slane %v5485_v52, %v9057_v55 }
 0x409   : > { %v6239_v42 = vrot.slane %v4905_v17, 9  ;;  %v5418_v39 = vadd.f32 %v6237_v59, %v4904_v6  ;;  %v5419_v38 = vadd.f32 %v6238_v28, %v4903_v18  ;;  %v5481_v11 = vmul.f32 0.25, %v5417_v43 }
 0x40a   : > { %v5488_v47 = vmul.f32 0.25, %v5424_v30  ;;  %v5632_v23 = vrot.slane %v5486_v24, %v9057_v55  ;;  %v4860_v54 = vadd.f32 %v4832_v29, %v4830_v57  ;;  %v5636_v60 = vrot.slane %v5487_v45, %v9057_v55  ;;  %v4638_v29 = vpop.f32.mrf.mxu1 }
 0x40b   : > { %v5420_v20 = vadd.f32 %v6239_v42, %v4905_v17  ;;  %v5482_v61 = vmul.f32 0.25, %v5418_v39  ;;  %v5483_v19 = vmul.f32 0.25, %v5419_v38  ;;  %v5612_v51 = vrot.slane %v5481_v11, %v9057_v55 }
 0x40c   : > { %v4940_v0 = vcombine.high %v4860_v54, %v4860_v54  ;;  %v4947_v18 = vrot.slane %v4860_v54, %v9048_v49  ;;  %v4799_v6 = vadd.f32 %v9034_v10, %v4760_v1  ;;  %v4634_v57 = vadd.f32 %v6528_v33, %v8960_v48 }
 0x40d   : > { %v5484_v44 = vmul.f32 0.25, %v5420_v20  ;;  %v5616_v53 = vrot.slane %v5482_v61, %v9057_v55  ;;  %v5620_v21 = vrot.slane %v5483_v19, %v9057_v55  ;;  %v5640_v28 = vrot.slane %v5488_v47, %v9057_v55  ;;  %v6534_v47 = vpop.f32.mrf.mxu1 }
 0x40e   : > { %v4954_v41 = vrot.slane %v4940_v0, %v9048_v49  ;;  %v4955_v52 = vcombine.high %v4947_v18, %v4947_v18  ;;  %v6248_v17 = vrot.slane %v4947_v18, 9  ;;  %v4831_v59 = vmax.f32 %v4799_v6, 0.0 }
 0x40f   : > { %v5624_v43 = vrot.slane %v5484_v44, %v9057_v55  ;;  %v5866_v30 = vsel %vm5865_vm0, %v5616_v53, %v5612_v51  ;;  %v4763_v24 = vmul.f32 %v9025_v37, %v4634_v57  ;;  %v4629_v11 = vadd.f32 %v4628_v25, %v8957_v5 }
 0x410   : > { %v5868_v45 = vsel %vm5867_vm1, %v5620_v21, %v5866_v30  ;;  %v4956_v1 = vcombine.high %v4954_v41, %v4954_v41  ;;  %v6249_v48 = vrot.slane %v4955_v52, 9  ;;  %v6250_v33 = vrot.slane %v4954_v41, 9  ;;  %v4648_v21 = vpop.f32.mrf.mxu1 }
 0x411   : > { %v5870_v42 = vsel %vm5869_vm2, %v5624_v43, %v5868_v45  ;;  %v5429_v39 = vadd.f32 %v6248_v17, %v4947_v18  ;;  %v4859_v38 = vadd.f32 %v4831_v59, %v4829_v13  ;;  %v4762_v45 = vmul.f32 %v9025_v37, %v4629_v11 }
 0x412   : > { %v5872_v54 = vsel %vm5871_vm3, %v5628_v35, %v5870_v42  ;;  %v6251_v20 = vrot.slane %v4956_v1, 9  ;;  %v5430_v61 = vadd.f32 %v6249_v48, %v4955_v52  ;;  %v5431_v19 = vadd.f32 %v6250_v33, %v4954_v41 }
 0x413   : > { %v5874_v51 = vsel %vm5873_vm4, %v5632_v23, %v5872_v54  ;;  %v9096_v0 = vmul.f32 0.25, %v5429_v39  ;;  %v4923_v6 = vcombine.high %v4859_v38, %v4859_v38  ;;  %v4930_v44 = vrot.slane %v4859_v38, %v9048_v49  ;;  %v6537_v39 = vpop.f32.mrf.mxu1 }
 0x414   : > { %v5876_v18 = vsel %vm5875_vm5, %v5636_v60, %v5874_v51  ;;  %v5432_v53 = vadd.f32 %v6251_v20, %v4956_v1  ;;  %v9100_v4 = vmul.f32 0.25, %v5430_v61  ;;  %v9102_v13 = vmul.f32 0.25, %v5431_v19 }
 0x415   : > { %v5878_v5 = vsel %vm5877_vm6, %v5640_v28, %v5876_v18  ;;  %v4937_v25 = vrot.slane %v4923_v6, %v9048_v49  ;;  %v4938_v35 = vcombine.high %v4930_v44, %v4930_v44  ;;  %v5660_v60 = vrot.slane %v9096_v0, %v9057_v55 }
 0x416   : > { %5936 = vst [vmem:[%s9106_s14] sm:$0xff] %v5878_v5  ;;  %v9109_v23 = vmul.f32 0.25, %v5432_v53  ;;  %v6244_v57 = vrot.slane %v4930_v44, 9  ;;  %v4802_v41 = vadd.f32 %v9034_v10, %v4763_v24  ;;  %v5664_v52 = vrot.slane %v9100_v4, %v9057_v55 }
 0x417   : > { %v4939_v17 = vcombine.high %v4937_v25, %v4937_v25  ;;  %v6245_v59 = vrot.slane %v4938_v35, 9  ;;  %v6246_v28 = vrot.slane %v4937_v25, 9  ;;  %v5668_v43 = vrot.slane %v9102_v13, %v9057_v55 }
 0x418   : > { %v5425_v30 = vadd.f32 %v6244_v57, %v4930_v44  ;;  %v4644_v1 = vadd.f32 %v9070_v2, %v8966_v34  ;;  %v4639_v24 = vadd.f32 %v4638_v29, %v8963_v8  ;;  %v4801_v54 = vadd.f32 %v9034_v10, %v4762_v45 }
 0x419   : > { %v6247_v48 = vrot.slane %v4939_v17, 9  ;;  %v5426_v33 = vadd.f32 %v6245_v59, %v4938_v35  ;;  %v5427_v42 = vadd.f32 %v6246_v28, %v4937_v25  ;;  %v4654_v61 = vadd.f32 %v6534_v47, %v8972_v31  ;;  %v4658_v31 = vpop.f32.mrf.mxu1 }
 0x41a   : > { %v5489_v38 = vmul.f32 0.25, %v5425_v30  ;;  %v4765_v20 = vmul.f32 %v9025_v37, %v4644_v1  ;;  %v4764_v11 = vmul.f32 %v9025_v37, %v4639_v24  ;;  %v4834_v2 = vmax.f32 %v4802_v41, 0.0 }
 0x41b   : > { %v5428_v19 = vadd.f32 %v6247_v48, %v4939_v17  ;;  %v5490_v51 = vmul.f32 0.25, %v5426_v33  ;;  %v5491_v0 = vmul.f32 0.25, %v5427_v42  ;;  %v4767_v8 = vmul.f32 %v9025_v37, %v4654_v61 }
 0x41c   : > { %v5644_v34 = vrot.slane %v5489_v38, %v9057_v55  ;;  %v4804_v6 = vadd.f32 %v9034_v10, %v4765_v20  ;;  %v4803_v53 = vadd.f32 %v9034_v10, %v4764_v11  ;;  %v4649_v13 = vadd.f32 %v4648_v21, %v8969_v3 }
 0x41d   : > { %v5492_v29 = vmul.f32 0.25, %v5428_v19  ;;  %v5648_v44 = vrot.slane %v5490_v51, %v9057_v55  ;;  %v5652_v18 = vrot.slane %v5491_v0, %v9057_v55  ;;  %v9133_v4 = vadd.f32 %v9034_v10, %v4767_v8 }
 0x41e   : > { %v4836_v47 = vmax.f32 %v4804_v6, 0.0  ;;  %v4664_v5 = vadd.f32 %v6537_v39, %v8978_v12  ;;  %v4833_v57 = vmax.f32 %v4801_v54, 0.0  ;;  %v4835_v41 = vmax.f32 %v4803_v53, 0.0 }
 0x41f   : > { %v5656_v25 = vrot.slane %v5492_v29, %v9057_v55  ;;  %v5879_v35 = vsel %vm5865_vm0, %v5648_v44, %v5644_v34  ;;  %v5672_v17 = vrot.slane %v9109_v23, %v9057_v55  ;;  %v4659_v30 = vadd.f32 %v4658_v31, %v8975_v32 }
 0x420   : > { %v5880_v59 = vsel %vm5867_vm1, %v5652_v18, %v5879_v35  ;;  %v4862_v28 = vadd.f32 %v4836_v47, %v4834_v2  ;;  %v4861_v1 = vadd.f32 %v4835_v41, %v4833_v57  ;;  %v4838_v3 = vmax.f32 %v9133_v4, 0.0 }
 0x421   : > { %v5881_v45 = vsel %vm5869_vm2, %v5656_v25, %v5880_v59  ;;  %v4769_v12 = vmul.f32 %v9025_v37, %v4664_v5  ;;  %v4766_v23 = vmul.f32 %v9025_v37, %v4649_v13  ;;  %v4768_v59 = vmul.f32 %v9025_v37, %v4659_v30 }
 0x422   : > { %v5882_v21 = vsel %vm5871_vm3, %v5660_v60, %v5881_v45  ;;  %v4974_v48 = vcombine.high %v4862_v28, %v4862_v28  ;;  %v4981_v33 = vrot.slane %v4862_v28, %v9048_v49  ;;  %v4957_v24 = vcombine.high %v4861_v1, %v4861_v1  ;;  %v6540_v60 = vpop.f32.mrf.mxu1 }
 0x423   : > { %v5883_v42 = vsel %vm5873_vm4, %v5664_v52, %v5882_v21  ;;  %v4964_v32 = vrot.slane %v4861_v1, %v9048_v49  ;;  %v4808_v39 = vadd.f32 %v9034_v10, %v4769_v12  ;;  %v4805_v12 = vadd.f32 %v9034_v10, %v4766_v23 }
 0x424   : > { %v5884_v38 = vsel %vm5875_vm5, %v5668_v43, %v5883_v42  ;;  %v4988_v54 = vrot.slane %v4974_v48, %v9048_v49  ;;  %v4989_v20 = vcombine.high %v4981_v33, %v4981_v33  ;;  %v6256_v61 = vrot.slane %v4981_v33, 9  ;;  %v4668_v4 = vpop.f32.mrf.mxu1 }
 0x425   : > { %v5885_v19 = vsel %vm5877_vm6, %v5672_v17, %v5884_v38  ;;  %v4971_v51 = vrot.slane %v4957_v24, %v9048_v49  ;;  %v4972_v0 = vcombine.high %v4964_v32, %v4964_v32  ;;  %v6252_v11 = vrot.slane %v4964_v32, 9 }
 0x426   : > { %5937 = vst [vmem:[%s9106_s14 + $0x8] sm:$0xff] %v5885_v19  ;;  %v4990_v52 = vcombine.high %v4988_v54, %v4988_v54  ;;  %v6257_v34 = vrot.slane %v4989_v20, 9  ;;  %v6258_v2 = vrot.slane %v4988_v54, 9  ;;  %v5437_v6 = vadd.f32 %v6256_v61, %v4981_v33  ;;  %v6543_v24 = vpop.f32.mrf.mxu1 }
 0x427   : > { %v4973_v8 = vcombine.high %v4971_v51, %v4971_v51  ;;  %v6253_v29 = vrot.slane %v4972_v0, 9  ;;  %v6254_v44 = vrot.slane %v4971_v51, 9  ;;  %v5433_v43 = vadd.f32 %v6252_v11, %v4964_v32 }
 0x428   : > { %v6259_v18 = vrot.slane %v4990_v52, 9  ;;  %v5438_v53 = vadd.f32 %v6257_v34, %v4989_v20  ;;  %v5439_v31 = vadd.f32 %v6258_v2, %v4988_v54  ;;  %v5501_v47 = vmul.f32 0.25, %v5437_v6 }
 0x429   : > { %v6255_v13 = vrot.slane %v4973_v8, 9  ;;  %v5434_v5 = vadd.f32 %v6253_v29, %v4972_v0  ;;  %v5435_v25 = vadd.f32 %v6254_v44, %v4971_v51  ;;  %v5497_v35 = vmul.f32 0.25, %v5433_v43 }
 0x42a   : > { %v5440_v57 = vadd.f32 %v6259_v18, %v4990_v52  ;;  %v5502_v41 = vmul.f32 0.25, %v5438_v53  ;;  %v5503_v17 = vmul.f32 0.25, %v5439_v31  ;;  %v5692_v48 = vrot.slane %v5501_v47, %v9057_v55 }
 0x42b   : > { %v5436_v28 = vadd.f32 %v6255_v13, %v4973_v8  ;;  %v5498_v45 = vmul.f32 0.25, %v5434_v5  ;;  %v5499_v1 = vmul.f32 0.25, %v5435_v25  ;;  %v5676_v42 = vrot.slane %v5497_v35, %v9057_v55  ;;  %v4678_v8 = vpop.f32.mrf.mxu1 }
 0x42c   : > { %v5504_v21 = vmul.f32 0.25, %v5440_v57  ;;  %v5696_v33 = vrot.slane %v5502_v41, %v9057_v55  ;;  %v4840_v20 = vmax.f32 %v4808_v39, 0.0  ;;  %v5700_v30 = vrot.slane %v5503_v17, %v9057_v55 }
 0x42d   : > { %v5500_v32 = vmul.f32 0.25, %v5436_v28  ;;  %v5680_v38 = vrot.slane %v5498_v45, %v9057_v55  ;;  %v5684_v54 = vrot.slane %v5499_v1, %v9057_v55  ;;  %v4807_v61 = vadd.f32 %v9034_v10, %v4768_v59  ;;  %v6546_v57 = vpop.f32.mrf.mxu1 }
 0x42e   : > { %v4674_v23 = vadd.f32 %v6540_v60, %v8984_v26  ;;  %v4669_v19 = vadd.f32 %v4668_v4, %v8981_v50  ;;  %v4837_v11 = vmax.f32 %v4805_v12, 0.0  ;;  %v4864_v52 = vadd.f32 %v4840_v20, %v4838_v3 }
 0x42f   : > { %v5688_v51 = vrot.slane %v5500_v32, %v9057_v55  ;;  %v5886_v0 = vsel %vm5865_vm0, %v5680_v38, %v5676_v42  ;;  %v4839_v2 = vmax.f32 %v4807_v61, 0.0  ;;  %v5704_v29 = vrot.slane %v5504_v21, %v9057_v55  ;;  %v4688_v20 = vpop.f32.mrf.mxu1 }
 0x430   : > { %v5887_v34 = vsel %vm5867_vm1, %v5684_v54, %v5886_v0  ;;  %v4771_v6 = vmul.f32 %v9025_v37, %v4674_v23  ;;  %v4770_v39 = vmul.f32 %v9025_v37, %v4669_v19  ;;  %v5008_v60 = vcombine.high %v4864_v52, %v4864_v52 }
 0x431   : > { %v5888_v26 = vsel %vm5869_vm2, %v5688_v51, %v5887_v34  ;;  %v5015_v50 = vrot.slane %v4864_v52, %v9048_v49  ;;  %v4863_v43 = vadd.f32 %v4839_v2, %v4837_v11  ;;  %v4684_v18 = vadd.f32 %v6543_v24, %v8990_v40 }
 0x432   : > { %v5889_v44 = vsel %vm5871_vm3, %v5692_v48, %v5888_v26  ;;  %v4810_v3 = vadd.f32 %v9034_v10, %v4771_v6  ;;  %v5022_v31 = vrot.slane %v5008_v60, %v9048_v49  ;;  %v9184_v35 = vadd.f32 %v9034_v10, %v4770_v39 }
 0x433   : > { %v5890_v53 = vsel %vm5873_vm4, %v5696_v33, %v5889_v44  ;;  %v5023_v47 = vcombine.high %v5015_v50, %v5015_v50  ;;  %v6264_v4 = vrot.slane %v5015_v50, 9  ;;  %v4991_v5 = vcombine.high %v4863_v43, %v4863_v43 }
 0x434   : > { %v5891_v13 = vsel %vm5875_vm5, %v5700_v30, %v5890_v53  ;;  %v4998_v25 = vrot.slane %v4863_v43, %v9048_v49  ;;  %v5024_v17 = vcombine.high %v5022_v31, %v5022_v31  ;;  %v6266_v40 = vrot.slane %v5022_v31, 9 }
 0x435   : > { %v5892_v41 = vsel %vm5877_vm6, %v5704_v29, %v5891_v13  ;;  %v6265_v59 = vrot.slane %v5023_v47, 9  ;;  %v5445_v28 = vadd.f32 %v6264_v4, %v5015_v50  ;;  %v5005_v45 = vrot.slane %v4991_v5, %v9048_v49  ;;  %v6549_v50 = vpop.f32.mrf.mxu1 }
 0x436   : > { %5938 = vst [vmem:[%s9106_s14 + $0x10] sm:$0xff] %v5892_v41  ;;  %v5006_v1 = vcombine.high %v4998_v25, %v4998_v25  ;;  %v6260_v12 = vrot.slane %v4998_v25, 9  ;;  %v6267_v21 = vrot.slane %v5024_v17, 9  ;;  %v5447_v33 = vadd.f32 %v6266_v40, %v5022_v31 }
 0x437   : > { %v5446_v48 = vadd.f32 %v6265_v59, %v5023_v47  ;;  %v4773_v42 = vmul.f32 %v9025_v37, %v4684_v18  ;;  %v5509_v24 = vmul.f32 0.25, %v5445_v28  ;;  %v5007_v32 = vcombine.high %v5005_v45, %v5005_v45 }
 0x438   : > { %v6261_v38 = vrot.slane %v5006_v1, 9  ;;  %v6262_v54 = vrot.slane %v5005_v45, 9  ;;  %v5448_v30 = vadd.f32 %v6267_v21, %v5024_v17  ;;  %v5441_v61 = vadd.f32 %v6260_v12, %v4998_v25 }
 0x439   : > { %v4842_v23 = vmax.f32 %v4810_v3, 0.0  ;;  %v6263_v19 = vrot.slane %v5007_v32, 9  ;;  %v4841_v11 = vmax.f32 %v9184_v35, 0.0  ;;  %v5510_v52 = vmul.f32 0.25, %v5446_v48 }
 0x43a   : > { %v5442_v51 = vadd.f32 %v6261_v38, %v5006_v1  ;;  %v5443_v0 = vadd.f32 %v6262_v54, %v5005_v45  ;;  %v5511_v34 = vmul.f32 0.25, %v5447_v33  ;;  %v5724_v2 = vrot.slane %v5509_v24, %v9057_v55  ;;  %v4698_v1 = vpop.f32.mrf.mxu1 }
 0x43b   : > { %v5505_v6 = vmul.f32 0.25, %v5441_v61  ;;  %v5444_v39 = vadd.f32 %v6263_v19, %v5007_v32  ;;  %v4812_v60 = vadd.f32 %v9034_v10, %v4773_v42  ;;  %v5512_v44 = vmul.f32 0.25, %v5448_v30 }
 0x43c   : > { %v5506_v29 = vmul.f32 0.25, %v5442_v51  ;;  %v5507_v26 = vmul.f32 0.25, %v5443_v0  ;;  %v4679_v3 = vadd.f32 %v4678_v8, %v8987_v16  ;;  %v4694_v18 = vadd.f32 %v6546_v57, %v8996_v46 }
 0x43d   : > { %v5708_v43 = vrot.slane %v5505_v6, %v9057_v55  ;;  %v5508_v53 = vmul.f32 0.25, %v5444_v39  ;;  %v4844_v4 = vmax.f32 %v4812_v60, 0.0  ;;  %v4689_v25 = vadd.f32 %v4688_v20, %v8993_v22  ;;  %v6552_v39 = vpop.f32.mrf.mxu1 }
 0x43e   : > { %v5712_v31 = vrot.slane %v5506_v29, %v9057_v55  ;;  %v5716_v47 = vrot.slane %v5507_v26, %v9057_v55  ;;  %v4772_v13 = vmul.f32 %v9025_v37, %v4679_v3  ;;  %v4775_v5 = vmul.f32 %v9025_v37, %v4694_v18 }
 0x43f   : > { %v4704_v35 = vadd.f32 %v6549_v50, %v9002_v15  ;;  %v5728_v41 = vrot.slane %v5510_v52, %v9057_v55  ;;  %v5720_v16 = vrot.slane %v5508_v53, %v9057_v55  ;;  %v4866_v8 = vadd.f32 %v4844_v4, %v4842_v23 }
 0x440   : > { %v5893_v46 = vsel %vm5865_vm0, %v5712_v31, %v5708_v43  ;;  %v5732_v57 = vrot.slane %v5511_v34, %v9057_v55  ;;  %v5736_v17 = vrot.slane %v5512_v44, %v9057_v55  ;;  %v4811_v40 = vadd.f32 %v9034_v10, %v4772_v13  ;;  %v9226_v13 = vpop.f32.mrf.mxu1 }
 0x441   : > { %v5894_v59 = vsel %vm5867_vm1, %v5716_v47, %v5893_v46  ;;  %v5042_v22 = vcombine.high %v4866_v8, %v4866_v8  ;;  %v5049_v15 = vrot.slane %v4866_v8, %v9048_v49  ;;  %v4777_v45 = vmul.f32 %v9025_v37, %v4704_v35 }
 0x442   : > { %v5895_v28 = vsel %vm5869_vm2, %v5720_v16, %v5894_v59  ;;  %v4843_v21 = vmax.f32 %v4811_v40, 0.0  ;;  %v4814_v48 = vadd.f32 %v9034_v10, %v4775_v5  ;;  %v4774_v33 = vmul.f32 %v9025_v37, %v4689_v25 }
 0x443   : > { %v5896_v12 = vsel %vm5871_vm3, %v5724_v2, %v5895_v28  ;;  %v5056_v24 = vrot.slane %v5042_v22, %v9048_v49  ;;  %v5057_v32 = vcombine.high %v5049_v15, %v5049_v15  ;;  %v6272_v38 = vrot.slane %v5049_v15, 9 }
 0x444   : > { %v5897_v42 = vsel %vm5873_vm4, %v5728_v41, %v5896_v12  ;;  %v4865_v20 = vadd.f32 %v4843_v21, %v4841_v11  ;;  %v4816_v30 = vadd.f32 %v9034_v10, %v4777_v45  ;;  %v4699_v61 = vadd.f32 %v4698_v1, %v8999_v7  ;;  %v6555_v12 = vpop.f32.mrf.mxu1 }
 0x445   : > { %v5898_v54 = vsel %vm5875_vm5, %v5732_v57, %v5897_v42  ;;  %v5058_v19 = vcombine.high %v5056_v24, %v5056_v24  ;;  %v6273_v51 = vrot.slane %v5057_v32, 9  ;;  %v6274_v0 = vrot.slane %v5056_v24, 9 }
 0x446   : > { %v5899_v23 = vsel %vm5877_vm6, %v5736_v17, %v5898_v54  ;;  %v5025_v52 = vcombine.high %v4865_v20, %v4865_v20  ;;  %v5032_v34 = vrot.slane %v4865_v20, %v9048_v49  ;;  %v4813_v2 = vadd.f32 %v9034_v10, %v4774_v33 }
 0x447   : > { %5939 = vst [vmem:[%s9106_s14 + $0x18] sm:$0xff] %v5899_v23  ;;  %v4848_v6 = vmax.f32 %v4816_v30, 0.0  ;;  %v6275_v29 = vrot.slane %v5058_v19, 9  ;;  %v5453_v26 = vadd.f32 %v6272_v38, %v5049_v15  ;;  %v5454_v11 = vadd.f32 %v6273_v51, %v5057_v32 }
 0x448   : > { %v4846_v60 = vmax.f32 %v4814_v48, 0.0  ;;  %v5039_v50 = vrot.slane %v5025_v52, %v9048_v49  ;;  %v5040_v7 = vcombine.high %v5032_v34, %v5032_v34  ;;  %v6268_v44 = vrot.slane %v5032_v34, 9 }
 0x449   : > { %v5455_v43 = vadd.f32 %v6274_v0, %v5056_v24  ;;  %v4776_v18 = vmul.f32 %v9025_v37, %v4699_v61  ;;  %v4845_v4 = vmax.f32 %v4813_v2, 0.0  ;;  %v5456_v5 = vadd.f32 %v6275_v29, %v5058_v19 }
 0x44a   : > { %v4868_v3 = vadd.f32 %v4848_v6, %v4846_v60  ;;  %v5041_v53 = vcombine.high %v5039_v50, %v5039_v50  ;;  %v6269_v31 = vrot.slane %v5040_v7, 9  ;;  %v6270_v47 = vrot.slane %v5039_v50, 9 }
 0x44b   : > { %v5517_v25 = vmul.f32 0.25, %v5453_v26  ;;  %v5518_v35 = vmul.f32 0.25, %v5454_v11  ;;  %v5449_v41 = vadd.f32 %v6268_v44, %v5032_v34  ;;  %v5519_v17 = vmul.f32 0.25, %v5455_v43  ;;  %v4718_v34 = vpop.f32.mrf.mxu1 }
 0x44c   : > { %v6271_v16 = vrot.slane %v5041_v53, 9  ;;  %v5450_v46 = vadd.f32 %v6269_v31, %v5040_v7  ;;  %v5451_v8 = vadd.f32 %v6270_v47, %v5039_v50  ;;  %v5076_v57 = vcombine.high %v4868_v3, %v4868_v3 }
 0x44d   : > { %v5513_v59 = vmul.f32 0.25, %v5449_v41  ;;  %v5083_v40 = vrot.slane %v4868_v3, %v9048_v49  ;;  %v4815_v28 = vadd.f32 %v9034_v10, %v4776_v18  ;;  %v5520_v20 = vmul.f32 0.25, %v5456_v5  ;;  %v6558_v5 = vpop.f32.mrf.mxu1 }
 0x44e   : > { %v5452_v22 = vadd.f32 %v6271_v16, %v5041_v53  ;;  %v5514_v15 = vmul.f32 0.25, %v5450_v46  ;;  %v5515_v45 = vmul.f32 0.25, %v5451_v8  ;;  %v5090_v1 = vrot.slane %v5076_v57, %v9048_v49 }
 0x44f   : > { %v5740_v21 = vrot.slane %v5513_v59, %v9057_v55  ;;  %v5091_v48 = vcombine.high %v5083_v40, %v5083_v40  ;;  %v6280_v33 = vrot.slane %v5083_v40, 9  ;;  %v4847_v42 = vmax.f32 %v4815_v28, 0.0 }
 0x450   : > { %v5516_v24 = vmul.f32 0.25, %v5452_v22  ;;  %v5744_v32 = vrot.slane %v5514_v15, %v9057_v55  ;;  %v5748_v38 = vrot.slane %v5515_v45, %v9057_v55  ;;  %v5092_v54 = vcombine.high %v5090_v1, %v5090_v1 }
 0x451   : > { %v6281_v30 = vrot.slane %v5091_v48, 9  ;;  %v6282_v61 = vrot.slane %v5090_v1, 9  ;;  %v4867_v23 = vadd.f32 %v4847_v42, %v4845_v4  ;;  %v5756_v19 = vrot.slane %v5517_v25, %v9057_v55 }
 0x452   : > { %v5752_v51 = vrot.slane %v5516_v24, %v9057_v55  ;;  %v5900_v0 = vsel %vm5865_vm0, %v5744_v32, %v5740_v21  ;;  %v5461_v52 = vadd.f32 %v6280_v33, %v5083_v40  ;;  %v5760_v2 = vrot.slane %v5518_v35, %v9057_v55 }
 0x453   : > { %v5901_v6 = vsel %vm5867_vm1, %v5748_v38, %v5900_v0  ;;  %v6283_v29 = vrot.slane %v5092_v54, 9  ;;  %v5462_v26 = vadd.f32 %v6281_v30, %v5091_v48  ;;  %v5463_v60 = vadd.f32 %v6282_v61, %v5090_v1  ;;  %v4728_v1 = vpop.f32.mrf.mxu1 }
 0x454   : > { %v5902_v11 = vsel %vm5869_vm2, %v5752_v51, %v5901_v6  ;;  %v5059_v50 = vcombine.high %v4867_v23, %v4867_v23  ;;  %v5066_v7 = vrot.slane %v4867_v23, %v9048_v49  ;;  %v5764_v44 = vrot.slane %v5519_v17, %v9057_v55 }
 0x455   : > { %v5768_v43 = vrot.slane %v5520_v20, %v9057_v55  ;;  %v5903_v3 = vsel %vm5871_vm3, %v5756_v19, %v5902_v11  ;;  %v4714_v18 = vadd.f32 %v6552_v39, %v9008_v14  ;;  %v5525_v31 = vmul.f32 0.25, %v5461_v52  ;;  %v6561_v23 = vpop.f32.mrf.mxu1 }
 0x456   : > { %v5904_v53 = vsel %vm5873_vm4, %v5760_v2, %v5903_v3  ;;  %v5073_v47 = vrot.slane %v5059_v50, %v9048_v49  ;;  %v5074_v4 = vcombine.high %v5066_v7, %v5066_v7  ;;  %v5464_v35 = vadd.f32 %v6283_v29, %v5092_v54 }
 0x457   : > { %v5905_v25 = vsel %vm5875_vm5, %v5764_v44, %v5904_v53  ;;  %v5526_v41 = vmul.f32 0.25, %v5462_v26  ;;  %v6276_v16 = vrot.slane %v5066_v7, 9  ;;  %v5527_v8 = vmul.f32 0.25, %v5463_v60 }
 0x458   : > { %v5906_v46 = vsel %vm5877_vm6, %v5768_v43, %v5905_v25  ;;  %v5075_v57 = vcombine.high %v5073_v47, %v5073_v47  ;;  %v6277_v17 = vrot.slane %v5074_v4, 9  ;;  %v6278_v59 = vrot.slane %v5073_v47, 9 }
 0x459   : > { %5940 = vst [vmem:[%s9106_s14 + $0x20] sm:$0xff] %v5906_v46  ;;  %v5457_v14 = vadd.f32 %v6276_v16, %v5066_v7  ;;  %v4779_v39 = vmul.f32 %v9025_v37, %v4714_v18  ;;  %v4709_v40 = vadd.f32 %v9226_v13, %v9005_v27  ;;  %v4724_v15 = vadd.f32 %v6555_v12, %v9014_v63 }
 0x45a   : > { %v6279_v28 = vrot.slane %v5075_v57, 9  ;;  %v5458_v22 = vadd.f32 %v6277_v17, %v5074_v4  ;;  %v4719_v45 = vadd.f32 %v4718_v34, %v9011_v56  ;;  %v5459_v21 = vadd.f32 %v6278_v59, %v5073_v47 }
 0x45b   : > { %v5521_v48 = vmul.f32 0.25, %v5457_v14  ;;  %v4818_v33 = vadd.f32 %v9034_v10, %v4779_v39  ;;  %v4778_v42 = vmul.f32 %v9025_v37, %v4709_v40  ;;  %v4781_v38 = vmul.f32 %v9025_v37, %v4724_v15 }
 0x45c   : > { %v5460_v24 = vadd.f32 %v6279_v28, %v5075_v57  ;;  %v5522_v32 = vmul.f32 0.25, %v5458_v22  ;;  %v4780_v54 = vmul.f32 %v9025_v37, %v4719_v45  ;;  %v5528_v27 = vmul.f32 0.25, %v5464_v35 }
 0x45d   : > { %v5523_v13 = vmul.f32 0.25, %v5459_v21  ;;  %v5772_v20 = vrot.slane %v5521_v48, %v9057_v55  ;;  %v4817_v63 = vadd.f32 %v9034_v10, %v4778_v42  ;;  %v4820_v30 = vadd.f32 %v9034_v10, %v4781_v38 }
 0x45e   : > { %v5524_v56 = vmul.f32 0.25, %v5460_v24  ;;  %v5776_v12 = vrot.slane %v5522_v32, %v9057_v55  ;;  %v4819_v61 = vadd.f32 %v9034_v10, %v4780_v54  ;;  %v4850_v51 = vmax.f32 %v4818_v33, 0.0 }
 0x45f   : > { %v5780_v19 = vrot.slane %v5523_v13, %v9057_v55  ;;  %v4849_v0 = vmax.f32 %v4817_v63, 0.0  ;;  %v4734_v52 = vadd.f32 %v6558_v5, %v9020_v62  ;;  %v4852_v6 = vmax.f32 %v4820_v30, 0.0  ;;  %v4738_v5 = vpop.f32.mrf.mxu1 }
 0x460   : > { %v5784_v34 = vrot.slane %v5524_v56, %v9057_v55  ;;  %v5907_v2 = vsel %vm5865_vm0, %v5776_v12, %v5772_v20  ;;  %v4851_v29 = vmax.f32 %v4819_v61, 0.0  ;;  %v5788_v26 = vrot.slane %v5525_v31, %v9057_v55 }
 0x461   : > { %v5908_v11 = vsel %vm5867_vm1, %v5780_v19, %v5907_v2  ;;  %v4729_v60 = vadd.f32 %v4728_v1, %v9017_v9  ;;  %v4744_v50 = vadd.f32 %v6561_v23, %v9040_v36  ;;  %v5792_v7 = vrot.slane %v5526_v41, %v9057_v55 }
 0x462   : > { %v5909_v44 = vsel %vm5869_vm2, %v5784_v34, %v5908_v11  ;;  %v4870_v43 = vadd.f32 %v4852_v6, %v4850_v51  ;;  %v4869_v62 = vadd.f32 %v4851_v29, %v4849_v0  ;;  %v5796_v3 = vrot.slane %v5527_v8, %v9057_v55  ;;  %v6623_v6 = vld [vmem:[%s9390_s5] ss:$0 sm:$0xff] }
 0x463   : > { %v5800_v18 = vrot.slane %v5528_v27, %v9057_v55  ;;  %v5910_v53 = vsel %vm5871_vm3, %v5788_v26, %v5909_v44  ;;  %v4783_v31 = vmul.f32 %v9025_v37, %v4734_v52  ;;  %v4782_v41 = vmul.f32 %v9025_v37, %v4729_v60 }
 0x464   : > { %v5911_v47 = vsel %vm5873_vm4, %v5792_v7, %v5910_v53  ;;  %v5110_v9 = vcombine.high %v4870_v43, %v4870_v43  ;;  %v5117_v36 = vrot.slane %v4870_v43, %v9048_v49  ;;  %v5093_v4 = vcombine.high %v4869_v62, %v4869_v62  ;;  %v6624_v7 = vld [vmem:[%s9391_s6] ss:$0 sm:$0xff] }
 0x465   : > { %v5912_v25 = vsel %vm5875_vm5, %v5796_v3, %v5911_v47  ;;  %v5100_v35 = vrot.slane %v4869_v62, %v9048_v49  ;;  %v4785_v16 = vmul.f32 %v9025_v37, %v4744_v50  ;;  %v4739_v40 = vadd.f32 %v4738_v5, %v9028_v58 }
 0x466   : > { %v5913_v46 = vsel %vm5877_vm6, %v5800_v18, %v5912_v25  ;;  %v5124_v8 = vrot.slane %v5110_v9, %v9048_v49  ;;  %v5125_v57 = vcombine.high %v5117_v36, %v5117_v36  ;;  %v6288_v17 = vrot.slane %v5117_v36, 9 }
 0x467   : > { %5941 = vst [vmem:[%s9106_s14 + $0x28] sm:$0xff] %v5913_v46  ;;  %v5107_v59 = vrot.slane %v5093_v4, %v9048_v49  ;;  %v5108_v14 = vcombine.high %v5100_v35, %v5100_v35  ;;  %v6284_v39 = vrot.slane %v5100_v35, 9  ;;  %v4822_v45 = vadd.f32 %v9034_v10, %v4783_v31 }
 0x468   : > { %v5126_v28 = vcombine.high %v5124_v8, %v5124_v8  ;;  %v6289_v22 = vrot.slane %v5125_v57, 9  ;;  %v6290_v15 = vrot.slane %v5124_v8, 9  ;;  %v5469_v42 = vadd.f32 %v6288_v17, %v5117_v36 }
 0x469   : > { %v5109_v1 = vcombine.high %v5107_v59, %v5107_v59  ;;  %v6285_v37 = vrot.slane %v5108_v14, 9  ;;  %v6286_v21 = vrot.slane %v5107_v59, 9  ;;  %v5465_v48 = vadd.f32 %v6284_v39, %v5100_v35 }
 0x46a   : > { %v6291_v33 = vrot.slane %v5126_v28, 9  ;;  %v5470_v24 = vadd.f32 %v6289_v22, %v5125_v57  ;;  %v4824_v32 = vadd.f32 %v9034_v10, %v4785_v16  ;;  %v5471_v20 = vadd.f32 %v6290_v15, %v5124_v8 }
 0x46b   : > { %v6287_v38 = vrot.slane %v5109_v1, 9  ;;  %v5466_v54 = vadd.f32 %v6285_v37, %v5108_v14  ;;  %v5467_v27 = vadd.f32 %v6286_v21, %v5107_v59  ;;  %v5529_v13 = vmul.f32 0.25, %v5465_v48 }
 0x46c   : > { %v4854_v58 = vmax.f32 %v4822_v45, 0.0  ;;  %v4821_v63 = vadd.f32 %v9034_v10, %v4782_v41  ;;  %v5472_v56 = vadd.f32 %v6291_v33, %v5126_v28  ;;  %v5533_v23 = vmul.f32 0.25, %v5469_v42 }
 0x46d   : > { %v5468_v12 = vadd.f32 %v6287_v38, %v5109_v1  ;;  %v5530_v30 = vmul.f32 0.25, %v5466_v54  ;;  %v5531_v61 = vmul.f32 0.25, %v5467_v27  ;;  %v5534_v19 = vmul.f32 0.25, %v5470_v24 }
 0x46e   : > { %v5804_v51 = vrot.slane %v5529_v13, %v9057_v55  ;;  %v4856_v0 = vmax.f32 %v4824_v32, 0.0  ;;  %v4784_v29 = vmul.f32 %v6623_v6, %v4739_v40  ;;  %v5535_v10 = vmul.f32 0.25, %v5471_v20 }
 0x46f   : > { %v5532_v52 = vmul.f32 0.25, %v5468_v12  ;;  %v5808_v34 = vrot.slane %v5530_v30, %v9057_v55  ;;  %v5812_v2 = vrot.slane %v5531_v61, %v9057_v55  ;;  %v5536_v11 = vmul.f32 0.25, %v5472_v56 }
 0x470   : > { %v4872_v26 = vadd.f32 %v4856_v0, %v4854_v58  ;;  %v4823_v44 = vadd.f32 %v6624_v7, %v4784_v29  ;;  %v5820_v43 = vrot.slane %v5533_v23, %v9057_v55  ;;  %v5824_v53 = vrot.slane %v5534_v19, %v9057_v55 }
 0x471   : > { %v5816_v60 = vrot.slane %v5532_v52, %v9057_v55  ;;  %v5914_v50 = vsel %vm5865_vm0, %v5808_v34, %v5804_v51  ;;  %v4853_v47 = vmax.f32 %v4821_v63, 0.0  ;;  %v5828_v36 = vrot.slane %v5535_v10, %v9057_v55 }
 0x472   : > { %v5915_v62 = vsel %vm5867_vm1, %v5812_v2, %v5914_v50  ;;  %v5144_v3 = vcombine.high %v4872_v26, %v4872_v26  ;;  %v5151_v18 = vrot.slane %v4872_v26, %v9048_v49  ;;  %v4855_v9 = vmax.f32 %v4823_v44, 0.0 }
 0x473   : > { %v5916_v31 = vsel %vm5869_vm2, %v5816_v60, %v5915_v62  ;;  %v5832_v35 = vrot.slane %v5536_v11, %v9057_v55 }
 0x474   : > { %v5917_v4 = vsel %vm5871_vm3, %v5820_v43, %v5916_v31  ;;  %v5158_v5 = vrot.slane %v5144_v3, %v9048_v49  ;;  %v5159_v25 = vcombine.high %v5151_v18, %v5151_v18  ;;  %v4871_v16 = vadd.f32 %v4855_v9, %v4853_v47 }
 0x475   : > { %v5918_v41 = vsel %vm5873_vm4, %v5824_v53, %v5917_v4  ;;  %v6296_v14 = vrot.slane %v5151_v18, 9 }
 0x476   : > { %v5919_v46 = vsel %vm5875_vm5, %v5828_v36, %v5918_v41  ;;  %v5160_v57 = vcombine.high %v5158_v5, %v5158_v5  ;;  %v5127_v17 = vcombine.high %v4871_v16, %v4871_v16  ;;  %v5134_v59 = vrot.slane %v4871_v16, %v9048_v49 }
 0x477   : > { %v5920_v8 = vsel %vm5877_vm6, %v5832_v35, %v5919_v46  ;;  %v6297_v39 = vrot.slane %v5159_v25, 9  ;;  %v6298_v15 = vrot.slane %v5158_v5, 9  ;;  %v5477_v48 = vadd.f32 %v6296_v14, %v5151_v18 }
 0x478   : > { %5942 = vst [vmem:[%s9106_s14 + $0x30] sm:$0xff] %v5920_v8  ;;  %v5141_v40 = vrot.slane %v5127_v17, %v9048_v49  ;;  %v5142_v28 = vcombine.high %v5134_v59, %v5134_v59  ;;  %v6292_v22 = vrot.slane %v5134_v59, 9  ;;  %v6299_v45 = vrot.slane %v5160_v57, 9 }
 0x479   : > { %v5478_v33 = vadd.f32 %v6297_v39, %v5159_v25  ;;  %v5479_v54 = vadd.f32 %v6298_v15, %v5158_v5  ;;  %v5541_v63 = vmul.f32 0.25, %v5477_v48 }
 0x47a   : > { %v5143_v1 = vcombine.high %v5141_v40, %v5141_v40  ;;  %v6293_v37 = vrot.slane %v5142_v28, 9  ;;  %v6294_v21 = vrot.slane %v5141_v40, 9  ;;  %v5473_v42 = vadd.f32 %v6292_v22, %v5134_v59 }
 0x47b   : > { %v5480_v13 = vadd.f32 %v6299_v45, %v5160_v57  ;;  %v5542_v56 = vmul.f32 0.25, %v5478_v33  ;;  %v5543_v19 = vmul.f32 0.25, %v5479_v54  ;;  %v5852_v34 = vrot.slane %v5541_v63, %v9057_v55 }
 0x47c   : > { %v6295_v24 = vrot.slane %v5143_v1, 9  ;;  %v5474_v32 = vadd.f32 %v6293_v37, %v5142_v28  ;;  %v5475_v38 = vadd.f32 %v6294_v21, %v5141_v40  ;;  %v5537_v27 = vmul.f32 0.25, %v5473_v42 }
 0x47d   : > { %v5544_v51 = vmul.f32 0.25, %v5480_v13  ;;  %v5856_v6 = vrot.slane %v5542_v56, %v9057_v55  ;;  %v5860_v10 = vrot.slane %v5543_v19, %v9057_v55 }
 0x47e   : > { %v5476_v20 = vadd.f32 %v6295_v24, %v5143_v1  ;;  %v5538_v49 = vmul.f32 0.25, %v5474_v32  ;;  %v5539_v58 = vmul.f32 0.25, %v5475_v38  ;;  %v5836_v30 = vrot.slane %v5537_v27, %v9057_v55 }
 0x47f   : > { %v5864_v11 = vrot.slane %v5544_v51, %v9057_v55 }
 0x480   : > { %v5540_v12 = vmul.f32 0.25, %v5476_v20  ;;  %v5840_v61 = vrot.slane %v5538_v49, %v9057_v55  ;;  %v5844_v23 = vrot.slane %v5539_v58, %v9057_v55 }
 0x482   : > { %v5848_v0 = vrot.slane %v5540_v12, %v9057_v55  ;;  %v5921_v52 = vsel %vm5865_vm0, %v5840_v61, %v5836_v30 }
 0x483   : > { %v5922_v2 = vsel %vm5867_vm1, %v5844_v23, %v5921_v52 }
 0x484   : > { %v5923_v29 = vsel %vm5869_vm2, %v5848_v0, %v5922_v2 }
 0x485   : > { %v5924_v26 = vsel %vm5871_vm3, %v5852_v34, %v5923_v29 }
 0x486   : > { %v5925_v60 = vsel %vm5873_vm4, %v5856_v6, %v5924_v26 }
 0x487   : > { %v5926_v50 = vsel %vm5875_vm5, %v5860_v10, %v5925_v60 }
 0x488   : > { %v5927_v7 = vsel %vm5877_vm6, %v5864_v11, %v5926_v50 }
 0x489   : > { %5943 = vst [vmem:[%s9106_s14 + $0x38] sm:$0xff] %v5927_v7 }
 0x48a   : > { %6664 = shalt.err (!%p6661_p0)
}
 0x48b   : > { %s6665_s9 = scalar_lea.hbm %s9336_s29, 1024  ;;  %s6669_s17 = scalar_lea.hbm %s9392_s7, 2048 }
 0x48c   : > { %p6666_p1 = scmp.ne.s32.totalorder %s9336_s29, %s6665_s9  ;;  %p6670_p4 = scmp.lt.s32.totalorder %s9336_s29, %s9392_s7 }
 0x48d   : > { %p6671_p7 = scmp.lt.s32.totalorder %s6669_s17, %s6665_s9 }
 0x48e   : > { %p6667_p2 = pnand %p6666_p1, %p6803_p5 }
 0x48f   : > { %p6672_p6 = por %p6671_p7, %p6670_p4 }
 0x490   : > { %p6668_p3 = pneg %p6667_p2 }
 0x492   : > { %p6673_p8 = pnand %p6672_p6, %p6668_p3 }
 0x494   : > { %6676 = shalt.err (!%p6673_p8)
}
 0x495   : > { %s6723_s21 = smov 128   ;;  %s6724_s23 = smov 8  }
 0x496   : > { %6567 = dma.vmem_to_hbm [thread:$0]  (%p6803_p5), %s9338_s20, 1024, %s9336_s29, %s9345_s28, %s6723_s21, %s6723_s21, %s6724_s23  }
 0x497 PF: > { %p6579_p9 = scmp.ge.s32.totalorder %s6715_s27, 2  ;;  %s5973_s22 = sand.u32 1, %s6703_s24  }
 0x498   : > { %p9508_p10 = scmp.ne.s32.totalorder %s9438_s12, 0  ;;  %s5974_s8 = scalar_lea.sflag [#allocation6], %s5973_s22 }
 0x49a   : > { %p6574_p11 = pnand %p6579_p9, %p9508_p10 }
 0x49c   : > { %p6575_p12 = pneg %p6574_p11 }
 0x49e   : > { %6698 = dma.done.wait (%p6575_p12), %s5974_s8, 1024  }
 0x49f   : > { %6700 = vsyncadd (%p6575_p12), %s5974_s8, 4294966272  ;;  %p18_p13 = scmp.ge.s32.totalorder %s6790_s30, 4   ;;  %s9509_s24 = smov %s6707_s25 }
 0x4a0   : > { %s9510_s25 = smov %s6711_s26  ;;  %s9511_s26 = smov %s6801_s10 }
 0x4a1   : > { %s9512_s27 = smov %s6790_s30  ;;  %20 = sbr.rel (!%p18_p13) target bundleno = 4 (0x4), region = 93 }
 0x4a6   :  { %5979 = vsyncpa [#allocation5], 1 }
 0x4a7   :  { %5981 = vsyncpa [#allocation5 + $0x1], 1 }
 0x4a8   :  { %5982 = vsyncpa [#allocation6], 1 }
 0x4a9   :  { %5984 = vsyncpa [#allocation6 + $0x1], 1 }

</bundles_post_ra>
